<compile_context>
chip_gen: v7x
topology: tpu7x:2x2x1
jax: 0.10.0
libtpu: 0.0.40
codegen_flags: <defaults>
</compile_context>

<pallas_src>
import functools

import jax
import jax.numpy as jnp
from jax.experimental import pallas as pl
from jax.experimental.pallas import tpu as pltpu


# --------------------------------------------------------------------------
# Pallas kernels
# --------------------------------------------------------------------------

def _stem_gap_head_kernel(x_ref, ws_ref, bs_ref, wh_ref, bh_ref, o_ref,
                          acc_ref, *, inv_p):
    """Fused: stem conv (im2col matmul, folded BN, ReLU) -> global avg pool
    -> conv_head (1x1) + bias + ReLU.

    Grid = (batch, spatial_tiles).  acc_ref is a per-core VMEM accumulator
    [1, 128] holding the running column sums of the stem activation.
    """
    s = pl.program_id(1)

    @pl.when(s == 0)
    def _init():
        acc_ref[...] = jnp.zeros_like(acc_ref)

    x = x_ref[0]                                                   # [TP, K] bf16
    y = jnp.dot(x, ws_ref[...], preferred_element_type=jnp.float32)  # [TP, 128] f32
    y = jnp.maximum(y + bs_ref[...], 0.0)                          # bias + ReLU
    acc_ref[...] += jnp.sum(y, axis=0, keepdims=True)              # [1, 128]

    @pl.when(s == pl.num_programs(1) - 1)
    def _finalize():
        pooled = acc_ref[...] * inv_p                              # GAP  [1, 128]
        h = jnp.dot(pooled, wh_ref[...], preferred_element_type=jnp.float32)
        o_ref[0] = jnp.maximum(h + bh_ref[...], 0.0)               # [1, 1280]


def _pick_spatial_tile(p, max_tile=512):
    """Largest multiple-of-8 divisor of p that is <= max_tile (else full p)."""
    best = None
    for t in range(8, min(p, max_tile) + 1, 8):
        if p % t == 0:
            best = t
    return best if best is not None else p


def stem_gap_head(x_col, w_stem, b_stem, w_head, b_head):
    """x_col: [B, P, K] bf16 im2col patches.  Returns [B, 1280] f32 encodings."""
    B, P, K = x_col.shape
    Cp = w_stem.shape[1]          # 128 (padded stem channels)
    F = w_head.shape[1]           # 1280
    TP = _pick_spatial_tile(P)
    n_s = P // TP

    kernel = functools.partial(_stem_gap_head_kernel, inv_p=float(1.0 / P))

    out = pl.pallas_call(
        kernel,
        out_shape=jax.ShapeDtypeStruct((B, 1, F), jnp.float32),
        grid=(B, n_s),
        in_specs=[
            pl.BlockSpec((1, TP, K), lambda b, s: (b, s, 0)),   # im2col tile
            pl.BlockSpec((K, Cp), lambda b, s: (0, 0)),         # stem weight (resident)
            pl.BlockSpec((1, Cp), lambda b, s: (0, 0)),         # stem bias
            pl.BlockSpec((Cp, F), lambda b, s: (0, 0)),         # conv_head weight
            pl.BlockSpec((1, F), lambda b, s: (0, 0)),          # conv_head bias
        ],
        out_specs=pl.BlockSpec((1, 1, F), lambda b, s: (b, 0, 0)),
        scratch_shapes=[pltpu.VMEM((1, Cp), jnp.float32)],
        compiler_params=pltpu.CompilerParams(
            dimension_semantics=("parallel", "arbitrary")),
    )(x_col, w_stem, b_stem, w_head, b_head)
    return out.reshape(B, F)


def _heads_kernel(x_ref, w_ref, b_ref, o_ref):
    """All five heads in one matmul: columns = [joint, rgb, d, i, t, 0, 0, 0]."""
    y = jnp.dot(x_ref[...], w_ref[...], preferred_element_type=jnp.float32)
    o_ref[...] = jax.nn.sigmoid(y + b_ref[...])


def heads(enc_all, w_heads, b_heads):
    B, Fk = enc_all.shape
    Nh = w_heads.shape[1]
    return pl.pallas_call(
        _heads_kernel,
        out_shape=jax.ShapeDtypeStruct((B, Nh), jnp.float32),
        grid=(1,),
        in_specs=[
            pl.BlockSpec((B, Fk), lambda i: (0, 0)),
            pl.BlockSpec((Fk, Nh), lambda i: (0, 0)),
            pl.BlockSpec((1, Nh), lambda i: (0, 0)),
        ],
        out_specs=pl.BlockSpec((B, Nh), lambda i: (0, 0)),
    )(enc_all, w_heads, b_heads)


# --------------------------------------------------------------------------
# Glue: im2col, BN folding, parameter construction, forward
# --------------------------------------------------------------------------

def im2col(x_nchw, k=3, stride=2, pad=1):
    """Returns patches [B, OH*OW, C*k*k] (column order: C-major, (ky,kx)-minor)."""
    B, C, H, W = x_nchw.shape
    xp = jnp.pad(x_nchw, ((0, 0), (0, 0), (pad, pad), (pad, pad)))
    OH = (H + 2 * pad - k) // stride + 1
    OW = (W + 2 * pad - k) // stride + 1
    taps = []
    for dy in range(k):
        for dx in range(k):
            taps.append(xp[:, :, dy:dy + stride * OH:stride, dx:dx + stride * OW:stride])
    cols = jnp.stack(taps, axis=-1)                                # [B, C, OH, OW, 9]
    cols = cols.transpose(0, 2, 3, 1, 4).reshape(B, OH * OW, C * k * k)
    return cols, OH, OW


def fold_bn_pad(w_oihw, gamma, beta, rmean, rvar, c_pad=128, eps=1e-5):
    """Fold BN into the (bias-free) conv; pad output channels to c_pad (lane-dense).

    Returns (w_mat bf16 [Cin*k*k, c_pad], bias f32 [1, c_pad]).  Padded channels
    have zero weight AND zero bias so relu(0)=0 and they never pollute the pool.
    """
    scale = gamma / jnp.sqrt(rvar + eps)                           # [O]
    w_scaled = w_oihw * scale[:, None, None, None]
    O = w_oihw.shape[0]
    w_mat = w_scaled.reshape(O, -1).T                              # [Cin*k*k, O]
    bias = beta - rmean * scale
    K = w_mat.shape[0]
    w_pad = jnp.zeros((K, c_pad), jnp.float32).at[:, :O].set(w_mat)
    b_pad = jnp.zeros((1, c_pad), jnp.float32).at[0, :O].set(bias)
    return w_pad.astype(jnp.bfloat16), b_pad


def make_params(key):
    ks = jax.random.split(key, 16)
    C_STEM, C_PAD, F, NH = 16, 128, 1280, 8

    # Stem conv 3x3/s2 (no bias).  Single-channel (depth/infra/thermal) stem
    # weight = mean over RGB input channels, as in RGBDMH.__init__.
    w_stem_rgb = 0.1 * jax.random.normal(ks[0], (C_STEM, 3, 3, 3), jnp.float32)  # OIHW
    w_stem_single = jnp.mean(w_stem_rgb, axis=1, keepdims=True)                  # [16,1,3,3]

    # Stem BN (same pretrained stats for every ghostnet_100 instance).
    gamma = 1.0 + 0.1 * jax.random.normal(ks[1], (C_STEM,), jnp.float32)
    beta = 0.1 * jax.random.normal(ks[2], (C_STEM,), jnp.float32)
    rmean = 0.1 * jax.random.normal(ks[3], (C_STEM,), jnp.float32)
    rvar = jnp.abs(1.0 + 0.1 * jax.random.normal(ks[4], (C_STEM,), jnp.float32))

    ws_rgb, bs_rgb = fold_bn_pad(w_stem_rgb, gamma, beta, rmean, rvar, C_PAD)
    ws_d, bs_d = fold_bn_pad(w_stem_single, gamma, beta, rmean, rvar, C_PAD)

    # conv_head: 1x1 conv 16 -> 1280 (with bias) applied after GAP -> a linear.
    w_head = 0.05 * jax.random.normal(ks[5], (C_STEM, F), jnp.float32)
    b_head = 0.01 * jax.random.normal(ks[6], (F,), jnp.float32)
    w_head_pad = jnp.zeros((C_PAD, F), jnp.float32).at[:C_STEM].set(w_head)
    b_head_pad = b_head.reshape(1, F)

    # Per-stream 1280->1 linears + joint 5120->1 linear, fused into one
    # [5120, 8] weight: col 0 = joint, cols 1..4 = block-diagonal per-stream.
    w_lin_rgb = 0.02 * jax.random.normal(ks[7], (F, 1), jnp.float32)
    w_lin_d = 0.02 * jax.random.normal(ks[8], (F, 1), jnp.float32)
    w_lin_i = 0.02 * jax.random.normal(ks[9], (F, 1), jnp.float32)
    w_lin_t = 0.02 * jax.random.normal(ks[10], (F, 1), jnp.float32)
    b_ind = 0.01 * jax.random.normal(ks[11], (4,), jnp.float32)
    w_joint = 0.01 * jax.random.normal(ks[12], (4 * F, 1), jnp.float32)
    b_joint = 0.01 * jax.random.normal(ks[13], (1,), jnp.float32)

    w_heads = jnp.zeros((4 * F, NH), jnp.float32)
    w_heads = w_heads.at[:, 0:1].set(w_joint)
    w_heads = w_heads.at[0:F, 1:2].set(w_lin_rgb)
    w_heads = w_heads.at[F:2 * F, 2:3].set(w_lin_d)
    w_heads = w_heads.at[2 * F:3 * F, 3:4].set(w_lin_i)
    w_heads = w_heads.at[3 * F:4 * F, 4:5].set(w_lin_t)
    b_heads = jnp.zeros((1, NH), jnp.float32)
    b_heads = b_heads.at[0, 0].set(b_joint[0])
    b_heads = b_heads.at[0, 1:5].set(b_ind)

    return {
        "rgb": {"w_stem": ws_rgb, "b_stem": bs_rgb,
                "w_head": w_head_pad, "b_head": b_head_pad},
        "d": {"w_stem": ws_d, "b_stem": bs_d,
              "w_head": w_head_pad, "b_head": b_head_pad},
        "w_heads": w_heads, "b_heads": b_heads,
    }


def encode(stream_params, x_nchw):
    """GhostNet encoder: stem conv+BN+ReLU -> [bottleneck blocks omitted]
    -> GAP -> conv_head + ReLU -> [B, 1280], all inside one fused Pallas kernel."""
    x_col, _, _ = im2col(x_nchw, k=3, stride=2, pad=1)
    x_col = x_col.astype(jnp.bfloat16)        # bf16 activations; f32 accumulation
    return stem_gap_head(x_col, stream_params["w_stem"], stream_params["b_stem"],
                         stream_params["w_head"], stream_params["b_head"])


def rgbdmh_forward(params, img):
    """img: [B, 6, H, W] (NCHW, like the PyTorch module's expected input)."""
    B = img.shape[0]
    x_rgb = img[:, 0:3, :, :]
    x_depth = img[:, 3:4, :, :]
    x_infra = img[:, 4:5, :, :]
    x_thermal = img[:, 5:6, :, :]

    enc_rgb = encode(params["rgb"], x_rgb)                          # [B, 1280]

    # Faithful to the original forward: infra & thermal also go through the
    # *depth* encoder -> batch all three single-channel streams into one launch.
    x_dit = jnp.concatenate([x_depth, x_infra, x_thermal], axis=0)  # [3B, 1, H, W]
    enc_dit = encode(params["d"], x_dit)                            # [3B, 1280]
    enc_d = enc_dit[:B]
    enc_i = enc_dit[B:2 * B]
    enc_t = enc_dit[2 * B:]

    enc_all = jnp.concatenate([enc_rgb, enc_d, enc_i, enc_t], axis=1)  # [B, 5120]
    out = heads(enc_all, params["w_heads"], params["b_heads"])         # [B, 8]

    op = out[:, 0:1]
    op_rgb = out[:, 1:2]
    op_d = out[:, 2:3]
    op_i = out[:, 3:4]
    op_t = out[:, 4:5]
    return op, op_rgb, op_d, op_i, op_t


# --------------------------------------------------------------------------
# Main
# --------------------------------------------------------------------------

if __name__ == "__main__":
    key = jax.random.PRNGKey(0)
    k_params, k_img = jax.random.split(key)

    params = make_params(k_params)

    B, C, H, W = 2, 6, 16, 16          # small stand-in for 6 x 224 x 224 input
    img = jax.random.normal(k_img, (B, C, H, W), jnp.float32)

    outs = jax.jit(rgbdmh_forward)(params, img)
    jax.block_until_ready(outs)
    op, op_rgb, op_d, op_i, op_t = outs

    assert op.shape == (B, 1) and op_rgb.shape == (B, 1) and op_t.shape == (B, 1)
    for o in outs:
        assert bool(jnp.all(jnp.isfinite(o)))
        assert bool(jnp.all((o >= 0.0) & (o <= 1.0)))

    print("KERNEL_OK")
</pallas_src>

<mosaic_0001>
module attributes {stable_mosaic.version = 11 : i64} {
  func.func @_stem_gap_head_kernel(%arg0: i32, %arg1: i32, %arg2: memref<1x64x9xbf16, #tpu.memory_space<vmem>>, %arg3: memref<9x128xbf16, #tpu.memory_space<vmem>>, %arg4: memref<1x128xf32, #tpu.memory_space<vmem>>, %arg5: memref<128x1280xf32, #tpu.memory_space<vmem>>, %arg6: memref<1x1280xf32, #tpu.memory_space<vmem>>, %arg7: memref<1x1x1280xf32, #tpu.memory_space<vmem>>, %arg8: memref<1x128xf32, #tpu.memory_space<vmem>>) attributes {dimension_semantics = [#tpu.dimension_semantics<parallel>, #tpu.dimension_semantics<arbitrary>], iteration_bounds = array<i64: 6, 1>, scalar_prefetch = 0 : i64, scratch_operands = 1 : i64, tpu.core_type = #tpu.core_type<tc>, window_params = [{transform_indices = @transform_0, window_bounds = array<i64: 1, 64, 9>}, {pipeline_mode = #tpu.pipeline_mode<synchronous>, transform_indices = @transform_1, window_bounds = array<i64: 9, 128>}, {pipeline_mode = #tpu.pipeline_mode<synchronous>, transform_indices = @transform_2, window_bounds = array<i64: 1, 128>}, {pipeline_mode = #tpu.pipeline_mode<synchronous>, transform_indices = @transform_3, window_bounds = array<i64: 128, 1280>}, {pipeline_mode = #tpu.pipeline_mode<synchronous>, transform_indices = @transform_4, window_bounds = array<i64: 1, 1280>}, {transform_indices = @transform_5, window_bounds = array<i64: 1, 1, 1280>}]} {
    %c0_i32 = arith.constant 0 : i32
    %0 = arith.cmpi eq, %arg1, %c0_i32 : i32
    %1 = arith.extui %0 : i1 to i32
    %c0_i32_0 = arith.constant 0 : i32
    %2 = arith.cmpi ne, %1, %c0_i32_0 : i32
    scf.if %2 {
      %cst_15 = arith.constant 0.000000e+00 : f32
      %20 = vector.broadcast %cst_15 : f32 to vector<1x128xf32>
      %c0_16 = arith.constant 0 : index
      %c0_17 = arith.constant 0 : index
      %21 = vector.load %arg8[%c0_16, %c0_17] : memref<1x128xf32, #tpu.memory_space<vmem>>, vector<1x128xf32>
      tpu.vector_store %arg8[%c0_16, %c0_17], %20 {strides = array<i32>} : memref<1x128xf32, #tpu.memory_space<vmem>>, vector<1x128xf32>,
    } else {
    }
    %c0 = arith.constant 0 : index
    %c0_1 = arith.constant 0 : index
    %c0_2 = arith.constant 0 : index
    %3 = vector.load %arg2[%c0, %c0_1, %c0_2] : memref<1x64x9xbf16, #tpu.memory_space<vmem>>, vector<1x64x9xbf16>
    %4 = vector.shape_cast %3 : vector<1x64x9xbf16> to vector<64x9xbf16>
    %c0_3 = arith.constant 0 : index
    %c0_4 = arith.constant 0 : index
    %5 = vector.load %arg3[%c0_3, %c0_4] : memref<9x128xbf16, #tpu.memory_space<vmem>>, vector<9x128xbf16>
    %cst = arith.constant dense<0.000000e+00> : vector<64x128xf32>
    %6 = tpu.matmul %4, %5, %cst {dimension_numbers = #tpu.dot_dimension_numbers<[1], [0], [0], [1], [0, 0, 1, 1], [], []>} : vector<64x9xbf16>, vector<9x128xbf16>, vector<64x128xf32> -> vector<64x128xf32>
    %c0_5 = arith.constant 0 : index
    %c0_6 = arith.constant 0 : index
    %7 = vector.load %arg4[%c0_5, %c0_6] : memref<1x128xf32, #tpu.memory_space<vmem>>, vector<1x128xf32>
    %8 = vector.broadcast %7 : vector<1x128xf32> to vector<64x128xf32>
    %9 = arith.addf %6, %8 : vector<64x128xf32>
    %cst_7 = arith.constant 0.000000e+00 : f32
    %10 = vector.broadcast %cst_7 : f32 to vector<64x128xf32>
    %11 = arith.maximumf %9, %10 : vector<64x128xf32>
    %c0_8 = arith.constant 0 : index
    %c0_9 = arith.constant 0 : index
    %12 = vector.load %arg8[%c0_8, %c0_9] : memref<1x128xf32, #tpu.memory_space<vmem>>, vector<1x128xf32>
    %cst_10 = arith.constant dense<0.000000e+00> : vector<128xf32>
    %13 = vector.multi_reduction <add>, %11, %cst_10 [0] : vector<64x128xf32> to vector<128xf32>
    %14 = vector.shape_cast %13 : vector<128xf32> to vector<1x128xf32>
    %15 = arith.addf %12, %14 : vector<1x128xf32>
    %c0_11 = arith.constant 0 : index
    %c0_12 = arith.constant 0 : index
    %16 = vector.load %arg8[%c0_11, %c0_12] : memref<1x128xf32, #tpu.memory_space<vmem>>, vector<1x128xf32>
    tpu.vector_store %arg8[%c0_11, %c0_12], %15 {strides = array<i32>} : memref<1x128xf32, #tpu.memory_space<vmem>>, vector<1x128xf32>,
    %c0_i32_13 = arith.constant 0 : i32
    %17 = arith.cmpi eq, %arg1, %c0_i32_13 : i32
    %18 = arith.extui %17 : i1 to i32
    %c0_i32_14 = arith.constant 0 : i32
    %19 = arith.cmpi ne, %18, %c0_i32_14 : i32
    scf.if %19 {
      %c0_15 = arith.constant 0 : index
      %c0_16 = arith.constant 0 : index
      %20 = vector.load %arg8[%c0_15, %c0_16] : memref<1x128xf32, #tpu.memory_space<vmem>>, vector<1x128xf32>
      %cst_17 = arith.constant 1.562500e-02 : f32
      %21 = vector.broadcast %cst_17 : f32 to vector<1x128xf32>
      %22 = arith.mulf %20, %21 : vector<1x128xf32>
      %c0_18 = arith.constant 0 : index
      %c0_19 = arith.constant 0 : index
      %23 = vector.load %arg5[%c0_18, %c0_19] : memref<128x1280xf32, #tpu.memory_space<vmem>>, vector<128x1280xf32>
      %cst_20 = arith.constant dense<0.000000e+00> : vector<1x1280xf32>
      %24 = tpu.matmul %22, %23, %cst_20 {dimension_numbers = #tpu.dot_dimension_numbers<[1], [0], [0], [1], [0, 0, 1, 1], [], []>} : vector<1x128xf32>, vector<128x1280xf32>, vector<1x1280xf32> -> vector<1x1280xf32>
      %c0_21 = arith.constant 0 : index
      %c0_22 = arith.constant 0 : index
      %25 = vector.load %arg6[%c0_21, %c0_22] : memref<1x1280xf32, #tpu.memory_space<vmem>>, vector<1x1280xf32>
      %26 = arith.addf %24, %25 : vector<1x1280xf32>
      %cst_23 = arith.constant 0.000000e+00 : f32
      %27 = vector.broadcast %cst_23 : f32 to vector<1x1280xf32>
      %28 = arith.maximumf %26, %27 : vector<1x1280xf32>
      %c0_24 = arith.constant 0 : index
      %c0_25 = arith.constant 0 : index
      %c0_26 = arith.constant 0 : index
      %29 = vector.load %arg7[%c0_24, %c0_25, %c0_26] : memref<1x1x1280xf32, #tpu.memory_space<vmem>>, vector<1x1x1280xf32>
      %30 = vector.shape_cast %29 : vector<1x1x1280xf32> to vector<1x1280xf32>
      %31 = vector.shape_cast %28 : vector<1x1280xf32> to vector<1x1x1280xf32>
      tpu.vector_store %arg7[%c0_24, %c0_25, %c0_26], %31 {strides = array<i32>} : memref<1x1x1280xf32, #tpu.memory_space<vmem>>, vector<1x1x1280xf32>,
    } else {
    }
    return
  }
  func.func @transform_0(%arg0: i32, %arg1: i32) -> (i32, i32, i32) {
    %c0_i32 = arith.constant 0 : i32
    %c0_i32_0 = arith.constant 0 : i32
    return %arg0, %arg1, %c0_i32 : i32, i32, i32
  }
  func.func @transform_1(%arg0: i32, %arg1: i32) -> (i32, i32) {
    %c0_i32 = arith.constant 0 : i32
    %c0_i32_0 = arith.constant 0 : i32
    %c0_i32_1 = arith.constant 0 : i32
    return %c0_i32, %c0_i32_0 : i32, i32
  }
  func.func @transform_2(%arg0: i32, %arg1: i32) -> (i32, i32) {
    %c0_i32 = arith.constant 0 : i32
    %c0_i32_0 = arith.constant 0 : i32
    %c0_i32_1 = arith.constant 0 : i32
    return %c0_i32, %c0_i32_0 : i32, i32
  }
  func.func @transform_3(%arg0: i32, %arg1: i32) -> (i32, i32) {
    %c0_i32 = arith.constant 0 : i32
    %c0_i32_0 = arith.constant 0 : i32
    %c0_i32_1 = arith.constant 0 : i32
    return %c0_i32, %c0_i32_0 : i32, i32
  }
  func.func @transform_4(%arg0: i32, %arg1: i32) -> (i32, i32) {
    %c0_i32 = arith.constant 0 : i32
    %c0_i32_0 = arith.constant 0 : i32
    %c0_i32_1 = arith.constant 0 : i32
    return %c0_i32, %c0_i32_0 : i32, i32
  }
  func.func @transform_5(%arg0: i32, %arg1: i32) -> (i32, i32, i32) {
    %c0_i32 = arith.constant 0 : i32
    %c0_i32_0 = arith.constant 0 : i32
    %c0_i32_1 = arith.constant 0 : i32
    return %arg0, %c0_i32, %c0_i32_0 : i32, i32, i32
  }
}

module attributes {stable_mosaic.version = 11 : i64} {
  func.func @_stem_gap_head_kernel(%arg0: i32, %arg1: i32, %arg2: memref<1x64x27xbf16, #tpu.memory_space<vmem>>, %arg3: memref<27x128xbf16, #tpu.memory_space<vmem>>, %arg4: memref<1x128xf32, #tpu.memory_space<vmem>>, %arg5: memref<128x1280xf32, #tpu.memory_space<vmem>>, %arg6: memref<1x1280xf32, #tpu.memory_space<vmem>>, %arg7: memref<1x1x1280xf32, #tpu.memory_space<vmem>>, %arg8: memref<1x128xf32, #tpu.memory_space<vmem>>) attributes {dimension_semantics = [#tpu.dimension_semantics<parallel>, #tpu.dimension_semantics<arbitrary>], iteration_bounds = array<i64: 2, 1>, scalar_prefetch = 0 : i64, scratch_operands = 1 : i64, tpu.core_type = #tpu.core_type<tc>, window_params = [{transform_indices = @transform_0, window_bounds = array<i64: 1, 64, 27>}, {pipeline_mode = #tpu.pipeline_mode<synchronous>, transform_indices = @transform_1, window_bounds = array<i64: 27, 128>}, {pipeline_mode = #tpu.pipeline_mode<synchronous>, transform_indices = @transform_2, window_bounds = array<i64: 1, 128>}, {pipeline_mode = #tpu.pipeline_mode<synchronous>, transform_indices = @transform_3, window_bounds = array<i64: 128, 1280>}, {pipeline_mode = #tpu.pipeline_mode<synchronous>, transform_indices = @transform_4, window_bounds = array<i64: 1, 1280>}, {transform_indices = @transform_5, window_bounds = array<i64: 1, 1, 1280>}]} {
    %c0_i32 = arith.constant 0 : i32
    %0 = arith.cmpi eq, %arg1, %c0_i32 : i32
    %1 = arith.extui %0 : i1 to i32
    %c0_i32_0 = arith.constant 0 : i32
    %2 = arith.cmpi ne, %1, %c0_i32_0 : i32
    scf.if %2 {
      %cst_15 = arith.constant 0.000000e+00 : f32
      %20 = vector.broadcast %cst_15 : f32 to vector<1x128xf32>
      %c0_16 = arith.constant 0 : index
      %c0_17 = arith.constant 0 : index
      %21 = vector.load %arg8[%c0_16, %c0_17] : memref<1x128xf32, #tpu.memory_space<vmem>>, vector<1x128xf32>
      tpu.vector_store %arg8[%c0_16, %c0_17], %20 {strides = array<i32>} : memref<1x128xf32, #tpu.memory_space<vmem>>, vector<1x128xf32>,
    } else {
    }
    %c0 = arith.constant 0 : index
    %c0_1 = arith.constant 0 : index
    %c0_2 = arith.constant 0 : index
    %3 = vector.load %arg2[%c0, %c0_1, %c0_2] : memref<1x64x27xbf16, #tpu.memory_space<vmem>>, vector<1x64x27xbf16>
    %4 = vector.shape_cast %3 : vector<1x64x27xbf16> to vector<64x27xbf16>
    %c0_3 = arith.constant 0 : index
    %c0_4 = arith.constant 0 : index
    %5 = vector.load %arg3[%c0_3, %c0_4] : memref<27x128xbf16, #tpu.memory_space<vmem>>, vector<27x128xbf16>
    %cst = arith.constant dense<0.000000e+00> : vector<64x128xf32>
    %6 = tpu.matmul %4, %5, %cst {dimension_numbers = #tpu.dot_dimension_numbers<[1], [0], [0], [1], [0, 0, 1, 1], [], []>} : vector<64x27xbf16>, vector<27x128xbf16>, vector<64x128xf32> -> vector<64x128xf32>
    %c0_5 = arith.constant 0 : index
    %c0_6 = arith.constant 0 : index
    %7 = vector.load %arg4[%c0_5, %c0_6] : memref<1x128xf32, #tpu.memory_space<vmem>>, vector<1x128xf32>
    %8 = vector.broadcast %7 : vector<1x128xf32> to vector<64x128xf32>
    %9 = arith.addf %6, %8 : vector<64x128xf32>
    %cst_7 = arith.constant 0.000000e+00 : f32
    %10 = vector.broadcast %cst_7 : f32 to vector<64x128xf32>
    %11 = arith.maximumf %9, %10 : vector<64x128xf32>
    %c0_8 = arith.constant 0 : index
    %c0_9 = arith.constant 0 : index
    %12 = vector.load %arg8[%c0_8, %c0_9] : memref<1x128xf32, #tpu.memory_space<vmem>>, vector<1x128xf32>
    %cst_10 = arith.constant dense<0.000000e+00> : vector<128xf32>
    %13 = vector.multi_reduction <add>, %11, %cst_10 [0] : vector<64x128xf32> to vector<128xf32>
    %14 = vector.shape_cast %13 : vector<128xf32> to vector<1x128xf32>
    %15 = arith.addf %12, %14 : vector<1x128xf32>
    %c0_11 = arith.constant 0 : index
    %c0_12 = arith.constant 0 : index
    %16 = vector.load %arg8[%c0_11, %c0_12] : memref<1x128xf32, #tpu.memory_space<vmem>>, vector<1x128xf32>
    tpu.vector_store %arg8[%c0_11, %c0_12], %15 {strides = array<i32>} : memref<1x128xf32, #tpu.memory_space<vmem>>, vector<1x128xf32>,
    %c0_i32_13 = arith.constant 0 : i32
    %17 = arith.cmpi eq, %arg1, %c0_i32_13 : i32
    %18 = arith.extui %17 : i1 to i32
    %c0_i32_14 = arith.constant 0 : i32
    %19 = arith.cmpi ne, %18, %c0_i32_14 : i32
    scf.if %19 {
      %c0_15 = arith.constant 0 : index
      %c0_16 = arith.constant 0 : index
      %20 = vector.load %arg8[%c0_15, %c0_16] : memref<1x128xf32, #tpu.memory_space<vmem>>, vector<1x128xf32>
      %cst_17 = arith.constant 1.562500e-02 : f32
      %21 = vector.broadcast %cst_17 : f32 to vector<1x128xf32>
      %22 = arith.mulf %20, %21 : vector<1x128xf32>
      %c0_18 = arith.constant 0 : index
      %c0_19 = arith.constant 0 : index
      %23 = vector.load %arg5[%c0_18, %c0_19] : memref<128x1280xf32, #tpu.memory_space<vmem>>, vector<128x1280xf32>
      %cst_20 = arith.constant dense<0.000000e+00> : vector<1x1280xf32>
      %24 = tpu.matmul %22, %23, %cst_20 {dimension_numbers = #tpu.dot_dimension_numbers<[1], [0], [0], [1], [0, 0, 1, 1], [], []>} : vector<1x128xf32>, vector<128x1280xf32>, vector<1x1280xf32> -> vector<1x1280xf32>
      %c0_21 = arith.constant 0 : index
      %c0_22 = arith.constant 0 : index
      %25 = vector.load %arg6[%c0_21, %c0_22] : memref<1x1280xf32, #tpu.memory_space<vmem>>, vector<1x1280xf32>
      %26 = arith.addf %24, %25 : vector<1x1280xf32>
      %cst_23 = arith.constant 0.000000e+00 : f32
      %27 = vector.broadcast %cst_23 : f32 to vector<1x1280xf32>
      %28 = arith.maximumf %26, %27 : vector<1x1280xf32>
      %c0_24 = arith.constant 0 : index
      %c0_25 = arith.constant 0 : index
      %c0_26 = arith.constant 0 : index
      %29 = vector.load %arg7[%c0_24, %c0_25, %c0_26] : memref<1x1x1280xf32, #tpu.memory_space<vmem>>, vector<1x1x1280xf32>
      %30 = vector.shape_cast %29 : vector<1x1x1280xf32> to vector<1x1280xf32>
      %31 = vector.shape_cast %28 : vector<1x1280xf32> to vector<1x1x1280xf32>
      tpu.vector_store %arg7[%c0_24, %c0_25, %c0_26], %31 {strides = array<i32>} : memref<1x1x1280xf32, #tpu.memory_space<vmem>>, vector<1x1x1280xf32>,
    } else {
    }
    return
  }
  func.func @transform_0(%arg0: i32, %arg1: i32) -> (i32, i32, i32) {
    %c0_i32 = arith.constant 0 : i32
    %c0_i32_0 = arith.constant 0 : i32
    return %arg0, %arg1, %c0_i32 : i32, i32, i32
  }
  func.func @transform_1(%arg0: i32, %arg1: i32) -> (i32, i32) {
    %c0_i32 = arith.constant 0 : i32
    %c0_i32_0 = arith.constant 0 : i32
    %c0_i32_1 = arith.constant 0 : i32
    return %c0_i32, %c0_i32_0 : i32, i32
  }
  func.func @transform_2(%arg0: i32, %arg1: i32) -> (i32, i32) {
    %c0_i32 = arith.constant 0 : i32
    %c0_i32_0 = arith.constant 0 : i32
    %c0_i32_1 = arith.constant 0 : i32
    return %c0_i32, %c0_i32_0 : i32, i32
  }
  func.func @transform_3(%arg0: i32, %arg1: i32) -> (i32, i32) {
    %c0_i32 = arith.constant 0 : i32
    %c0_i32_0 = arith.constant 0 : i32
    %c0_i32_1 = arith.constant 0 : i32
    return %c0_i32, %c0_i32_0 : i32, i32
  }
  func.func @transform_4(%arg0: i32, %arg1: i32) -> (i32, i32) {
    %c0_i32 = arith.constant 0 : i32
    %c0_i32_0 = arith.constant 0 : i32
    %c0_i32_1 = arith.constant 0 : i32
    return %c0_i32, %c0_i32_0 : i32, i32
  }
  func.func @transform_5(%arg0: i32, %arg1: i32) -> (i32, i32, i32) {
    %c0_i32 = arith.constant 0 : i32
    %c0_i32_0 = arith.constant 0 : i32
    %c0_i32_1 = arith.constant 0 : i32
    return %arg0, %c0_i32, %c0_i32_0 : i32, i32, i32
  }
}

module attributes {stable_mosaic.version = 11 : i64} {
  func.func @_heads_kernel(%arg0: i32, %arg1: memref<2x5120xf32, #tpu.memory_space<vmem>>, %arg2: memref<5120x8xf32, #tpu.memory_space<vmem>>, %arg3: memref<1x8xf32, #tpu.memory_space<vmem>>, %arg4: memref<2x8xf32, #tpu.memory_space<vmem>>) attributes {dimension_semantics = [#tpu.dimension_semantics<arbitrary>], iteration_bounds = array<i64: 1>, scalar_prefetch = 0 : i64, scratch_operands = 0 : i64, tpu.core_type = #tpu.core_type<tc>, window_params = [{pipeline_mode = #tpu.pipeline_mode<synchronous>, transform_indices = @transform_0, window_bounds = array<i64: 2, 5120>}, {pipeline_mode = #tpu.pipeline_mode<synchronous>, transform_indices = @transform_1, window_bounds = array<i64: 5120, 8>}, {pipeline_mode = #tpu.pipeline_mode<synchronous>, transform_indices = @transform_2, window_bounds = array<i64: 1, 8>}, {pipeline_mode = #tpu.pipeline_mode<synchronous>, transform_indices = @transform_3, window_bounds = array<i64: 2, 8>}]} {
    %c0 = arith.constant 0 : index
    %c0_0 = arith.constant 0 : index
    %0 = vector.load %arg1[%c0, %c0_0] : memref<2x5120xf32, #tpu.memory_space<vmem>>, vector<2x5120xf32>
    %c0_1 = arith.constant 0 : index
    %c0_2 = arith.constant 0 : index
    %1 = vector.load %arg2[%c0_1, %c0_2] : memref<5120x8xf32, #tpu.memory_space<vmem>>, vector<5120x8xf32>
    %cst = arith.constant dense<0.000000e+00> : vector<2x8xf32>
    %2 = tpu.matmul %0, %1, %cst {dimension_numbers = #tpu.dot_dimension_numbers<[1], [0], [0], [1], [0, 0, 1, 1], [], []>} : vector<2x5120xf32>, vector<5120x8xf32>, vector<2x8xf32> -> vector<2x8xf32>
    %c0_3 = arith.constant 0 : index
    %c0_4 = arith.constant 0 : index
    %3 = vector.load %arg3[%c0_3, %c0_4] : memref<1x8xf32, #tpu.memory_space<vmem>>, vector<1x8xf32>
    %4 = vector.broadcast %3 : vector<1x8xf32> to vector<2x8xf32>
    %5 = arith.addf %2, %4 : vector<2x8xf32>
    %6 = arith.negf %5 : vector<2x8xf32>
    %7 = math.exp %6 : vector<2x8xf32>
    %cst_5 = arith.constant 1.000000e+00 : f32
    %8 = vector.broadcast %cst_5 : f32 to vector<2x8xf32>
    %9 = arith.addf %8, %7 : vector<2x8xf32>
    %10 = arith.divf %8, %9 : vector<2x8xf32>
    %c0_6 = arith.constant 0 : index
    %c0_7 = arith.constant 0 : index
    %11 = vector.load %arg4[%c0_6, %c0_7] : memref<2x8xf32, #tpu.memory_space<vmem>>, vector<2x8xf32>
    tpu.vector_store %arg4[%c0_6, %c0_7], %10 {strides = array<i32>} : memref<2x8xf32, #tpu.memory_space<vmem>>, vector<2x8xf32>,
    return
  }
  func.func @transform_0(%arg0: i32) -> (i32, i32) {
    %c0_i32 = arith.constant 0 : i32
    %c0_i32_0 = arith.constant 0 : i32
    %c0_i32_1 = arith.constant 0 : i32
    return %c0_i32, %c0_i32_0 : i32, i32
  }
  func.func @transform_1(%arg0: i32) -> (i32, i32) {
    %c0_i32 = arith.constant 0 : i32
    %c0_i32_0 = arith.constant 0 : i32
    %c0_i32_1 = arith.constant 0 : i32
    return %c0_i32, %c0_i32_0 : i32, i32
  }
  func.func @transform_2(%arg0: i32) -> (i32, i32) {
    %c0_i32 = arith.constant 0 : i32
    %c0_i32_0 = arith.constant 0 : i32
    %c0_i32_1 = arith.constant 0 : i32
    return %c0_i32, %c0_i32_0 : i32, i32
  }
  func.func @transform_3(%arg0: i32) -> (i32, i32) {
    %c0_i32 = arith.constant 0 : i32
    %c0_i32_0 = arith.constant 0 : i32
    %c0_i32_1 = arith.constant 0 : i32
    return %c0_i32, %c0_i32_0 : i32, i32
  }
}

</mosaic_0001>

<bundles_post_ra>
// kernel: rgbdmh_forward.4
= control target key start
LH: loop header
LB: loop body
LE: loop exit
PB: predicated region body
PF: predicated region fallthrough
CT: control target
= control target key end

     0   :  { %10 = vsyncpa [#allocation4], 0  ;;  %s1897_s0 = inlined_call_operand.vmem [shape: bf16[6,64,9], index: 0, kind: input, shape index: {}]   ;;  %s1898_s1 = inlined_call_operand.hbm [shape: bf16[9,128], index: 1, kind: input, shape index: {}]   ;;  %s1899_s2 = inlined_call_operand.hbm [shape: f32[1,128], index: 2, kind: input, shape index: {}]   ;;  %s1900_s3 = inlined_call_operand.hbm [shape: f32[128,1280], index: 3, kind: input, shape index: {}]   ;;  %s1901_s4 = inlined_call_operand.hbm [shape: f32[1,1280], index: 4, kind: input, shape index: {}]   ;;  %s1902_s5 = inlined_call_operand.vmem [shape: f32[6,1,1280], index: 5, kind: output, shape index: {}]  }
   0x1   :  { %11 = vsyncpa [#allocation6], 0 }
   0x2   :  { %12 = vsyncpa [#allocation9], 0  ;;  %s1708_s18 = smov 0   ;;  %s1710_s19 = smov 0  }
   0x3   :  { %s1712_s20 = smov 0  }
   0x4 LB: > { %s1667_s21 = smov [#allocation5]   ;;  %s1238_s23 = sadd.s32 4294967295, %s1665_s20   ;;  %s1665_s20 = sphi %s1712_s20, %s18_s20   ;;  %s1661_s19 = sphi %s1710_s19, %s1915_s19   ;;  %s1657_s18 = sphi %s1708_s18, %s1914_s18  }
   0x5   : > { %s199_s22 = sshll.u32 %s1667_s21, 4  ;;  %p1240_p0 = scmp.ge.s32.totalorder %s1665_s20, 1  ;;  %s200_s22 = int_to_ptr.vmem [resolvable:$true] %s199_s22 }
   0x6   : > { %p173_p1 = scmp.lt.s32.totalorder %s1665_s20, 7  ;;  %p1726_p2 = scmp.eq.s32.totalorder %s1238_s23, 0 }
   0x7   : > { %s30_s26 = sadd.s32 1, %s1661_s19  ;;  %s1668_s29 = smov [#allocation3]  }
   0x8   : > { %s1906_s24 = scalar_select %p1726_p2, 1, 0 }
   0x9   : > { %p1730_p3 = pnand %p1240_p0, %p173_p1  ;;  %p1743_p6 = scmp.ge.s32.totalorder %s30_s26, 6 }
   0xa   : > { %s185_s30 = sshll.u32 %s1668_s29, 4  ;;  %s1519_s8 = scalar_lea.hbm %s1899_s2, 16  ;;  %s1747_s30 = int_to_ptr.vmem [resolvable:$true] %s185_s30 }
   0xb   : > { %s1907_s25 = scalar_select %p1730_p3, 1, 0 }
   0xc   : > { %p1458_p4 = pneg %p1730_p3  ;;  %p1520_p7 = scmp.ne.s32.totalorder %s1899_s2, %s1519_s8 }
   0xd   : > { %s1909_s28 = scalar_select %p1743_p6, 1, 0 }
   0xe   : > { %p1739_p5 = pnand %p1726_p2, %p1458_p4  ;;  %p1526_p11 = scmp.lt.u32.totalorder %s1519_s8, %s1899_s2 }
  0x10   : > { %p1757_p8 = pneg %p1739_p5 }
  0x12   : > { %p1522_p9 = pnand %p1757_p8, %p1520_p7 }
  0x14   : > { %p1523_p10 = pneg %p1522_p9 }
  0x16   : > { %p1528_p12 = pnand %p1526_p11, %p1523_p10 }
  0x18   : > { %1531 = shalt.err (!%p1528_p12)
}
  0x19   : > { %s1532_s14 = scalar_lea.vmem %s200_s22, 16  ;;  %s1539_s15 = scalar_lea.vmem %s200_s22, 32 }
  0x1a   : > { %p1533_p13 = scmp.ne.s32.totalorder %s200_s22, %s1532_s14  ;;  %p1540_p4 = scmp.lt.s32.totalorder %s200_s22, %s200_s22 }
  0x1b   : > { %p1541_p2 = scmp.lt.s32.totalorder %s1539_s15, %s1532_s14 }
  0x1c   : > { %p1535_p0 = pnand %p1533_p13, %p1757_p8 }
  0x1d   : > { %p1542_p3 = por %p1541_p2, %p1540_p4 }
  0x1e   : > { %p1536_p1 = pneg %p1535_p0 }
  0x20   : > { %p1543_p6 = pnand %p1542_p3, %p1536_p1 }
  0x22   : > { %1546 = shalt.err (!%p1543_p6)
}
  0x23   : > { %1464 = dma.hbm_to_vmem [thread:$0]  (!%p1739_p5), %s1899_s2, 16, %s200_s22, [#allocation6]  }
  0x24   : > { %p1911_p7 = scmp.ne.s32.totalorder %s1909_s28, 0  ;;  %s1547_s29 = scalar_lea.hbm %s1898_s1, 128 }
  0x25   : > { %p1548_p2 = scmp.ne.s32.totalorder %s1898_s1, %s1547_s29  ;;  %p1554_p9 = scmp.lt.u32.totalorder %s1547_s29, %s1898_s1 }
  0x26   : > { %s1917_s26 = smov (%p1911_p7, %s30_s26), 0 }
  0x27   : > { %p1550_p3 = pnand %p1548_p2, %p1757_p8 }
  0x29   : > { %p1551_p6 = pneg %p1550_p3 }
  0x2b   : > { %p1556_p10 = pnand %p1554_p9, %p1551_p6 }
  0x2d   : > { %1559 = shalt.err (!%p1556_p10)
}
  0x2e   : > { %s1560_s22 = scalar_lea.vmem %s1747_s30, 128  ;;  %p1568_p0 = scmp.lt.s32.totalorder %s1747_s30, %s1747_s30 }
  0x2f   : > { %p1561_p11 = scmp.ne.s32.totalorder %s1747_s30, %s1560_s22  ;;  %p1569_p1 = scmp.lt.s32.totalorder %s1560_s22, %s1560_s22 }
  0x31   : > { %p1563_p12 = pnand %p1561_p11, %p1757_p8  ;;  %p1570_p4 = por %p1569_p1, %p1568_p0 }
  0x33   : > { %p1564_p13 = pneg %p1563_p12 }
  0x35   : > { %p1571_p7 = pnand %p1570_p4, %p1564_p13 }
  0x37   : > { %1574 = shalt.err (!%p1571_p7)
}
  0x38   : > { %s1669_s28 = smov 64   ;;  %s1670_s10 = smov 4  }
  0x39   : > { %1461 = dma.hbm_to_vmem [thread:$0]  (!%p1739_p5), %s1898_s1, 128, %s1747_s30, [#allocation4], %s1669_s28, %s1669_s28, %s1670_s10  }
  0x3a   : > { %s1671_s14 = smov [#allocation7]   ;;  %s1575_s21 = scalar_lea.hbm %s1900_s3, 20480 }
  0x3b   : > { %s209_s15 = sshll.u32 %s1671_s14, 4  ;;  %p1576_p2 = scmp.ne.s32.totalorder %s1900_s3, %s1575_s21  ;;  %s210_s15 = int_to_ptr.vmem [resolvable:$true] %s209_s15 }
  0x3c   : > { %p1582_p9 = scmp.lt.u32.totalorder %s1575_s21, %s1900_s3 }
  0x3d   : > { %p1578_p3 = pnand %p1576_p2, %p1757_p8 }
  0x3f   : > { %p1579_p6 = pneg %p1578_p3 }
  0x41   : > { %p1584_p10 = pnand %p1582_p9, %p1579_p6 }
  0x43   : > { %1587 = shalt.err (!%p1584_p10)
}
  0x44   : > { %s1588_s30 = scalar_lea.vmem %s210_s15, 20480  ;;  %p1596_p0 = scmp.lt.s32.totalorder %s210_s15, %s210_s15 }
  0x45   : > { %p1589_p11 = scmp.ne.s32.totalorder %s210_s15, %s1588_s30  ;;  %p1597_p1 = scmp.lt.s32.totalorder %s1588_s30, %s1588_s30 }
  0x47   : > { %p1591_p12 = pnand %p1589_p11, %p1757_p8  ;;  %p1598_p4 = por %p1597_p1, %p1596_p0 }
  0x49   : > { %p1592_p13 = pneg %p1591_p12 }
  0x4b   : > { %p1599_p7 = pnand %p1598_p4, %p1592_p13 }
  0x4d   : > { %1602 = shalt.err (!%p1599_p7)
}
  0x4e   : > { %s1672_s8 = smov 1280   ;;  %s1673_s9 = smov 80  }
  0x4f   : > { %1467 = dma.hbm_to_vmem [thread:$0]  (!%p1739_p5), %s1900_s3, 20480, %s210_s15, [#allocation6], %s1672_s8, %s1672_s8, %s1673_s9  }
  0x50   : > { %s1674_s10 = smov [#allocation8]   ;;  %s1603_s16 = scalar_lea.hbm %s1901_s4, 160 }
  0x51   : > { %s223_s12 = sshll.u32 %s1674_s10, 4  ;;  %p1604_p2 = scmp.ne.s32.totalorder %s1901_s4, %s1603_s16  ;;  %s224_s12 = int_to_ptr.vmem [resolvable:$true] %s223_s12 }
  0x52   : > { %p1610_p9 = scmp.lt.u32.totalorder %s1603_s16, %s1901_s4 }
  0x53   : > { %p1606_p3 = pnand %p1604_p2, %p1757_p8 }
  0x55   : > { %p1607_p6 = pneg %p1606_p3 }
  0x57   : > { %p1612_p10 = pnand %p1610_p9, %p1607_p6 }
  0x59   : > { %1615 = shalt.err (!%p1612_p10)
}
  0x5a   : > { %s1616_s15 = scalar_lea.vmem %s224_s12, 160  ;;  %p1624_p0 = scmp.lt.s32.totalorder %s224_s12, %s224_s12 }
  0x5b   : > { %p1617_p11 = scmp.ne.s32.totalorder %s224_s12, %s1616_s15  ;;  %p1625_p1 = scmp.lt.s32.totalorder %s1616_s15, %s1616_s15 }
  0x5d   : > { %p1619_p12 = pnand %p1617_p11, %p1757_p8  ;;  %p1626_p4 = por %p1625_p1, %p1624_p0 }
  0x5f   : > { %p1620_p13 = pneg %p1619_p12 }
  0x61   : > { %p1627_p7 = pnand %p1626_p4, %p1620_p13 }
  0x63   : > { %1630 = shalt.err (!%p1627_p7)
}
  0x64   : > { %1470 = dma.hbm_to_vmem [thread:$0]  (!%p1739_p5), %s1901_s4, 160, %s224_s12, [#allocation9]  }
  0x65   : > { %p1912_p2 = scmp.ne.s32.totalorder %s1907_s25, 0 }
  0x66   : > { %p1913_p3 = scmp.ne.s32.totalorder (!%p1912_p2), %s1906_s24, 0 }
  0x67   : > { %249 = sbr.rel (%p1912_p2) target bundleno = 669 (0x29d), region = 40 }
  0x6e   : > { %1644 = dma.done.wait (%p1913_p3), [#allocation4], 128  }
  0x6f   : > { %1646 = vsyncadd (%p1913_p3), [#allocation4], 4294967168 }
  0x70   : > { %1648 = dma.done.wait (%p1913_p3), [#allocation6], 20496  }
  0x71   : > { %1650 = vsyncadd (%p1913_p3), [#allocation6], 4294946800 }
  0x72   : > { %1652 = dma.done.wait (%p1913_p3), [#allocation9], 160  }
  0x73   : > { %1654 = vsyncadd (%p1913_p3), [#allocation9], 4294967136  ;;  %vm367_vm0 = vcmask 1043456   ;;  %p293_p5 = scmp.lt.s32.totalorder %s1657_s18, 5  ;;  %vm368_vm1 = vcmask 1044480   ;;  %v1675_v0 = vmov 65535  }
  0x74   : > { %v369_v1 = vsel %vm367_vm0, 4294967295, %v1675_v0  ;;  %vm354_vm2 = vcmask 72704   ;;  %v1514_v3 = vld [vmem:[#allocation3] sm:$0x1f]   ;;  %v469_v9 = vld [vmem:[#allocation7 + $0x8] sm:$0xff]  ;;  %v468_v14 = vld [vmem:[#allocation7] sm:$0xff] }
  0x75   : > { %s1919_s18 = smov (!%p293_p5, %s1657_s18), 5  ;;  %v370_v2 = vsel %vm368_vm1, %v369_v1, 0  ;;  %v479_v10 = vld [vmem:[#allocation7 + $0x58] sm:$0xff]  ;;  %v481_v13 = vld [vmem:[#allocation7 + $0x68] sm:$0xff]  ;;  %v478_v15 = vld [vmem:[#allocation7 + $0x50] sm:$0xff]  ;;  %v1676_v60 = vmov 0.0  }
  0x76   : > { %s1265_s25 = sshll.u32 %s1919_s18, 5  ;;  %v372_v5 = vand.u32 %v1514_v3, %v370_v2  ;;  %v471_v11 = vld [vmem:[#allocation7 + $0x18] sm:$0xff]  ;;  %v1281_v12 = vpack.c.bf16 %v479_v10, %v469_v9  ;;  %v1283_v17 = vpack.c.bf16 %v478_v15, %v468_v14  ;;  %v470_v18 = vld [vmem:[#allocation7 + $0x10] sm:$0xff]  ;;  %v480_v19 = vld [vmem:[#allocation7 + $0x60] sm:$0xff]  ;;  %311 = vst [vmem:[#allocation2] sm:$0x1] %v1676_v60  ;;  %746 = vmatprep.mubr.f32.mxu1 %v1676_v60 }
  0x77   : > { %s300_s30 = scalar_lea.vmem %s1897_s0, %s1265_s25  ;;  %v1313_v16 = vpack.c.bf16 %v481_v13, %v471_v11  ;;  %v1315_v20 = vpack.c.bf16 %v480_v19, %v470_v18  ;;  %v489_v21 = vld [vmem:[#allocation7 + $0xa8] sm:$0xff]  ;;  %v499_v22 = vld [vmem:[#allocation7 + $0xf8] sm:$0xff]  ;;  %v488_v26 = vld [vmem:[#allocation7 + $0xa0] sm:$0xff]  ;;  %s1441_s24 = smul.u32 10, %s1919_s18 }
  0x78   : > { %v1515_v4 = vld [vmem:[%s300_s30] sm:$0xff]   ;;  %1271 = vmatprep.subr.bf16.mxu0 %v372_v5  ;;  %v1516_v6 = vld [vmem:[%s300_s30 + $0x8] sm:$0xff]   ;;  %v1517_v7 = vld [vmem:[%s300_s30 + $0x10] sm:$0xff]   ;;  %1282 = vmatprep.subr.bf16.mxu1 %v1281_v12  ;;  %v1285_v24 = vpack.c.bf16 %v499_v22, %v489_v21 }
  0x79   : > { %1273 = vmatprep.mubr.msk.bf16.mxu0 %vm354_vm2, %v1515_v4  ;;  %1272 = vmatpush3.bf16.msra.mxu0 %v372_v5  ;;  %v1518_v8 = vld [vmem:[%s300_s30 + $0x18] sm:$0xff]   ;;  %v491_v23 = vld [vmem:[#allocation7 + $0xb8] sm:$0xff]  ;;  %v500_v31 = vld [vmem:[#allocation7 + $0x100] sm:$0xff]  ;;  %s305_s22 = scalar_lea.vmem %s1902_s5, %s1441_s24 }
  0x7a   : > { %1314 = vmatprep.subr.bf16.mxu0 %v1313_v16  ;;  %1284 = vmatpush1.bf16.msra.mxu1 %v1283_v17  ;;  %v501_v25 = vld [vmem:[#allocation7 + $0x108] sm:$0xff]  ;;  %v498_v27 = vld [vmem:[#allocation7 + $0xf0] sm:$0xff]  ;;  %v519_v34 = vld [vmem:[#allocation7 + $0x198] sm:$0xff] }
  0x7b   : > { %v1317_v28 = vpack.c.bf16 %v501_v25, %v491_v23  ;;  %v1287_v29 = vpack.c.bf16 %v498_v27, %v488_v26  ;;  %v490_v30 = vld [vmem:[#allocation7 + $0xb0] sm:$0xff]  ;;  %1286 = vmatprep.subr.bf16.mxu1 %v1285_v24  ;;  %v509_v33 = vld [vmem:[#allocation7 + $0x148] sm:$0xff]  ;;  %v511_v35 = vld [vmem:[#allocation7 + $0x158] sm:$0xff] }
  0x7c   : > { %1274 = vmatmul.mubr.msk.bf16.vlgmr.msra.gmra.mrb[0].mxu0 %vm354_vm2, %v1516_v6  ;;  %v1319_v32 = vpack.c.bf16 %v500_v31, %v490_v30  ;;  %v1289_v36 = vpack.c.bf16 %v519_v34, %v509_v33  ;;  %v521_v37 = vld [vmem:[#allocation7 + $0x1a8] sm:$0xff]  ;;  %v508_v38 = vld [vmem:[#allocation7 + $0x140] sm:$0xff]  ;;  %v518_v39 = vld [vmem:[#allocation7 + $0x190] sm:$0xff] }
  0x7d   : > { %1277 = vmatprep.mubr.msk.bf16.mxu0 %vm354_vm2, %v1517_v7  ;;  %1316 = vmatpush1.bf16.msra.mxu0 %v1315_v20  ;;  %v1321_v40 = vpack.c.bf16 %v521_v37, %v511_v35  ;;  %v1291_v41 = vpack.c.bf16 %v518_v39, %v508_v38  ;;  %v510_v42 = vld [vmem:[#allocation7 + $0x150] sm:$0xff]  ;;  %v520_v43 = vld [vmem:[#allocation7 + $0x1a0] sm:$0xff]  ;;  %v529_v45 = vld [vmem:[#allocation7 + $0x1e8] sm:$0xff] }
  0x7e   : > { %1318 = vmatprep.subr.bf16.mxu0 %v1317_v28  ;;  %1288 = vmatpush1.bf16.msra.mxu1 %v1287_v29  ;;  %v1323_v44 = vpack.c.bf16 %v520_v43, %v510_v42  ;;  %v539_v46 = vld [vmem:[#allocation7 + $0x238] sm:$0xff]  ;;  %v541_v49 = vld [vmem:[#allocation7 + $0x248] sm:$0xff]  ;;  %v528_v50 = vld [vmem:[#allocation7 + $0x1e0] sm:$0xff] }
  0x7f   : > { %1290 = vmatprep.subr.bf16.mxu1 %v1289_v36  ;;  %v531_v47 = vld [vmem:[#allocation7 + $0x1f8] sm:$0xff]  ;;  %v1293_v48 = vpack.c.bf16 %v539_v46, %v529_v45  ;;  %v538_v51 = vld [vmem:[#allocation7 + $0x230] sm:$0xff]  ;;  %v540_v55 = vld [vmem:[#allocation7 + $0x240] sm:$0xff] }
  0x80   : > { %v1325_v52 = vpack.c.bf16 %v541_v49, %v531_v47  ;;  %v1295_v53 = vpack.c.bf16 %v538_v51, %v528_v50  ;;  %v530_v54 = vld [vmem:[#allocation7 + $0x1f0] sm:$0xff]  ;;  %v549_v57 = vld [vmem:[#allocation7 + $0x288] sm:$0xff]  ;;  %v559_v58 = vld [vmem:[#allocation7 + $0x2d8] sm:$0xff] }
  0x81   : > { %1320 = vmatpush1.bf16.msra.mxu0 %v1319_v32  ;;  %v1327_v56 = vpack.c.bf16 %v540_v55, %v530_v54  ;;  %v551_v59 = vld [vmem:[#allocation7 + $0x298] sm:$0xff]  ;;  %v1297_v61 = vpack.c.bf16 %v559_v58, %v549_v57  ;;  %v561_v62 = vld [vmem:[#allocation7 + $0x2e8] sm:$0xff]  ;;  %v548_v63 = vld [vmem:[#allocation7 + $0x280] sm:$0xff] }
  0x82   : > { %1322 = vmatprep.subr.bf16.mxu0 %v1321_v40  ;;  %1292 = vmatpush1.bf16.msra.mxu1 %v1291_v41  ;;  %v558_v0 = vld [vmem:[#allocation7 + $0x2d0] sm:$0xff]  ;;  %v1329_v1 = vpack.c.bf16 %v561_v62, %v551_v59  ;;  %v560_v4 = vld [vmem:[#allocation7 + $0x2e0] sm:$0xff]  ;;  %v569_v6 = vld [vmem:[#allocation7 + $0x328] sm:$0xff] }
  0x83   : > { %1294 = vmatprep.subr.bf16.mxu1 %v1293_v48  ;;  %v1299_v2 = vpack.c.bf16 %v558_v0, %v548_v63  ;;  %v550_v3 = vld [vmem:[#allocation7 + $0x290] sm:$0xff]  ;;  %v579_v7 = vld [vmem:[#allocation7 + $0x378] sm:$0xff]  ;;  %v581_v10 = vld [vmem:[#allocation7 + $0x388] sm:$0xff] }
  0x84   : > { %1278 = vmatmul.mubr.msk.bf16.gmra.mrb[4].mxu0 %vm354_vm2, %v1518_v8  ;;  %v1331_v5 = vpack.c.bf16 %v560_v4, %v550_v3  ;;  %v571_v8 = vld [vmem:[#allocation7 + $0x338] sm:$0xff]  ;;  %v1301_v9 = vpack.c.bf16 %v579_v7, %v569_v6  ;;  %v568_v11 = vld [vmem:[#allocation7 + $0x320] sm:$0xff]  ;;  %v578_v12 = vld [vmem:[#allocation7 + $0x370] sm:$0xff] }
  0x85   : > { %1324 = vmatpush1.bf16.msra.mxu0 %v1323_v44  ;;  %817 = vmatprep.mubr.f32.mxu0 %v1676_v60  ;;  %v1333_v13 = vpack.c.bf16 %v581_v10, %v571_v8  ;;  %v1303_v14 = vpack.c.bf16 %v578_v12, %v568_v11  ;;  %v570_v15 = vld [vmem:[#allocation7 + $0x330] sm:$0xff]  ;;  %v580_v16 = vld [vmem:[#allocation7 + $0x380] sm:$0xff]  ;;  %v589_v17 = vld [vmem:[#allocation7 + $0x3c8] sm:$0xff] }
  0x86   : > { %1326 = vmatprep.subr.bf16.mxu0 %v1325_v52  ;;  %1296 = vmatpush1.bf16.msra.mxu1 %v1295_v53  ;;  %v1335_v18 = vpack.c.bf16 %v580_v16, %v570_v15  ;;  %v599_v19 = vld [vmem:[#allocation7 + $0x418] sm:$0xff]  ;;  %v601_v21 = vld [vmem:[#allocation7 + $0x428] sm:$0xff]  ;;  %v588_v24 = vld [vmem:[#allocation7 + $0x3c0] sm:$0xff] }
  0x87   : > { %1298 = vmatprep.subr.bf16.mxu1 %v1297_v61  ;;  %v591_v20 = vld [vmem:[#allocation7 + $0x3d8] sm:$0xff]  ;;  %v1305_v22 = vpack.c.bf16 %v599_v19, %v589_v17  ;;  %v598_v25 = vld [vmem:[#allocation7 + $0x410] sm:$0xff]  ;;  %v600_v28 = vld [vmem:[#allocation7 + $0x420] sm:$0xff] }
  0x88   : > { %v1337_v23 = vpack.c.bf16 %v601_v21, %v591_v20  ;;  %v590_v26 = vld [vmem:[#allocation7 + $0x3d0] sm:$0xff]  ;;  %v1307_v27 = vpack.c.bf16 %v598_v25, %v588_v24  ;;  %v609_v29 = vld [vmem:[#allocation7 + $0x468] sm:$0xff]  ;;  %v619_v30 = vld [vmem:[#allocation7 + $0x4b8] sm:$0xff] }
  0x89   : > { %1328 = vmatpush1.bf16.msra.mxu0 %v1327_v56  ;;  %v1339_v31 = vpack.c.bf16 %v600_v28, %v590_v26  ;;  %v1309_v32 = vpack.c.bf16 %v619_v30, %v609_v29  ;;  %v611_v33 = vld [vmem:[#allocation7 + $0x478] sm:$0xff]  ;;  %v621_v34 = vld [vmem:[#allocation7 + $0x4c8] sm:$0xff]  ;;  %v608_v35 = vld [vmem:[#allocation7 + $0x460] sm:$0xff] }
  0x8a   : > { %1330 = vmatprep.subr.bf16.mxu0 %v1329_v1  ;;  %1300 = vmatpush1.bf16.msra.mxu1 %v1299_v2  ;;  %v1341_v36 = vpack.c.bf16 %v621_v34, %v611_v33  ;;  %v618_v37 = vld [vmem:[#allocation7 + $0x4b0] sm:$0xff]  ;;  %v620_v39 = vld [vmem:[#allocation7 + $0x4c0] sm:$0xff]  ;;  %v473_v41 = vld [vmem:[#allocation7 + $0x28] sm:$0xff] }
  0x8b   : > { %1302 = vmatprep.subr.bf16.mxu1 %v1301_v9  ;;  %v610_v38 = vld [vmem:[#allocation7 + $0x470] sm:$0xff]  ;;  %v1311_v40 = vpack.c.bf16 %v618_v37, %v608_v35  ;;  %v483_v42 = vld [vmem:[#allocation7 + $0x78] sm:$0xff]  ;;  %v485_v46 = vld [vmem:[#allocation7 + $0x88] sm:$0xff] }
  0x8c   : > { %v1343_v43 = vpack.c.bf16 %v620_v39, %v610_v38  ;;  %v1345_v44 = vpack.c.bf16 %v483_v42, %v473_v41  ;;  %v475_v45 = vld [vmem:[#allocation7 + $0x38] sm:$0xff]  ;;  %v472_v25 = vld [vmem:[#allocation7 + $0x20] sm:$0xff]  ;;  %v482_v26 = vld [vmem:[#allocation7 + $0x70] sm:$0xff] }
  0x8d   : > { %1332 = vmatpush1.bf16.msra.mxu0 %v1331_v5  ;;  %v1377_v47 = vpack.c.bf16 %v485_v46, %v475_v45  ;;  %v1253_v48 = vld [vmem:[#allocation5] ss:$0 sm:$0xff]  ;;  %v484_v28 = vld [vmem:[#allocation7 + $0x80] sm:$0xff]  ;;  %v493_v29 = vld [vmem:[#allocation7 + $0xc8] sm:$0xff]  ;;  %v1347_v34 = vpack.c.bf16 %v482_v26, %v472_v25 }
  0x8e   : > { %1334 = vmatprep.subr.bf16.mxu0 %v1333_v13  ;;  %1304 = vmatpush1.bf16.msra.mxu1 %v1303_v14  ;;  %v503_v30 = vld [vmem:[#allocation7 + $0x118] sm:$0xff]  ;;  %v502_v37 = vld [vmem:[#allocation7 + $0x110] sm:$0xff]  ;;  %v504_v42 = vld [vmem:[#allocation7 + $0x120] sm:$0xff] }
  0x8f   : > { %1306 = vmatprep.subr.bf16.mxu1 %v1305_v22  ;;  %v447_v22 = vld [vmem:[#allocation2] sm:$0x1]  ;;  %v1349_v39 = vpack.c.bf16 %v503_v30, %v493_v29  ;;  %v515_v45 = vld [vmem:[#allocation7 + $0x178] sm:$0xff]  ;;  %v525_v46 = vld [vmem:[#allocation7 + $0x1c8] sm:$0xff] }
  0x90   : > { %v494_v41 = vld [vmem:[#allocation7 + $0xd0] sm:$0xff]  ;;  %v603_v29 = vld [vmem:[#allocation7 + $0x438] sm:$0xff] }
  0x91   : > { %1336 = vmatpush1.bf16.msra.mxu0 %v1335_v18  ;;  %v574_v26 = vld [vmem:[#allocation7 + $0x350] sm:$0xff]  ;;  %v595_v30 = vld [vmem:[#allocation7 + $0x3f8] sm:$0xff] }
  0x92   : > { %1338 = vmatprep.subr.bf16.mxu0 %v1337_v23  ;;  %1308 = vmatpush1.bf16.msra.mxu1 %v1307_v27  ;;  %v474_v27 = vld [vmem:[#allocation7 + $0x30] sm:$0xff] }
  0x93   : > { %1310 = vmatprep.subr.bf16.mxu1 %v1309_v32  ;;  %v505_v32 = vld [vmem:[#allocation7 + $0x128] sm:$0xff]  ;;  %v1379_v35 = vpack.c.bf16 %v484_v28, %v474_v27  ;;  %v584_v27 = vld [vmem:[#allocation7 + $0x3a0] sm:$0xff] }
  0x94   : > { %v593_v28 = vld [vmem:[#allocation7 + $0x3e8] sm:$0xff] }
  0x95   : > { %1340 = vmatpush1.bf16.msra.mxu0 %v1339_v31  ;;  %v495_v31 = vld [vmem:[#allocation7 + $0xd8] sm:$0xff] }
  0x96   : > { %1342 = vmatprep.subr.bf16.mxu0 %v1341_v36  ;;  %1312 = vmatpush1.bf16.msra.mxu1 %v1311_v40  ;;  %v492_v36 = vld [vmem:[#allocation7 + $0xc0] sm:$0xff]  ;;  %v1381_v40 = vpack.c.bf16 %v505_v32, %v495_v31  ;;  %v605_v31 = vld [vmem:[#allocation7 + $0x448] sm:$0xff] }
  0x97   : > { %1346 = vmatprep.subr.bf16.mxu1 %v1345_v44  ;;  %v523_v44 = vld [vmem:[#allocation7 + $0x1b8] sm:$0xff] }
  0x99   : > { %1344 = vmatpush1.bf16.msra.mxu0 %v1343_v43  ;;  %v513_v43 = vld [vmem:[#allocation7 + $0x168] sm:$0xff] }
  0x9a   : > { %1378 = vmatprep.subr.bf16.mxu0 %v1377_v47  ;;  %v1351_v47 = vpack.c.bf16 %v502_v37, %v492_v36  ;;  %v1369_v36 = vpack.c.bf16 %v603_v29, %v593_v28  ;;  %v1401_v37 = vpack.c.bf16 %v605_v31, %v595_v30  ;;  %v596_v30 = vld [vmem:[#allocation7 + $0x400] sm:$0xff]  ;;  %v606_v31 = vld [vmem:[#allocation7 + $0x450] sm:$0xff] }
 0x14f   : > { %v1275_v49 = vpop.f32.mrb[0].mxu0 }
 0x150   : > { %v408_v50 = vpop.f32.mrb[1].mxu0  ;;  %v417_v54 = vadd.f32 %v1275_v49, %v1253_v48  ;;  %v512_v49 = vld [vmem:[#allocation7 + $0x160] sm:$0xff] }
 0x151   : > { %v409_v51 = vadd.f32 %v1253_v48, %v408_v50  ;;  %v1276_v52 = vpop.f32.mrb[2].mxu0  ;;  %v522_v50 = vld [vmem:[#allocation7 + $0x1b0] sm:$0xff] }
 0x152   : > { %v411_v53 = vpop.f32.mrb[3].mxu0  ;;  %v420_v57 = vadd.f32 %v1276_v52, %v1253_v48  ;;  %v441_v59 = vmax.f32 %v417_v54, 0.0  ;;  %v1385_v52 = vpack.c.bf16 %v525_v46, %v515_v45  ;;  %v524_v54 = vld [vmem:[#allocation7 + $0x1c0] sm:$0xff] }
 0x153   : > { %v412_v55 = vadd.f32 %v1253_v48, %v411_v53  ;;  %v439_v56 = vmax.f32 %v409_v51, 0.0  ;;  %v1353_v51 = vpack.c.bf16 %v523_v44, %v513_v43  ;;  %v514_v53 = vld [vmem:[#allocation7 + $0x170] sm:$0xff]  ;;  %v615_v43 = vld [vmem:[#allocation7 + $0x498] sm:$0xff]  ;;  %v625_v44 = vld [vmem:[#allocation7 + $0x4e8] sm:$0xff] }
 0x154   : > { %v442_v0 = vmax.f32 %v420_v57, 0.0  ;;  %v535_v57 = vld [vmem:[#allocation7 + $0x218] sm:$0xff] }
 0x155   : > { %v440_v58 = vmax.f32 %v412_v55, 0.0  ;;  %v533_v55 = vld [vmem:[#allocation7 + $0x208] sm:$0xff] }
 0x157   : > { %v448_v61 = vadd.f32 %v440_v58, %v439_v56  ;;  %v1279_v62 = vpop.f32.mrb[4].mxu0  ;;  %v543_v56 = vld [vmem:[#allocation7 + $0x258] sm:$0xff]  ;;  %v545_v58 = vld [vmem:[#allocation7 + $0x268] sm:$0xff] }
 0x158   : > { %v424_v63 = vpop.f32.mrb[5].mxu0  ;;  %v433_v5 = vadd.f32 %v1279_v62, %v1253_v48  ;;  %v532_v62 = vld [vmem:[#allocation7 + $0x200] sm:$0xff] }
 0x159   : > { %v449_v1 = vadd.f32 %v448_v61, %v441_v59  ;;  %v425_v2 = vadd.f32 %v1253_v48, %v424_v63  ;;  %v1280_v3 = vpop.f32.mrb[6].mxu0  ;;  %v1355_v59 = vpack.c.bf16 %v522_v50, %v512_v49  ;;  %v1387_v61 = vpack.c.bf16 %v524_v54, %v514_v53  ;;  %v542_v63 = vld [vmem:[#allocation7 + $0x250] sm:$0xff]  ;;  %v477_v53 = vld [vmem:[#allocation7 + $0x48] sm:$0xff]  ;;  %v487_v54 = vld [vmem:[#allocation7 + $0x98] sm:$0xff] }
 0x15a   : > { %v427_v4 = vpop.f32.mrb[7].mxu0  ;;  %v436_v10 = vadd.f32 %v1280_v3, %v1253_v48  ;;  %v445_v12 = vmax.f32 %v433_v5, 0.0  ;;  %v544_v3 = vld [vmem:[#allocation7 + $0x260] sm:$0xff]  ;;  %v563_v5 = vld [vmem:[#allocation7 + $0x2f8] sm:$0xff]  ;;  %v1405_v49 = vpack.c.bf16 %v625_v44, %v615_v43  ;;  %v622_v50 = vld [vmem:[#allocation7 + $0x4d0] sm:$0xff] }
 0x15b   : > { %v443_v6 = vmax.f32 %v425_v2, 0.0  ;;  %v450_v7 = vadd.f32 %v449_v1, %v442_v0  ;;  %v428_v8 = vadd.f32 %v1253_v48, %v427_v4  ;;  %v1383_v48 = vpack.c.bf16 %v504_v42, %v494_v41  ;;  %v534_v2 = vld [vmem:[#allocation7 + $0x210] sm:$0xff]  ;;  %v553_v4 = vld [vmem:[#allocation7 + $0x2a8] sm:$0xff]  ;;  %v623_v42 = vld [vmem:[#allocation7 + $0x4d8] sm:$0xff] }
 0x15c   : > { %v446_v14 = vmax.f32 %v436_v10, 0.0  ;;  %v1357_v0 = vpack.c.bf16 %v543_v56, %v533_v55  ;;  %v1389_v1 = vpack.c.bf16 %v545_v58, %v535_v57  ;;  %v552_v10 = vld [vmem:[#allocation7 + $0x2a0] sm:$0xff]  ;;  %v613_v41 = vld [vmem:[#allocation7 + $0x488] sm:$0xff]  ;;  %v1409_v57 = vpack.c.bf16 %v487_v54, %v477_v53 }
 0x15d   : > { %v451_v9 = vadd.f32 %v450_v7, %v443_v6  ;;  %v444_v11 = vmax.f32 %v428_v8, 0.0  ;;  %v555_v6 = vld [vmem:[#allocation7 + $0x2b8] sm:$0xff]  ;;  %v565_v7 = vld [vmem:[#allocation7 + $0x308] sm:$0xff]  ;;  %v1359_v8 = vpack.c.bf16 %v542_v63, %v532_v62  ;;  %v476_v58 = vld [vmem:[#allocation7 + $0x40] sm:$0xff] }
 0x15e   : > { %v507_v62 = vld [vmem:[#allocation7 + $0x138] sm:$0xff]  ;;  %v628_v44 = vld [vmem:[#allocation8] sm:$0xff] }
 0x15f   : > { %v452_v13 = vadd.f32 %v451_v9, %v444_v11  ;;  %v1391_v9 = vpack.c.bf16 %v544_v3, %v534_v2  ;;  %v562_v11 = vld [vmem:[#allocation7 + $0x2f0] sm:$0xff]  ;;  %v517_v3 = vld [vmem:[#allocation7 + $0x188] sm:$0xff] }
 0x160   : > { %v506_v2 = vld [vmem:[#allocation7 + $0x130] sm:$0xff] }
 0x161   : > { %v453_v15 = vadd.f32 %v452_v13, %v445_v12  ;;  %v1361_v12 = vpack.c.bf16 %v563_v5, %v553_v4  ;;  %v1393_v13 = vpack.c.bf16 %v565_v7, %v555_v6  ;;  %v527_v4 = vld [vmem:[#allocation7 + $0x1d8] sm:$0xff]  ;;  %v516_v7 = vld [vmem:[#allocation7 + $0x180] sm:$0xff] }
 0x162   : > { %v1417_v6 = vpack.c.bf16 %v527_v4, %v517_v3 }
 0x163   : > { %v454_v16 = vadd.f32 %v453_v15, %v446_v14  ;;  %v554_v14 = vld [vmem:[#allocation7 + $0x2b0] sm:$0xff]  ;;  %v564_v15 = vld [vmem:[#allocation7 + $0x300] sm:$0xff] }
 0x165   : > { %v455_v17 = vrot.slane %v454_v16, 4 }
 0x167   : > { %v456_v18 = vadd.f32 %v455_v17, %v454_v16  ;;  %v573_v16 = vld [vmem:[#allocation7 + $0x348] sm:$0xff]  ;;  %v583_v17 = vld [vmem:[#allocation7 + $0x398] sm:$0xff] }
 0x169   : > { %v457_v19 = vrot.slane %v456_v18, 2 }
 0x16b   : > { %v458_v20 = vadd.f32 %v457_v19, %v456_v18  ;;  %v575_v18 = vld [vmem:[#allocation7 + $0x358] sm:$0xff]  ;;  %v585_v19 = vld [vmem:[#allocation7 + $0x3a8] sm:$0xff] }
 0x16c   : > { %v1397_v25 = vpack.c.bf16 %v585_v19, %v575_v18  ;;  %v556_v19 = vld [vmem:[#allocation7 + $0x2c0] sm:$0xff] }
 0x16d   : > { %v459_v21 = vrot.slane %v458_v20, 1 }
 0x16f   : > { %v460_v23 = vadd.f32 %v459_v21, %v458_v20  ;;  %v1363_v20 = vpack.c.bf16 %v562_v11, %v552_v10  ;;  %v1395_v21 = vpack.c.bf16 %v564_v15, %v554_v14  ;;  %v547_v10 = vld [vmem:[#allocation7 + $0x278] sm:$0xff]  ;;  %v546_v14 = vld [vmem:[#allocation7 + $0x270] sm:$0xff]  ;;  %v557_v15 = vld [vmem:[#allocation7 + $0x2c8] sm:$0xff] }
 0x171   : > { %v461_v24 = vadd.f32 %v460_v23, %v447_v22  ;;  %v572_v22 = vld [vmem:[#allocation7 + $0x340] sm:$0xff]  ;;  %v582_v23 = vld [vmem:[#allocation7 + $0x390] sm:$0xff] }
 0x172   : > { %v1367_v32 = vpack.c.bf16 %v582_v23, %v572_v22 }
 0x173   : > { %462 = vst [vmem:[#allocation2] sm:$0x1] %v461_v24  ;;  %v1365_v24 = vpack.c.bf16 %v583_v17, %v573_v16  ;;  %v567_v16 = vld [vmem:[#allocation7 + $0x318] sm:$0xff] }
 0x174   : > { %v1425_v18 = vpack.c.bf16 %v567_v16, %v557_v15 }
 0x17a   : > { %v466_v33 = vld [vmem:[#allocation2] sm:$0x1] }
 0x17b   : > { %v1861_v38 = vmul.f32 0.015625, %v466_v33  ;;  %v1399_v33 = vpack.c.bf16 %v584_v27, %v574_v26  ;;  %v597_v26 = vld [vmem:[#allocation7 + $0x408] sm:$0xff]  ;;  %v607_v27 = vld [vmem:[#allocation7 + $0x458] sm:$0xff] }
 0x17c   : > { %v1433_v29 = vpack.c.bf16 %v607_v27, %v597_v26 }
 0x17d   : > { %747 = vmatmul.mubr.f32.vlgmr.msra.gmra.mrb[0].mxu1 %v1861_v38  ;;  %818 = vmatmul.mubr.f32.vlgmr.msra.gmra.mrb[8].mxu0 %v1861_v38 }
 0x17e   : > { %1348 = vmatpush1.bf16.msra.mxu1 %v1347_v34  ;;  %1380 = vmatpush1.bf16.msra.mxu0 %v1379_v35  ;;  %v592_v34 = vld [vmem:[#allocation7 + $0x3e0] sm:$0xff]  ;;  %v602_v35 = vld [vmem:[#allocation7 + $0x430] sm:$0xff] }
 0x17f   : > { %1350 = vmatprep.subr.bf16.mxu1 %v1349_v39  ;;  %1382 = vmatprep.subr.bf16.mxu0 %v1381_v40  ;;  %v594_v39 = vld [vmem:[#allocation7 + $0x3f0] sm:$0xff]  ;;  %v604_v40 = vld [vmem:[#allocation7 + $0x440] sm:$0xff]  ;;  %v1371_v45 = vpack.c.bf16 %v602_v35, %v592_v34  ;;  %v1435_v34 = vpack.c.bf16 %v606_v31, %v596_v30 }
 0x180   : > { %888 = vmatprep.mubr.f32.mxu1 %v1676_v60  ;;  %959 = vmatprep.mubr.f32.mxu0 %v1676_v60  ;;  %v1403_v46 = vpack.c.bf16 %v604_v40, %v594_v39  ;;  %v632_v40 = vlaneseq }
 0x182   : > { %1352 = vmatpush1.bf16.msra.mxu1 %v1351_v47  ;;  %1384 = vmatpush1.bf16.msra.mxu0 %v1383_v48  ;;  %v612_v47 = vld [vmem:[#allocation7 + $0x480] sm:$0xff]  ;;  %v1373_v48 = vpack.c.bf16 %v623_v42, %v613_v41  ;;  %v1872_v41 = vshrl.u32 %v632_v40, 7  ;;  %vm1126_vm3 = vcmp.lt.s32.totalorder %v632_v40, 256 }
 0x183   : > { %1354 = vmatprep.subr.bf16.mxu1 %v1353_v51  ;;  %1386 = vmatprep.subr.bf16.mxu0 %v1385_v52  ;;  %v614_v51 = vld [vmem:[#allocation7 + $0x490] sm:$0xff]  ;;  %v624_v52 = vld [vmem:[#allocation7 + $0x4e0] sm:$0xff]  ;;  %v1375_v55 = vpack.c.bf16 %v622_v50, %v612_v47  ;;  %v1677_v47 = vmov 1966171168  }
 0x184   : > { %v1407_v56 = vpack.c.bf16 %v624_v52, %v614_v51  ;;  %v634_v42 = vsub.s32 0, %v1872_v41  ;;  %v642_v43 = vsub.s32 2, %v1872_v41 }
 0x186   : > { %1356 = vmatpush1.bf16.msra.mxu1 %v1355_v59  ;;  %1388 = vmatpush1.bf16.msra.mxu0 %v1387_v61  ;;  %v486_v59 = vld [vmem:[#allocation7 + $0x90] sm:$0xff]  ;;  %v497_v61 = vld [vmem:[#allocation7 + $0xe8] sm:$0xff]  ;;  %v643_v50 = vrot.slane %v628_v44, %v642_v43 }
 0x187   : > { %1358 = vmatprep.subr.bf16.mxu1 %v1357_v0  ;;  %1390 = vmatprep.subr.bf16.mxu0 %v1389_v1  ;;  %v1411_v63 = vpack.c.bf16 %v486_v59, %v476_v58  ;;  %v1413_v0 = vpack.c.bf16 %v507_v62, %v497_v61  ;;  %v496_v1 = vld [vmem:[#allocation7 + $0xe0] sm:$0xff] }
 0x188   : > { %v1415_v5 = vpack.c.bf16 %v506_v2, %v496_v1 }
 0x18a   : > { %1360 = vmatpush1.bf16.msra.mxu1 %v1359_v8  ;;  %1392 = vmatpush1.bf16.msra.mxu0 %v1391_v9  ;;  %v526_v8 = vld [vmem:[#allocation7 + $0x1d0] sm:$0xff]  ;;  %v537_v9 = vld [vmem:[#allocation7 + $0x228] sm:$0xff] }
 0x18b   : > { %1362 = vmatprep.subr.bf16.mxu1 %v1361_v12  ;;  %1394 = vmatprep.subr.bf16.mxu0 %v1393_v13  ;;  %v1419_v11 = vpack.c.bf16 %v526_v8, %v516_v7  ;;  %v1421_v12 = vpack.c.bf16 %v547_v10, %v537_v9  ;;  %v536_v13 = vld [vmem:[#allocation7 + $0x220] sm:$0xff]  ;;  %v650_v8 = vsub.s32 4, %v1872_v41  ;;  %v658_v9 = vsub.s32 6, %v1872_v41 }
 0x18c   : > { %v1423_v17 = vpack.c.bf16 %v546_v14, %v536_v13  ;;  %v654_v10 = vsub.s32 5, %v1872_v41 }
 0x18d   : > { %v659_v13 = vrot.slane %v628_v44, %v658_v9 }
 0x18e   : > { %1364 = vmatpush1.bf16.msra.mxu1 %v1363_v20  ;;  %1396 = vmatpush1.bf16.msra.mxu0 %v1395_v21  ;;  %v577_v20 = vld [vmem:[#allocation7 + $0x368] sm:$0xff]  ;;  %v587_v21 = vld [vmem:[#allocation7 + $0x3b8] sm:$0xff]  ;;  %v655_v14 = vrot.slane %v628_v44, %v654_v10 }
 0x18f   : > { %1366 = vmatprep.subr.bf16.mxu1 %v1365_v24  ;;  %1398 = vmatprep.subr.bf16.mxu0 %v1397_v25  ;;  %v1429_v23 = vpack.c.bf16 %v587_v21, %v577_v20  ;;  %v576_v24 = vld [vmem:[#allocation7 + $0x360] sm:$0xff]  ;;  %v586_v25 = vld [vmem:[#allocation7 + $0x3b0] sm:$0xff] }
 0x190   : > { %v1431_v28 = vpack.c.bf16 %v586_v25, %v576_v24 }
 0x192   : > { %1368 = vmatpush1.bf16.msra.mxu1 %v1367_v32  ;;  %1400 = vmatpush1.bf16.msra.mxu0 %v1399_v33  ;;  %v617_v32 = vld [vmem:[#allocation7 + $0x4a8] sm:$0xff]  ;;  %v627_v33 = vld [vmem:[#allocation7 + $0x4f8] sm:$0xff] }
 0x193   : > { %1370 = vmatprep.subr.bf16.mxu1 %v1369_v36  ;;  %1402 = vmatprep.subr.bf16.mxu0 %v1401_v37  ;;  %v1437_v35 = vpack.c.bf16 %v627_v33, %v617_v32  ;;  %v616_v36 = vld [vmem:[#allocation7 + $0x4a0] sm:$0xff]  ;;  %v626_v37 = vld [vmem:[#allocation7 + $0x4f0] sm:$0xff] }
 0x194   : > { %v1439_v39 = vpack.c.bf16 %v626_v37, %v616_v36 }
 0x196   : > { %1372 = vmatpush1.bf16.msra.mxu1 %v1371_v45  ;;  %1404 = vmatpush1.bf16.msra.mxu0 %v1403_v46  ;;  %v638_v45 = vsub.s32 1, %v1872_v41  ;;  %v646_v46 = vsub.s32 3, %v1872_v41 }
 0x197   : > { %1374 = vmatprep.subr.bf16.mxu1 %v1373_v48  ;;  %1406 = vmatprep.subr.bf16.mxu0 %v1405_v49  ;;  %v1062_v48 = vunpack.c.l.s4 %v1677_v47  ;;  %v635_v49 = vrot.slane %v628_v44, %v634_v42 }
 0x198   : > { %v639_v51 = vrot.slane %v628_v44, %v638_v45  ;;  %v647_v52 = vrot.slane %v628_v44, %v646_v46 }
 0x199   : > { %v1063_v54 = vunpack.c.0.s8 %v1062_v48 }
 0x19a   : > { %1376 = vmatpush1.bf16.msra.mxu1 %v1375_v55  ;;  %1408 = vmatpush1.bf16.msra.mxu0 %v1407_v56 }
 0x19b   : > { %1410 = vmatprep.subr.bf16.mxu1 %v1409_v57  ;;  %v1066_v1 = vsub.s32 %v1063_v54, %v1872_v41 }
 0x19d   : > { %889 = vmatmul.mubr.f32.vlgmr.msra.gmra.mrb[2].mxu1 %v1861_v38  ;;  %960 = vmatmul.mubr.f32.vlgmr.msra.gmra.mrb[10].mxu0 %v1861_v38 }
 0x19e   : > { %1412 = vmatpush1.bf16.msra.mxu1 %v1411_v63  ;;  %1030 = vmatprep.mubr.f32.mxu1 %v1676_v60  ;;  %v566_v60 = vld [vmem:[#allocation7 + $0x310] sm:$0xff] }
 0x19f   : > { %1414 = vmatprep.subr.bf16.mxu1 %v1413_v0  ;;  %v1427_v22 = vpack.c.bf16 %v566_v60, %v556_v19 }
 0x1a2   : > { %1416 = vmatpush1.bf16.msra.mxu1 %v1415_v5 }
 0x1a3   : > { %1418 = vmatprep.subr.bf16.mxu1 %v1417_v6 }
 0x1a6   : > { %1420 = vmatpush1.bf16.msra.mxu1 %v1419_v11  ;;  %v662_v11 = vsub.s32 7, %v1872_v41 }
 0x1a7   : > { %1422 = vmatprep.subr.bf16.mxu1 %v1421_v12  ;;  %v651_v12 = vrot.slane %v628_v44, %v650_v8 }
 0x1a8   : > { %v663_v15 = vrot.slane %v628_v44, %v662_v11 }
 0x1aa   : > { %1424 = vmatpush1.bf16.msra.mxu1 %v1423_v17 }
 0x1ab   : > { %1426 = vmatprep.subr.bf16.mxu1 %v1425_v18 }
 0x1ae   : > { %1428 = vmatpush1.bf16.msra.mxu1 %v1427_v22 }
 0x1af   : > { %1430 = vmatprep.subr.bf16.mxu1 %v1429_v23 }
 0x1b2   : > { %1432 = vmatpush1.bf16.msra.mxu1 %v1431_v28 }
 0x1b3   : > { %1434 = vmatprep.subr.bf16.mxu1 %v1433_v29 }
 0x1b6   : > { %1436 = vmatpush1.bf16.msra.mxu1 %v1435_v34 }
 0x1b7   : > { %1438 = vmatprep.subr.bf16.mxu1 %v1437_v35  ;;  %v629_v35 = vld [vmem:[#allocation8 + $0x8] sm:$0x3] }
 0x1b8   : > { %v667_v36 = vrot.slane %v629_v35, %v634_v42  ;;  %v671_v37 = vrot.slane %v629_v35, %v638_v45 }
 0x1ba   : > { %1440 = vmatpush1.bf16.msra.mxu1 %v1439_v39 }
 0x1bd   : > { %1031 = vmatmul.mubr.f32.vlgmr.msra.gmra.mrb[4].mxu1 %v1861_v38 }
 0x250   : > { %v748_v38 = vpop.f32.mrb[0].mxu1  ;;  %v819_v53 = vpop.f32.mrb[8].mxu0 }
 0x251   : > { %v749_v55 = vadd.f32 %v748_v38, %v635_v49  ;;  %v820_v56 = vadd.f32 %v819_v53, %v643_v50  ;;  %v750_v57 = vpop.f32.mrb[1].mxu1  ;;  %v821_v58 = vpop.f32.mrb[9].mxu0 }
 0x252   : > { %v751_v59 = vadd.f32 %v750_v57, %v639_v51  ;;  %v822_v61 = vadd.f32 %v821_v58, %v647_v52 }
 0x253   : > { %v1037_v62 = vmax.f32 %v749_v55, 0.0  ;;  %v1039_v63 = vmax.f32 %v820_v56, 0.0 }
 0x254   : > { %v1038_v0 = vmax.f32 %v751_v59, 0.0  ;;  %v1040_v2 = vmax.f32 %v822_v61, 0.0 }
 0x256   : > { %v1057_v3 = vcombine.low %v1037_v62, %v1038_v0  ;;  %v1058_v4 = vcombine.low %v1039_v63, %v1040_v2 }
 0x258   : > { %v1067_v5 = vrot.slane %v1057_v3, %v1066_v1  ;;  %v1074_v6 = vrot.slane %v1058_v4, %v1066_v1 }
 0x25a   : > { %v1089_v7 = vcombine.low %v1067_v5, %v1074_v6 }
 0x25c   : > { %v1097_v32 = vrot.slane %v1089_v7, %v1066_v1 }
 0x270   : > { %v890_v16 = vpop.f32.mrb[2].mxu1  ;;  %v961_v17 = vpop.f32.mrb[10].mxu0 }
 0x271   : > { %v891_v18 = vadd.f32 %v890_v16, %v651_v12  ;;  %v962_v19 = vadd.f32 %v961_v17, %v659_v13  ;;  %v892_v60 = vpop.f32.mrb[3].mxu1  ;;  %v963_v20 = vpop.f32.mrb[11].mxu0 }
 0x272   : > { %v893_v21 = vadd.f32 %v892_v60, %v655_v14  ;;  %v964_v22 = vadd.f32 %v963_v20, %v663_v15 }
 0x273   : > { %v1041_v23 = vmax.f32 %v891_v18, 0.0  ;;  %v1043_v24 = vmax.f32 %v962_v19, 0.0 }
 0x274   : > { %v1042_v25 = vmax.f32 %v893_v21, 0.0  ;;  %v1044_v26 = vmax.f32 %v964_v22, 0.0 }
 0x276   : > { %v1059_v27 = vcombine.low %v1041_v23, %v1042_v25  ;;  %v1060_v28 = vcombine.low %v1043_v24, %v1044_v26 }
 0x278   : > { %v1081_v29 = vrot.slane %v1059_v27, %v1066_v1  ;;  %v1088_v30 = vrot.slane %v1060_v28, %v1066_v1 }
 0x27a   : > { %v1090_v31 = vcombine.low %v1081_v29, %v1088_v30 }
 0x27c   : > { %v1104_v33 = vrot.slane %v1090_v31, %v1066_v1 }
 0x27e   : > { %v1105_v34 = vcombine.low %v1097_v32, %v1104_v33 }
 0x280   : > { %1123 = vst [vmem:[%s305_s22] sm:$0xff] %v1105_v34 }
 0x290   : > { %v1032_v39 = vpop.f32.mrb[4].mxu1 }
 0x291   : > { %v1033_v41 = vadd.f32 %v1032_v39, %v667_v36  ;;  %v1034_v43 = vpop.f32.mrb[5].mxu1 }
 0x292   : > { %v1035_v44 = vadd.f32 %v1034_v43, %v671_v37 }
 0x293   : > { %v1045_v46 = vmax.f32 %v1033_v41, 0.0 }
 0x294   : > { %v1046_v47 = vmax.f32 %v1035_v44, 0.0 }
 0x296   : > { %v1106_v48 = vcombine.low %v1045_v46, %v1046_v47 }
 0x298   : > { %v1113_v49 = vrot.slane %v1106_v48, %v1066_v1 }
 0x29a   : > { %v1120_v50 = vrot.slane %v1113_v49, %v1066_v1 }
 0x29c   : > { %1128 = vst.msk [vmem:[%s305_s22 + $0x8] sm:$0x3] %vm1126_vm3, %v1120_v50 }
 0x29d PF: > { %s18_s20 = sadd.s32 1, %s1665_s20   ;;  %s1914_s18 = smov %s1661_s19 }
 0x29e   : > { %p15_p8 = scmp.ge.s32.totalorder %s18_s20, 8   ;;  %s1915_s19 = smov %s1917_s26 }
 0x2a0   :  { %17 = sbr.rel (!%p15_p8) target bundleno = 4 (0x4), region = 95 }
 0x2a7   :  { %1148 = vsyncpa [#allocation4], 1 }
 0x2a8   :  { %1150 = vsyncpa [#allocation4 + $0x1], 1 }
 0x2a9   :  { %1151 = vsyncpa [#allocation6], 1 }
 0x2aa   :  { %1152 = vsyncpa [#allocation9], 1 }

// kernel: rgbdmh_forward.3
= control target key start
LH: loop header
LB: loop body
LE: loop exit
PB: predicated region body
PF: predicated region fallthrough
CT: control target
= control target key end

     0   :  { %10 = vsyncpa [#allocation4], 0  ;;  %s2298_s0 = inlined_call_operand.vmem [shape: bf16[2,64,27], index: 0, kind: input, shape index: {}]   ;;  %s2299_s1 = inlined_call_operand.hbm [shape: bf16[27,128], index: 1, kind: input, shape index: {}]   ;;  %s2300_s2 = inlined_call_operand.hbm [shape: f32[1,128], index: 2, kind: input, shape index: {}]   ;;  %s2301_s3 = inlined_call_operand.vmem [shape: f32[128,1280], index: 3, kind: input, shape index: {}]   ;;  %s2302_s4 = inlined_call_operand.hbm [shape: f32[1,1280], index: 4, kind: input, shape index: {}]   ;;  %s2303_s5 = inlined_call_operand.vmem [shape: f32[2,1,1280], index: 5, kind: output, shape index: {}]  }
   0x1   :  { %11 = vsyncpa [#allocation6], 0  ;;  %s1647_s18 = smov 0   ;;  %s1649_s19 = smov 0  }
   0x2   :  { %s1651_s20 = smov 0  }
   0x3 LB: > { %s1609_s21 = smov [#allocation5]   ;;  %s1221_s23 = sadd.s32 4294967295, %s1607_s20   ;;  %s1607_s20 = sphi %s1651_s20, %s17_s20   ;;  %s1603_s19 = sphi %s1649_s19, %s2316_s19   ;;  %s1599_s18 = sphi %s1647_s18, %s2315_s18  }
   0x4   : > { %s198_s22 = sshll.u32 %s1609_s21, 4  ;;  %p1223_p0 = scmp.ge.s32.totalorder %s1607_s20, 1  ;;  %s199_s22 = int_to_ptr.vmem [resolvable:$true] %s198_s22 }
   0x5   : > { %p172_p1 = scmp.lt.s32.totalorder %s1607_s20, 3  ;;  %p1665_p2 = scmp.eq.s32.totalorder %s1221_s23, 0 }
   0x6   : > { %s29_s26 = sadd.s32 1, %s1603_s19  ;;  %s1610_s29 = smov [#allocation3]  }
   0x7   : > { %s2307_s24 = scalar_select %p1665_p2, 1, 0 }
   0x8   : > { %p1669_p3 = pnand %p1223_p0, %p172_p1  ;;  %p1682_p6 = scmp.ge.s32.totalorder %s29_s26, 2 }
   0x9   : > { %s184_s30 = sshll.u32 %s1610_s29, 4  ;;  %s1493_s8 = scalar_lea.hbm %s2300_s2, 16  ;;  %s1686_s30 = int_to_ptr.vmem [resolvable:$true] %s184_s30 }
   0xa   : > { %s2308_s25 = scalar_select %p1669_p3, 1, 0 }
   0xb   : > { %p1439_p4 = pneg %p1669_p3  ;;  %p1494_p7 = scmp.ne.s32.totalorder %s2300_s2, %s1493_s8 }
   0xc   : > { %s2310_s28 = scalar_select %p1682_p6, 1, 0 }
   0xd   : > { %p1678_p5 = pnand %p1665_p2, %p1439_p4  ;;  %p1500_p11 = scmp.lt.u32.totalorder %s1493_s8, %s2300_s2 }
   0xf   : > { %p1696_p8 = pneg %p1678_p5 }
  0x11   : > { %p1496_p9 = pnand %p1696_p8, %p1494_p7 }
  0x13   : > { %p1497_p10 = pneg %p1496_p9 }
  0x15   : > { %p1502_p12 = pnand %p1500_p11, %p1497_p10 }
  0x17   : > { %1505 = shalt.err (!%p1502_p12)
}
  0x18   : > { %s1506_s14 = scalar_lea.vmem %s199_s22, 16  ;;  %s1513_s15 = scalar_lea.vmem %s199_s22, 32 }
  0x19   : > { %p1507_p13 = scmp.ne.s32.totalorder %s199_s22, %s1506_s14  ;;  %p1514_p4 = scmp.lt.s32.totalorder %s199_s22, %s199_s22 }
  0x1a   : > { %p1515_p2 = scmp.lt.s32.totalorder %s1513_s15, %s1506_s14 }
  0x1b   : > { %p1509_p0 = pnand %p1507_p13, %p1696_p8 }
  0x1c   : > { %p1516_p3 = por %p1515_p2, %p1514_p4 }
  0x1d   : > { %p1510_p1 = pneg %p1509_p0 }
  0x1f   : > { %p1517_p6 = pnand %p1516_p3, %p1510_p1 }
  0x21   : > { %1520 = shalt.err (!%p1517_p6)
}
  0x22   : > { %1445 = dma.hbm_to_vmem [thread:$0]  (!%p1678_p5), %s2300_s2, 16, %s199_s22, [#allocation6]  }
  0x23   : > { %p2312_p7 = scmp.ne.s32.totalorder %s2310_s28, 0  ;;  %s1521_s29 = scalar_lea.hbm %s2299_s1, 256 }
  0x24   : > { %p1522_p2 = scmp.ne.s32.totalorder %s2299_s1, %s1521_s29  ;;  %p1528_p9 = scmp.lt.u32.totalorder %s1521_s29, %s2299_s1 }
  0x25   : > { %s2318_s26 = smov (%p2312_p7, %s29_s26), 0 }
  0x26   : > { %p1524_p3 = pnand %p1522_p2, %p1696_p8 }
  0x28   : > { %p1525_p6 = pneg %p1524_p3 }
  0x2a   : > { %p1530_p10 = pnand %p1528_p9, %p1525_p6 }
  0x2c   : > { %1533 = shalt.err (!%p1530_p10)
}
  0x2d   : > { %s1534_s22 = scalar_lea.vmem %s1686_s30, 256  ;;  %p1542_p0 = scmp.lt.s32.totalorder %s1686_s30, %s1686_s30 }
  0x2e   : > { %p1535_p11 = scmp.ne.s32.totalorder %s1686_s30, %s1534_s22  ;;  %p1543_p1 = scmp.lt.s32.totalorder %s1534_s22, %s1534_s22 }
  0x30   : > { %p1537_p12 = pnand %p1535_p11, %p1696_p8  ;;  %p1544_p4 = por %p1543_p1, %p1542_p0 }
  0x32   : > { %p1538_p13 = pneg %p1537_p12 }
  0x34   : > { %p1545_p7 = pnand %p1544_p4, %p1538_p13 }
  0x36   : > { %1548 = shalt.err (!%p1545_p7)
}
  0x37   : > { %s1611_s28 = smov 64   ;;  %s1612_s10 = smov 4  }
  0x38   : > { %1442 = dma.hbm_to_vmem [thread:$0]  (!%p1678_p5), %s2299_s1, 256, %s1686_s30, [#allocation4], %s1611_s28, %s1611_s28, %s1612_s10  }
  0x39   : > { %s1613_s14 = smov [#allocation7]   ;;  %s1549_s21 = scalar_lea.hbm %s2302_s4, 160 }
  0x3a   : > { %s212_s15 = sshll.u32 %s1613_s14, 4  ;;  %p1550_p2 = scmp.ne.s32.totalorder %s2302_s4, %s1549_s21  ;;  %s213_s15 = int_to_ptr.vmem [resolvable:$true] %s212_s15 }
  0x3b   : > { %p1556_p9 = scmp.lt.u32.totalorder %s1549_s21, %s2302_s4 }
  0x3c   : > { %p1552_p3 = pnand %p1550_p2, %p1696_p8 }
  0x3e   : > { %p1553_p6 = pneg %p1552_p3 }
  0x40   : > { %p1558_p10 = pnand %p1556_p9, %p1553_p6 }
  0x42   : > { %1561 = shalt.err (!%p1558_p10)
}
  0x43   : > { %s1562_s30 = scalar_lea.vmem %s213_s15, 160  ;;  %p1570_p0 = scmp.lt.s32.totalorder %s213_s15, %s213_s15 }
  0x44   : > { %p1563_p11 = scmp.ne.s32.totalorder %s213_s15, %s1562_s30  ;;  %p1571_p1 = scmp.lt.s32.totalorder %s1562_s30, %s1562_s30 }
  0x46   : > { %p1565_p12 = pnand %p1563_p11, %p1696_p8  ;;  %p1572_p4 = por %p1571_p1, %p1570_p0 }
  0x48   : > { %p1566_p13 = pneg %p1565_p12 }
  0x4a   : > { %p1573_p7 = pnand %p1572_p4, %p1566_p13 }
  0x4c   : > { %1576 = shalt.err (!%p1573_p7)
}
  0x4d   : > { %1448 = dma.hbm_to_vmem [thread:$0]  (!%p1678_p5), %s2302_s4, 160, %s213_s15, [#allocation6]  }
  0x4e   : > { %p2313_p2 = scmp.ne.s32.totalorder %s2308_s25, 0 }
  0x4f   : > { %p2314_p3 = scmp.ne.s32.totalorder (!%p2313_p2), %s2307_s24, 0 }
  0x50   : > { %238 = sbr.rel (%p2313_p2) target bundleno = 645 (0x285), region = 40 }
  0x57   : > { %1590 = dma.done.wait (%p2314_p3), [#allocation4], 256  }
  0x58   : > { %1592 = vsyncadd (%p2314_p3), [#allocation4], 4294967040 }
  0x59   : > { %1594 = dma.done.wait (%p2314_p3), [#allocation6], 176  }
  0x5a   : > { %1596 = vsyncadd (%p2314_p3), [#allocation6], 4294967120  ;;  %p278_p8 = scmp.lt.s32.totalorder %s1599_s18, 1  ;;  %vm360_vm0 = vcmask 1044480   ;;  %vm361_vm1 = vcmask 1045504   ;;  %v1614_v0 = vmov 65535  }
  0x5b   : > { %v362_v1 = vsel %vm360_vm0, 4294967295, %v1614_v0  ;;  %vm347_vm2 = vcmask 220160   ;;  %v1487_v2 = vld [vmem:[#allocation3] sm:$0xff]   ;;  %v1488_v4 = vld [vmem:[#allocation3 + $0x8] sm:$0x3f]   ;;  %v472_v11 = vld [vmem:[%s2301_s3 + $0x58] sm:$0xff] }
  0x5c   : > { %s2320_s18 = smov (!%p278_p8, %s1599_s18), 1  ;;  %v363_v3 = vsel %vm361_vm1, %v362_v1, 0  ;;  %1254 = vmatprep.subr.bf16.mxu0 %v1487_v2  ;;  %v462_v10 = vld [vmem:[%s2301_s3 + $0x8] sm:$0xff]  ;;  %v464_v12 = vld [vmem:[%s2301_s3 + $0x18] sm:$0xff]  ;;  %v461_v15 = vld [vmem:[%s2301_s3] sm:$0xff]  ;;  %v1615_v61 = vmov 0.0  }
  0x5d   : > { %s1247_s25 = sshll.u32 %s2320_s18, 5  ;;  %1255 = vmatpush3.bf16.msra.mxu0 %v1487_v2  ;;  %v365_v6 = vand.u32 %v1488_v4, %v363_v3  ;;  %v1266_v13 = vpack.c.bf16 %v472_v11, %v462_v10  ;;  %v474_v14 = vld [vmem:[%s2301_s3 + $0x68] sm:$0xff]  ;;  %v471_v16 = vld [vmem:[%s2301_s3 + $0x50] sm:$0xff]  ;;  %v473_v20 = vld [vmem:[%s2301_s3 + $0x60] sm:$0xff]  ;;  %296 = vst [vmem:[#allocation2] sm:$0x1] %v1615_v61  ;;  %739 = vmatprep.mubr.f32.mxu1 %v1615_v61 }
  0x5e   : > { %s285_s22 = scalar_lea.vmem %s2298_s0, %s1247_s25  ;;  %v1298_v17 = vpack.c.bf16 %v474_v14, %v464_v12  ;;  %v1268_v18 = vpack.c.bf16 %v471_v16, %v461_v15  ;;  %v463_v19 = vld [vmem:[%s2301_s3 + $0x10] sm:$0xff]  ;;  %v482_v22 = vld [vmem:[%s2301_s3 + $0xa8] sm:$0xff]  ;;  %v492_v23 = vld [vmem:[%s2301_s3 + $0xf8] sm:$0xff]  ;;  %s1426_s14 = smul.u32 10, %s2320_s18 }
  0x5f   : > { %v1489_v5 = vld [vmem:[%s285_s22] sm:$0xff]   ;;  %1256 = vmatprep.subr.bf16.mxu0 %v365_v6  ;;  %v1490_v7 = vld [vmem:[%s285_s22 + $0x8] sm:$0xff]   ;;  %v1491_v8 = vld [vmem:[%s285_s22 + $0x10] sm:$0xff]   ;;  %1267 = vmatprep.subr.bf16.mxu1 %v1266_v13  ;;  %v1300_v21 = vpack.c.bf16 %v473_v20, %v463_v19  ;;  %v1270_v25 = vpack.c.bf16 %v492_v23, %v482_v22 }
  0x60   : > { %1258 = vmatprep.mubr.msk.bf16.mxu0 %vm347_vm2, %v1489_v5  ;;  %v1492_v9 = vld [vmem:[%s285_s22 + $0x18] sm:$0xff]   ;;  %1269 = vmatpush1.bf16.msra.mxu1 %v1268_v18  ;;  %v494_v26 = vld [vmem:[%s2301_s3 + $0x108] sm:$0xff]  ;;  %v481_v27 = vld [vmem:[%s2301_s3 + $0xa0] sm:$0xff]  ;;  %s290_s17 = scalar_lea.vmem %s2303_s5, %s1426_s14 }
  0x61   : > { %1257 = vmatpush3.bf16.msra.mxu0 %v365_v6  ;;  %v484_v24 = vld [vmem:[%s2301_s3 + $0xb8] sm:$0xff]  ;;  %v491_v28 = vld [vmem:[%s2301_s3 + $0xf0] sm:$0xff]  ;;  %v493_v32 = vld [vmem:[%s2301_s3 + $0x100] sm:$0xff]  ;;  %1271 = vmatprep.subr.bf16.mxu1 %v1270_v25 }
  0x62   : > { %1299 = vmatprep.subr.bf16.mxu0 %v1298_v17  ;;  %v1302_v29 = vpack.c.bf16 %v494_v26, %v484_v24  ;;  %v1272_v30 = vpack.c.bf16 %v491_v28, %v481_v27  ;;  %v483_v31 = vld [vmem:[%s2301_s3 + $0xb0] sm:$0xff]  ;;  %v502_v34 = vld [vmem:[%s2301_s3 + $0x148] sm:$0xff]  ;;  %v512_v35 = vld [vmem:[%s2301_s3 + $0x198] sm:$0xff] }
  0x63   : > { %v1304_v33 = vpack.c.bf16 %v493_v32, %v483_v31  ;;  %v504_v36 = vld [vmem:[%s2301_s3 + $0x158] sm:$0xff]  ;;  %v1274_v37 = vpack.c.bf16 %v512_v35, %v502_v34  ;;  %v514_v38 = vld [vmem:[%s2301_s3 + $0x1a8] sm:$0xff]  ;;  %v501_v39 = vld [vmem:[%s2301_s3 + $0x140] sm:$0xff] }
  0x64   : > { %1259 = vmatmul.mubr.msk.bf16.vlgmr.msra.gmra.mrb[0].mxu0 %vm347_vm2, %v1490_v7  ;;  %1273 = vmatpush1.bf16.msra.mxu1 %v1272_v30  ;;  %v511_v40 = vld [vmem:[%s2301_s3 + $0x190] sm:$0xff]  ;;  %v1306_v41 = vpack.c.bf16 %v514_v38, %v504_v36  ;;  %v513_v44 = vld [vmem:[%s2301_s3 + $0x1a0] sm:$0xff]  ;;  %v522_v46 = vld [vmem:[%s2301_s3 + $0x1e8] sm:$0xff] }
  0x65   : > { %1262 = vmatprep.mubr.msk.bf16.mxu0 %vm347_vm2, %v1491_v8  ;;  %1301 = vmatpush1.bf16.msra.mxu0 %v1300_v21  ;;  %v1276_v42 = vpack.c.bf16 %v511_v40, %v501_v39  ;;  %v503_v43 = vld [vmem:[%s2301_s3 + $0x150] sm:$0xff]  ;;  %v532_v47 = vld [vmem:[%s2301_s3 + $0x238] sm:$0xff]  ;;  %v534_v50 = vld [vmem:[%s2301_s3 + $0x248] sm:$0xff] }
  0x66   : > { %1303 = vmatprep.subr.bf16.mxu0 %v1302_v29  ;;  %1275 = vmatprep.subr.bf16.mxu1 %v1274_v37  ;;  %v1308_v45 = vpack.c.bf16 %v513_v44, %v503_v43  ;;  %v524_v48 = vld [vmem:[%s2301_s3 + $0x1f8] sm:$0xff]  ;;  %v1278_v49 = vpack.c.bf16 %v532_v47, %v522_v46  ;;  %v521_v51 = vld [vmem:[%s2301_s3 + $0x1e0] sm:$0xff]  ;;  %v531_v52 = vld [vmem:[%s2301_s3 + $0x230] sm:$0xff] }
  0x67   : > { %v1310_v53 = vpack.c.bf16 %v534_v50, %v524_v48  ;;  %v1280_v54 = vpack.c.bf16 %v531_v52, %v521_v51  ;;  %v523_v55 = vld [vmem:[%s2301_s3 + $0x1f0] sm:$0xff]  ;;  %v533_v56 = vld [vmem:[%s2301_s3 + $0x240] sm:$0xff]  ;;  %v542_v58 = vld [vmem:[%s2301_s3 + $0x288] sm:$0xff] }
  0x68   : > { %1277 = vmatpush1.bf16.msra.mxu1 %v1276_v42  ;;  %v1312_v57 = vpack.c.bf16 %v533_v56, %v523_v55  ;;  %v552_v59 = vld [vmem:[%s2301_s3 + $0x2d8] sm:$0xff]  ;;  %v554_v63 = vld [vmem:[%s2301_s3 + $0x2e8] sm:$0xff]  ;;  %v541_v0 = vld [vmem:[%s2301_s3 + $0x280] sm:$0xff] }
  0x69   : > { %1305 = vmatpush1.bf16.msra.mxu0 %v1304_v33  ;;  %1279 = vmatprep.subr.bf16.mxu1 %v1278_v49  ;;  %v544_v60 = vld [vmem:[%s2301_s3 + $0x298] sm:$0xff]  ;;  %v1282_v62 = vpack.c.bf16 %v552_v59, %v542_v58  ;;  %v551_v1 = vld [vmem:[%s2301_s3 + $0x2d0] sm:$0xff]  ;;  %v553_v5 = vld [vmem:[%s2301_s3 + $0x2e0] sm:$0xff] }
  0x6a   : > { %1307 = vmatprep.subr.bf16.mxu0 %v1306_v41  ;;  %v1314_v2 = vpack.c.bf16 %v554_v63, %v544_v60  ;;  %v1284_v3 = vpack.c.bf16 %v551_v1, %v541_v0  ;;  %v543_v4 = vld [vmem:[%s2301_s3 + $0x290] sm:$0xff]  ;;  %v562_v7 = vld [vmem:[%s2301_s3 + $0x328] sm:$0xff]  ;;  %v572_v8 = vld [vmem:[%s2301_s3 + $0x378] sm:$0xff] }
  0x6b   : > { %v1316_v6 = vpack.c.bf16 %v553_v5, %v543_v4  ;;  %v1286_v10 = vpack.c.bf16 %v572_v8, %v562_v7  ;;  %v574_v11 = vld [vmem:[%s2301_s3 + $0x388] sm:$0xff]  ;;  %v561_v12 = vld [vmem:[%s2301_s3 + $0x320] sm:$0xff]  ;;  %v571_v13 = vld [vmem:[%s2301_s3 + $0x370] sm:$0xff] }
  0x6c   : > { %1263 = vmatmul.mubr.msk.bf16.gmra.mrb[4].mxu0 %vm347_vm2, %v1492_v9  ;;  %1281 = vmatpush1.bf16.msra.mxu1 %v1280_v54  ;;  %v564_v9 = vld [vmem:[%s2301_s3 + $0x338] sm:$0xff]  ;;  %v1288_v15 = vpack.c.bf16 %v571_v13, %v561_v12  ;;  %v563_v16 = vld [vmem:[%s2301_s3 + $0x330] sm:$0xff]  ;;  %v573_v17 = vld [vmem:[%s2301_s3 + $0x380] sm:$0xff] }
  0x6d   : > { %1309 = vmatpush1.bf16.msra.mxu0 %v1308_v45  ;;  %810 = vmatprep.mubr.f32.mxu0 %v1615_v61  ;;  %v1318_v14 = vpack.c.bf16 %v574_v11, %v564_v9  ;;  %v582_v18 = vld [vmem:[%s2301_s3 + $0x3c8] sm:$0xff]  ;;  %v1320_v19 = vpack.c.bf16 %v573_v17, %v563_v16  ;;  %v592_v20 = vld [vmem:[%s2301_s3 + $0x418] sm:$0xff]  ;;  %v581_v25 = vld [vmem:[%s2301_s3 + $0x3c0] sm:$0xff] }
  0x6e   : > { %1311 = vmatprep.subr.bf16.mxu0 %v1310_v53  ;;  %1283 = vmatprep.subr.bf16.mxu1 %v1282_v62  ;;  %v584_v21 = vld [vmem:[%s2301_s3 + $0x3d8] sm:$0xff]  ;;  %v594_v22 = vld [vmem:[%s2301_s3 + $0x428] sm:$0xff]  ;;  %v1290_v23 = vpack.c.bf16 %v592_v20, %v582_v18  ;;  %v591_v26 = vld [vmem:[%s2301_s3 + $0x410] sm:$0xff] }
  0x6f   : > { %v1322_v24 = vpack.c.bf16 %v594_v22, %v584_v21  ;;  %v583_v27 = vld [vmem:[%s2301_s3 + $0x3d0] sm:$0xff]  ;;  %v1292_v28 = vpack.c.bf16 %v591_v26, %v581_v25  ;;  %v593_v29 = vld [vmem:[%s2301_s3 + $0x420] sm:$0xff]  ;;  %v602_v30 = vld [vmem:[%s2301_s3 + $0x468] sm:$0xff] }
  0x70   : > { %1285 = vmatpush1.bf16.msra.mxu1 %v1284_v3  ;;  %v612_v31 = vld [vmem:[%s2301_s3 + $0x4b8] sm:$0xff]  ;;  %v1324_v32 = vpack.c.bf16 %v593_v29, %v583_v27  ;;  %v614_v35 = vld [vmem:[%s2301_s3 + $0x4c8] sm:$0xff]  ;;  %v601_v36 = vld [vmem:[%s2301_s3 + $0x460] sm:$0xff] }
  0x71   : > { %1313 = vmatpush1.bf16.msra.mxu0 %v1312_v57  ;;  %1287 = vmatprep.subr.bf16.mxu1 %v1286_v10  ;;  %v1294_v33 = vpack.c.bf16 %v612_v31, %v602_v30  ;;  %v604_v34 = vld [vmem:[%s2301_s3 + $0x478] sm:$0xff]  ;;  %v611_v38 = vld [vmem:[%s2301_s3 + $0x4b0] sm:$0xff]  ;;  %v613_v40 = vld [vmem:[%s2301_s3 + $0x4c0] sm:$0xff] }
  0x72   : > { %1315 = vmatprep.subr.bf16.mxu0 %v1314_v2  ;;  %v1326_v37 = vpack.c.bf16 %v614_v35, %v604_v34  ;;  %v603_v39 = vld [vmem:[%s2301_s3 + $0x470] sm:$0xff]  ;;  %v1296_v41 = vpack.c.bf16 %v611_v38, %v601_v36  ;;  %v466_v42 = vld [vmem:[%s2301_s3 + $0x28] sm:$0xff]  ;;  %v476_v43 = vld [vmem:[%s2301_s3 + $0x78] sm:$0xff] }
  0x73   : > { %v1328_v44 = vpack.c.bf16 %v613_v40, %v603_v39  ;;  %v1330_v45 = vpack.c.bf16 %v476_v43, %v466_v42  ;;  %v468_v46 = vld [vmem:[%s2301_s3 + $0x38] sm:$0xff]  ;;  %v478_v47 = vld [vmem:[%s2301_s3 + $0x88] sm:$0xff]  ;;  %v1234_v49 = vld [vmem:[#allocation5] ss:$0 sm:$0xff] }
  0x74   : > { %1289 = vmatpush1.bf16.msra.mxu1 %v1288_v15  ;;  %v1362_v48 = vpack.c.bf16 %v478_v47, %v468_v46  ;;  %v465_v26 = vld [vmem:[%s2301_s3 + $0x20] sm:$0xff]  ;;  %v475_v27 = vld [vmem:[%s2301_s3 + $0x70] sm:$0xff]  ;;  %v486_v30 = vld [vmem:[%s2301_s3 + $0xc8] sm:$0xff] }
  0x75   : > { %1317 = vmatpush1.bf16.msra.mxu0 %v1316_v6  ;;  %1291 = vmatprep.subr.bf16.mxu1 %v1290_v23  ;;  %v440_v23 = vld [vmem:[#allocation2] sm:$0x1]  ;;  %v496_v31 = vld [vmem:[%s2301_s3 + $0x118] sm:$0xff]  ;;  %v1332_v35 = vpack.c.bf16 %v475_v27, %v465_v26  ;;  %v495_v38 = vld [vmem:[%s2301_s3 + $0x110] sm:$0xff] }
  0x76   : > { %1319 = vmatprep.subr.bf16.mxu0 %v1318_v14  ;;  %v477_v29 = vld [vmem:[%s2301_s3 + $0x80] sm:$0xff]  ;;  %v1334_v40 = vpack.c.bf16 %v496_v31, %v486_v30  ;;  %v487_v42 = vld [vmem:[%s2301_s3 + $0xd0] sm:$0xff]  ;;  %v508_v46 = vld [vmem:[%s2301_s3 + $0x178] sm:$0xff] }
  0x77   : > { %v497_v43 = vld [vmem:[%s2301_s3 + $0x120] sm:$0xff]  ;;  %v518_v47 = vld [vmem:[%s2301_s3 + $0x1c8] sm:$0xff]  ;;  %v567_v27 = vld [vmem:[%s2301_s3 + $0x350] sm:$0xff] }
  0x78   : > { %1293 = vmatpush1.bf16.msra.mxu1 %v1292_v28  ;;  %v467_v28 = vld [vmem:[%s2301_s3 + $0x30] sm:$0xff]  ;;  %v596_v30 = vld [vmem:[%s2301_s3 + $0x438] sm:$0xff] }
  0x79   : > { %1321 = vmatpush1.bf16.msra.mxu0 %v1320_v19  ;;  %1295 = vmatprep.subr.bf16.mxu1 %v1294_v33  ;;  %v498_v33 = vld [vmem:[%s2301_s3 + $0x128] sm:$0xff]  ;;  %v1364_v36 = vpack.c.bf16 %v477_v29, %v467_v28  ;;  %v577_v28 = vld [vmem:[%s2301_s3 + $0x3a0] sm:$0xff]  ;;  %v588_v31 = vld [vmem:[%s2301_s3 + $0x3f8] sm:$0xff] }
  0x7a   : > { %1323 = vmatprep.subr.bf16.mxu0 %v1322_v24  ;;  %v586_v29 = vld [vmem:[%s2301_s3 + $0x3e8] sm:$0xff] }
  0x7c   : > { %1297 = vmatpush1.bf16.msra.mxu1 %v1296_v41 }
  0x7d   : > { %1325 = vmatpush1.bf16.msra.mxu0 %v1324_v32  ;;  %1331 = vmatprep.subr.bf16.mxu1 %v1330_v45  ;;  %v488_v32 = vld [vmem:[%s2301_s3 + $0xd8] sm:$0xff] }
  0x7e   : > { %1327 = vmatprep.subr.bf16.mxu0 %v1326_v37  ;;  %v485_v37 = vld [vmem:[%s2301_s3 + $0xc0] sm:$0xff]  ;;  %v1366_v41 = vpack.c.bf16 %v498_v33, %v488_v32  ;;  %v516_v45 = vld [vmem:[%s2301_s3 + $0x1b8] sm:$0xff]  ;;  %v598_v32 = vld [vmem:[%s2301_s3 + $0x448] sm:$0xff] }
  0x81   : > { %1329 = vmatpush1.bf16.msra.mxu0 %v1328_v44  ;;  %v506_v44 = vld [vmem:[%s2301_s3 + $0x168] sm:$0xff] }
  0x82   : > { %1363 = vmatprep.subr.bf16.mxu0 %v1362_v48  ;;  %v1336_v48 = vpack.c.bf16 %v495_v38, %v485_v37  ;;  %v1354_v37 = vpack.c.bf16 %v596_v30, %v586_v29  ;;  %v1386_v38 = vpack.c.bf16 %v598_v32, %v588_v31  ;;  %v589_v31 = vld [vmem:[%s2301_s3 + $0x400] sm:$0xff]  ;;  %v599_v32 = vld [vmem:[%s2301_s3 + $0x450] sm:$0xff] }
 0x137   : > { %v1260_v50 = vpop.f32.mrb[0].mxu0 }
 0x138   : > { %v401_v51 = vpop.f32.mrb[1].mxu0  ;;  %v410_v55 = vadd.f32 %v1260_v50, %v1234_v49  ;;  %v505_v50 = vld [vmem:[%s2301_s3 + $0x160] sm:$0xff] }
 0x139   : > { %v402_v52 = vadd.f32 %v1234_v49, %v401_v51  ;;  %v1261_v53 = vpop.f32.mrb[2].mxu0  ;;  %v515_v51 = vld [vmem:[%s2301_s3 + $0x1b0] sm:$0xff] }
 0x13a   : > { %v404_v54 = vpop.f32.mrb[3].mxu0  ;;  %v413_v58 = vadd.f32 %v1261_v53, %v1234_v49  ;;  %v434_v60 = vmax.f32 %v410_v55, 0.0  ;;  %v1370_v53 = vpack.c.bf16 %v518_v47, %v508_v46  ;;  %v517_v55 = vld [vmem:[%s2301_s3 + $0x1c0] sm:$0xff] }
 0x13b   : > { %v405_v56 = vadd.f32 %v1234_v49, %v404_v54  ;;  %v432_v57 = vmax.f32 %v402_v52, 0.0  ;;  %v1338_v52 = vpack.c.bf16 %v516_v45, %v506_v44  ;;  %v507_v54 = vld [vmem:[%s2301_s3 + $0x170] sm:$0xff]  ;;  %v608_v44 = vld [vmem:[%s2301_s3 + $0x498] sm:$0xff]  ;;  %v618_v45 = vld [vmem:[%s2301_s3 + $0x4e8] sm:$0xff] }
 0x13c   : > { %v435_v1 = vmax.f32 %v413_v58, 0.0  ;;  %v528_v58 = vld [vmem:[%s2301_s3 + $0x218] sm:$0xff] }
 0x13d   : > { %v433_v59 = vmax.f32 %v405_v56, 0.0  ;;  %v526_v56 = vld [vmem:[%s2301_s3 + $0x208] sm:$0xff] }
 0x13f   : > { %v441_v62 = vadd.f32 %v433_v59, %v432_v57  ;;  %v1264_v63 = vpop.f32.mrb[4].mxu0  ;;  %v536_v57 = vld [vmem:[%s2301_s3 + $0x258] sm:$0xff]  ;;  %v538_v59 = vld [vmem:[%s2301_s3 + $0x268] sm:$0xff] }
 0x140   : > { %v417_v0 = vpop.f32.mrb[5].mxu0  ;;  %v426_v6 = vadd.f32 %v1264_v63, %v1234_v49  ;;  %v525_v63 = vld [vmem:[%s2301_s3 + $0x200] sm:$0xff] }
 0x141   : > { %v442_v2 = vadd.f32 %v441_v62, %v434_v60  ;;  %v418_v3 = vadd.f32 %v1234_v49, %v417_v0  ;;  %v1265_v4 = vpop.f32.mrb[6].mxu0  ;;  %v1340_v60 = vpack.c.bf16 %v515_v51, %v505_v50  ;;  %v1372_v62 = vpack.c.bf16 %v517_v55, %v507_v54  ;;  %v535_v0 = vld [vmem:[%s2301_s3 + $0x250] sm:$0xff]  ;;  %v470_v54 = vld [vmem:[%s2301_s3 + $0x48] sm:$0xff]  ;;  %v480_v55 = vld [vmem:[%s2301_s3 + $0x98] sm:$0xff] }
 0x142   : > { %v420_v5 = vpop.f32.mrb[7].mxu0  ;;  %v429_v11 = vadd.f32 %v1265_v4, %v1234_v49  ;;  %v438_v13 = vmax.f32 %v426_v6, 0.0  ;;  %v537_v4 = vld [vmem:[%s2301_s3 + $0x260] sm:$0xff]  ;;  %v556_v6 = vld [vmem:[%s2301_s3 + $0x2f8] sm:$0xff]  ;;  %v1390_v50 = vpack.c.bf16 %v618_v45, %v608_v44  ;;  %v615_v51 = vld [vmem:[%s2301_s3 + $0x4d0] sm:$0xff] }
 0x143   : > { %v436_v7 = vmax.f32 %v418_v3, 0.0  ;;  %v443_v8 = vadd.f32 %v442_v2, %v435_v1  ;;  %v421_v9 = vadd.f32 %v1234_v49, %v420_v5  ;;  %v1368_v49 = vpack.c.bf16 %v497_v43, %v487_v42  ;;  %v527_v3 = vld [vmem:[%s2301_s3 + $0x210] sm:$0xff]  ;;  %v546_v5 = vld [vmem:[%s2301_s3 + $0x2a8] sm:$0xff]  ;;  %v616_v43 = vld [vmem:[%s2301_s3 + $0x4d8] sm:$0xff] }
 0x144   : > { %v439_v15 = vmax.f32 %v429_v11, 0.0  ;;  %v1342_v1 = vpack.c.bf16 %v536_v57, %v526_v56  ;;  %v1374_v2 = vpack.c.bf16 %v538_v59, %v528_v58  ;;  %v545_v11 = vld [vmem:[%s2301_s3 + $0x2a0] sm:$0xff]  ;;  %v606_v42 = vld [vmem:[%s2301_s3 + $0x488] sm:$0xff]  ;;  %v1394_v58 = vpack.c.bf16 %v480_v55, %v470_v54  ;;  %v621_v45 = vld [vmem:[#allocation7] sm:$0xff] }
 0x145   : > { %v444_v10 = vadd.f32 %v443_v8, %v436_v7  ;;  %v437_v12 = vmax.f32 %v421_v9, 0.0  ;;  %v548_v7 = vld [vmem:[%s2301_s3 + $0x2b8] sm:$0xff]  ;;  %v558_v8 = vld [vmem:[%s2301_s3 + $0x308] sm:$0xff]  ;;  %v1344_v9 = vpack.c.bf16 %v535_v0, %v525_v63  ;;  %v469_v59 = vld [vmem:[%s2301_s3 + $0x40] sm:$0xff] }
 0x146   : > { %v500_v63 = vld [vmem:[%s2301_s3 + $0x138] sm:$0xff] }
 0x147   : > { %v445_v14 = vadd.f32 %v444_v10, %v437_v12  ;;  %v1376_v10 = vpack.c.bf16 %v537_v4, %v527_v3  ;;  %v555_v12 = vld [vmem:[%s2301_s3 + $0x2f0] sm:$0xff]  ;;  %v510_v4 = vld [vmem:[%s2301_s3 + $0x188] sm:$0xff] }
 0x148   : > { %v499_v3 = vld [vmem:[%s2301_s3 + $0x130] sm:$0xff] }
 0x149   : > { %v446_v16 = vadd.f32 %v445_v14, %v438_v13  ;;  %v1346_v13 = vpack.c.bf16 %v556_v6, %v546_v5  ;;  %v1378_v14 = vpack.c.bf16 %v558_v8, %v548_v7  ;;  %v520_v5 = vld [vmem:[%s2301_s3 + $0x1d8] sm:$0xff]  ;;  %v509_v8 = vld [vmem:[%s2301_s3 + $0x180] sm:$0xff] }
 0x14a   : > { %v1402_v7 = vpack.c.bf16 %v520_v5, %v510_v4 }
 0x14b   : > { %v447_v17 = vadd.f32 %v446_v16, %v439_v15  ;;  %v547_v15 = vld [vmem:[%s2301_s3 + $0x2b0] sm:$0xff]  ;;  %v557_v16 = vld [vmem:[%s2301_s3 + $0x300] sm:$0xff] }
 0x14d   : > { %v448_v18 = vrot.slane %v447_v17, 4 }
 0x14f   : > { %v449_v19 = vadd.f32 %v448_v18, %v447_v17  ;;  %v566_v17 = vld [vmem:[%s2301_s3 + $0x348] sm:$0xff]  ;;  %v576_v18 = vld [vmem:[%s2301_s3 + $0x398] sm:$0xff] }
 0x151   : > { %v450_v20 = vrot.slane %v449_v19, 2 }
 0x153   : > { %v451_v21 = vadd.f32 %v450_v20, %v449_v19  ;;  %v568_v19 = vld [vmem:[%s2301_s3 + $0x358] sm:$0xff]  ;;  %v578_v20 = vld [vmem:[%s2301_s3 + $0x3a8] sm:$0xff] }
 0x154   : > { %v1382_v26 = vpack.c.bf16 %v578_v20, %v568_v19  ;;  %v549_v19 = vld [vmem:[%s2301_s3 + $0x2c0] sm:$0xff]  ;;  %v559_v20 = vld [vmem:[%s2301_s3 + $0x310] sm:$0xff] }
 0x155   : > { %v452_v22 = vrot.slane %v451_v21, 1 }
 0x157   : > { %v453_v24 = vadd.f32 %v452_v22, %v451_v21  ;;  %v1348_v21 = vpack.c.bf16 %v555_v12, %v545_v11  ;;  %v1380_v22 = vpack.c.bf16 %v557_v16, %v547_v15  ;;  %v540_v11 = vld [vmem:[%s2301_s3 + $0x278] sm:$0xff]  ;;  %v550_v15 = vld [vmem:[%s2301_s3 + $0x2c8] sm:$0xff] }
 0x158   : > { %v560_v16 = vld [vmem:[%s2301_s3 + $0x318] sm:$0xff] }
 0x159   : > { %v454_v25 = vadd.f32 %v453_v24, %v440_v23  ;;  %v565_v23 = vld [vmem:[%s2301_s3 + $0x340] sm:$0xff]  ;;  %v575_v24 = vld [vmem:[%s2301_s3 + $0x390] sm:$0xff] }
 0x15a   : > { %v1352_v33 = vpack.c.bf16 %v575_v24, %v565_v23  ;;  %v1412_v23 = vpack.c.bf16 %v559_v20, %v549_v19 }
 0x15b   : > { %455 = vst [vmem:[#allocation2] sm:$0x1] %v454_v25  ;;  %v1350_v25 = vpack.c.bf16 %v576_v18, %v566_v17  ;;  %v1410_v18 = vpack.c.bf16 %v560_v16, %v550_v15 }
 0x162   : > { %v459_v34 = vld [vmem:[#allocation2] sm:$0x1] }
 0x163   : > { %v2016_v39 = vmul.f32 0.015625, %v459_v34  ;;  %v1384_v34 = vpack.c.bf16 %v577_v28, %v567_v27  ;;  %v590_v27 = vld [vmem:[%s2301_s3 + $0x408] sm:$0xff]  ;;  %v600_v28 = vld [vmem:[%s2301_s3 + $0x458] sm:$0xff] }
 0x164   : > { %v1418_v30 = vpack.c.bf16 %v600_v28, %v590_v27 }
 0x165   : > { %740 = vmatmul.mubr.f32.vlgmr.msra.gmra.mrb[0].mxu1 %v2016_v39  ;;  %811 = vmatmul.mubr.f32.vlgmr.msra.gmra.mrb[8].mxu0 %v2016_v39 }
 0x166   : > { %1333 = vmatpush1.bf16.msra.mxu1 %v1332_v35  ;;  %1365 = vmatpush1.bf16.msra.mxu0 %v1364_v36  ;;  %v585_v35 = vld [vmem:[%s2301_s3 + $0x3e0] sm:$0xff]  ;;  %v595_v36 = vld [vmem:[%s2301_s3 + $0x430] sm:$0xff] }
 0x167   : > { %1335 = vmatprep.subr.bf16.mxu1 %v1334_v40  ;;  %1367 = vmatprep.subr.bf16.mxu0 %v1366_v41  ;;  %v587_v40 = vld [vmem:[%s2301_s3 + $0x3f0] sm:$0xff]  ;;  %v597_v41 = vld [vmem:[%s2301_s3 + $0x440] sm:$0xff]  ;;  %v1356_v46 = vpack.c.bf16 %v595_v36, %v585_v35  ;;  %v1420_v35 = vpack.c.bf16 %v599_v32, %v589_v31 }
 0x168   : > { %881 = vmatprep.mubr.f32.mxu1 %v1615_v61  ;;  %952 = vmatprep.mubr.f32.mxu0 %v1615_v61  ;;  %v1388_v47 = vpack.c.bf16 %v597_v41, %v587_v40  ;;  %v625_v41 = vlaneseq }
 0x16a   : > { %1337 = vmatpush1.bf16.msra.mxu1 %v1336_v48  ;;  %1369 = vmatpush1.bf16.msra.mxu0 %v1368_v49  ;;  %v605_v48 = vld [vmem:[%s2301_s3 + $0x480] sm:$0xff]  ;;  %v1358_v49 = vpack.c.bf16 %v616_v43, %v606_v42  ;;  %v2273_v42 = vshrl.u32 %v625_v41, 7  ;;  %vm1119_vm3 = vcmp.lt.s32.totalorder %v625_v41, 256 }
 0x16b   : > { %1339 = vmatprep.subr.bf16.mxu1 %v1338_v52  ;;  %1371 = vmatprep.subr.bf16.mxu0 %v1370_v53  ;;  %v607_v52 = vld [vmem:[%s2301_s3 + $0x490] sm:$0xff]  ;;  %v617_v53 = vld [vmem:[%s2301_s3 + $0x4e0] sm:$0xff]  ;;  %v1360_v56 = vpack.c.bf16 %v615_v51, %v605_v48  ;;  %v1616_v48 = vmov 1966171168  }
 0x16c   : > { %v1392_v57 = vpack.c.bf16 %v617_v53, %v607_v52  ;;  %v627_v43 = vsub.s32 0, %v2273_v42  ;;  %v635_v44 = vsub.s32 2, %v2273_v42 }
 0x16e   : > { %1341 = vmatpush1.bf16.msra.mxu1 %v1340_v60  ;;  %1373 = vmatpush1.bf16.msra.mxu0 %v1372_v62  ;;  %v479_v60 = vld [vmem:[%s2301_s3 + $0x90] sm:$0xff]  ;;  %v490_v62 = vld [vmem:[%s2301_s3 + $0xe8] sm:$0xff]  ;;  %v636_v51 = vrot.slane %v621_v45, %v635_v44 }
 0x16f   : > { %1343 = vmatprep.subr.bf16.mxu1 %v1342_v1  ;;  %1375 = vmatprep.subr.bf16.mxu0 %v1374_v2  ;;  %v1396_v0 = vpack.c.bf16 %v479_v60, %v469_v59  ;;  %v1398_v1 = vpack.c.bf16 %v500_v63, %v490_v62  ;;  %v489_v2 = vld [vmem:[%s2301_s3 + $0xe0] sm:$0xff] }
 0x170   : > { %v1400_v6 = vpack.c.bf16 %v499_v3, %v489_v2 }
 0x172   : > { %1345 = vmatpush1.bf16.msra.mxu1 %v1344_v9  ;;  %1377 = vmatpush1.bf16.msra.mxu0 %v1376_v10  ;;  %v519_v9 = vld [vmem:[%s2301_s3 + $0x1d0] sm:$0xff]  ;;  %v530_v10 = vld [vmem:[%s2301_s3 + $0x228] sm:$0xff] }
 0x173   : > { %1347 = vmatprep.subr.bf16.mxu1 %v1346_v13  ;;  %1379 = vmatprep.subr.bf16.mxu0 %v1378_v14  ;;  %v1406_v12 = vpack.c.bf16 %v540_v11, %v530_v10  ;;  %v529_v13 = vld [vmem:[%s2301_s3 + $0x220] sm:$0xff]  ;;  %v539_v14 = vld [vmem:[%s2301_s3 + $0x270] sm:$0xff]  ;;  %v651_v10 = vsub.s32 6, %v2273_v42  ;;  %v647_v11 = vsub.s32 5, %v2273_v42 }
 0x174   : > { %v1408_v17 = vpack.c.bf16 %v539_v14, %v529_v13 }
 0x175   : > { %v652_v13 = vrot.slane %v621_v45, %v651_v10  ;;  %v648_v14 = vrot.slane %v621_v45, %v647_v11 }
 0x176   : > { %1349 = vmatpush1.bf16.msra.mxu1 %v1348_v21  ;;  %1381 = vmatpush1.bf16.msra.mxu0 %v1380_v22  ;;  %v570_v21 = vld [vmem:[%s2301_s3 + $0x368] sm:$0xff]  ;;  %v580_v22 = vld [vmem:[%s2301_s3 + $0x3b8] sm:$0xff] }
 0x177   : > { %1351 = vmatprep.subr.bf16.mxu1 %v1350_v25  ;;  %1383 = vmatprep.subr.bf16.mxu0 %v1382_v26  ;;  %v1414_v24 = vpack.c.bf16 %v580_v22, %v570_v21  ;;  %v569_v25 = vld [vmem:[%s2301_s3 + $0x360] sm:$0xff]  ;;  %v579_v26 = vld [vmem:[%s2301_s3 + $0x3b0] sm:$0xff] }
 0x178   : > { %v1416_v29 = vpack.c.bf16 %v579_v26, %v569_v25 }
 0x17a   : > { %1353 = vmatpush1.bf16.msra.mxu1 %v1352_v33  ;;  %1385 = vmatpush1.bf16.msra.mxu0 %v1384_v34  ;;  %v610_v33 = vld [vmem:[%s2301_s3 + $0x4a8] sm:$0xff]  ;;  %v620_v34 = vld [vmem:[%s2301_s3 + $0x4f8] sm:$0xff] }
 0x17b   : > { %1355 = vmatprep.subr.bf16.mxu1 %v1354_v37  ;;  %1387 = vmatprep.subr.bf16.mxu0 %v1386_v38  ;;  %v1422_v36 = vpack.c.bf16 %v620_v34, %v610_v33  ;;  %v609_v37 = vld [vmem:[%s2301_s3 + $0x4a0] sm:$0xff]  ;;  %v619_v38 = vld [vmem:[%s2301_s3 + $0x4f0] sm:$0xff] }
 0x17c   : > { %v1424_v40 = vpack.c.bf16 %v619_v38, %v609_v37 }
 0x17e   : > { %1357 = vmatpush1.bf16.msra.mxu1 %v1356_v46  ;;  %1389 = vmatpush1.bf16.msra.mxu0 %v1388_v47  ;;  %v631_v46 = vsub.s32 1, %v2273_v42  ;;  %v639_v47 = vsub.s32 3, %v2273_v42 }
 0x17f   : > { %1359 = vmatprep.subr.bf16.mxu1 %v1358_v49  ;;  %1391 = vmatprep.subr.bf16.mxu0 %v1390_v50  ;;  %v1055_v49 = vunpack.c.l.s4 %v1616_v48  ;;  %v628_v50 = vrot.slane %v621_v45, %v627_v43 }
 0x180   : > { %v632_v52 = vrot.slane %v621_v45, %v631_v46  ;;  %v640_v53 = vrot.slane %v621_v45, %v639_v47 }
 0x181   : > { %v1056_v55 = vunpack.c.0.s8 %v1055_v49 }
 0x182   : > { %1361 = vmatpush1.bf16.msra.mxu1 %v1360_v56  ;;  %1393 = vmatpush1.bf16.msra.mxu0 %v1392_v57 }
 0x183   : > { %1395 = vmatprep.subr.bf16.mxu1 %v1394_v58  ;;  %v1059_v2 = vsub.s32 %v1056_v55, %v2273_v42 }
 0x185   : > { %882 = vmatmul.mubr.f32.vlgmr.msra.gmra.mrb[2].mxu1 %v2016_v39  ;;  %953 = vmatmul.mubr.f32.vlgmr.msra.gmra.mrb[10].mxu0 %v2016_v39 }
 0x186   : > { %1397 = vmatpush1.bf16.msra.mxu1 %v1396_v0  ;;  %1023 = vmatprep.mubr.f32.mxu1 %v1615_v61  ;;  %v1404_v61 = vpack.c.bf16 %v519_v9, %v509_v8  ;;  %v643_v9 = vsub.s32 4, %v2273_v42 }
 0x187   : > { %1399 = vmatprep.subr.bf16.mxu1 %v1398_v1 }
 0x18a   : > { %1401 = vmatpush1.bf16.msra.mxu1 %v1400_v6 }
 0x18b   : > { %1403 = vmatprep.subr.bf16.mxu1 %v1402_v7 }
 0x18e   : > { %1405 = vmatpush1.bf16.msra.mxu1 %v1404_v61  ;;  %v655_v61 = vsub.s32 7, %v2273_v42 }
 0x18f   : > { %1407 = vmatprep.subr.bf16.mxu1 %v1406_v12  ;;  %v644_v12 = vrot.slane %v621_v45, %v643_v9 }
 0x190   : > { %v656_v15 = vrot.slane %v621_v45, %v655_v61 }
 0x192   : > { %1409 = vmatpush1.bf16.msra.mxu1 %v1408_v17 }
 0x193   : > { %1411 = vmatprep.subr.bf16.mxu1 %v1410_v18 }
 0x196   : > { %1413 = vmatpush1.bf16.msra.mxu1 %v1412_v23 }
 0x197   : > { %1415 = vmatprep.subr.bf16.mxu1 %v1414_v24 }
 0x19a   : > { %1417 = vmatpush1.bf16.msra.mxu1 %v1416_v29 }
 0x19b   : > { %1419 = vmatprep.subr.bf16.mxu1 %v1418_v30 }
 0x19e   : > { %1421 = vmatpush1.bf16.msra.mxu1 %v1420_v35 }
 0x19f   : > { %1423 = vmatprep.subr.bf16.mxu1 %v1422_v36  ;;  %v622_v36 = vld [vmem:[#allocation7 + $0x8] sm:$0x3] }
 0x1a0   : > { %v660_v37 = vrot.slane %v622_v36, %v627_v43  ;;  %v664_v38 = vrot.slane %v622_v36, %v631_v46 }
 0x1a2   : > { %1425 = vmatpush1.bf16.msra.mxu1 %v1424_v40 }
 0x1a5   : > { %1024 = vmatmul.mubr.f32.vlgmr.msra.gmra.mrb[4].mxu1 %v2016_v39 }
 0x238   : > { %v741_v39 = vpop.f32.mrb[0].mxu1  ;;  %v812_v54 = vpop.f32.mrb[8].mxu0 }
 0x239   : > { %v742_v56 = vadd.f32 %v741_v39, %v628_v50  ;;  %v813_v57 = vadd.f32 %v812_v54, %v636_v51  ;;  %v743_v58 = vpop.f32.mrb[1].mxu1  ;;  %v814_v59 = vpop.f32.mrb[9].mxu0 }
 0x23a   : > { %v744_v60 = vadd.f32 %v743_v58, %v632_v52  ;;  %v815_v62 = vadd.f32 %v814_v59, %v640_v53 }
 0x23b   : > { %v1030_v63 = vmax.f32 %v742_v56, 0.0  ;;  %v1032_v0 = vmax.f32 %v813_v57, 0.0 }
 0x23c   : > { %v1031_v1 = vmax.f32 %v744_v60, 0.0  ;;  %v1033_v3 = vmax.f32 %v815_v62, 0.0 }
 0x23e   : > { %v1050_v4 = vcombine.low %v1030_v63, %v1031_v1  ;;  %v1051_v5 = vcombine.low %v1032_v0, %v1033_v3 }
 0x240   : > { %v1060_v6 = vrot.slane %v1050_v4, %v1059_v2  ;;  %v1067_v7 = vrot.slane %v1051_v5, %v1059_v2 }
 0x242   : > { %v1082_v8 = vcombine.low %v1060_v6, %v1067_v7 }
 0x244   : > { %v1090_v33 = vrot.slane %v1082_v8, %v1059_v2 }
 0x258   : > { %v883_v16 = vpop.f32.mrb[2].mxu1  ;;  %v954_v17 = vpop.f32.mrb[10].mxu0 }
 0x259   : > { %v884_v18 = vadd.f32 %v883_v16, %v644_v12  ;;  %v955_v19 = vadd.f32 %v954_v17, %v652_v13  ;;  %v885_v20 = vpop.f32.mrb[3].mxu1  ;;  %v956_v21 = vpop.f32.mrb[11].mxu0 }
 0x25a   : > { %v886_v22 = vadd.f32 %v885_v20, %v648_v14  ;;  %v957_v23 = vadd.f32 %v956_v21, %v656_v15 }
 0x25b   : > { %v1034_v24 = vmax.f32 %v884_v18, 0.0  ;;  %v1036_v25 = vmax.f32 %v955_v19, 0.0 }
 0x25c   : > { %v1035_v26 = vmax.f32 %v886_v22, 0.0  ;;  %v1037_v27 = vmax.f32 %v957_v23, 0.0 }
 0x25e   : > { %v1052_v28 = vcombine.low %v1034_v24, %v1035_v26  ;;  %v1053_v29 = vcombine.low %v1036_v25, %v1037_v27 }
 0x260   : > { %v1074_v30 = vrot.slane %v1052_v28, %v1059_v2  ;;  %v1081_v31 = vrot.slane %v1053_v29, %v1059_v2 }
 0x262   : > { %v1083_v32 = vcombine.low %v1074_v30, %v1081_v31 }
 0x264   : > { %v1097_v34 = vrot.slane %v1083_v32, %v1059_v2 }
 0x266   : > { %v1098_v35 = vcombine.low %v1090_v33, %v1097_v34 }
 0x268   : > { %1116 = vst [vmem:[%s290_s17] sm:$0xff] %v1098_v35 }
 0x278   : > { %v1025_v40 = vpop.f32.mrb[4].mxu1 }
 0x279   : > { %v1026_v42 = vadd.f32 %v1025_v40, %v660_v37  ;;  %v1027_v44 = vpop.f32.mrb[5].mxu1 }
 0x27a   : > { %v1028_v45 = vadd.f32 %v1027_v44, %v664_v38 }
 0x27b   : > { %v1038_v47 = vmax.f32 %v1026_v42, 0.0 }
 0x27c   : > { %v1039_v48 = vmax.f32 %v1028_v45, 0.0 }
 0x27e   : > { %v1099_v49 = vcombine.low %v1038_v47, %v1039_v48 }
 0x280   : > { %v1106_v50 = vrot.slane %v1099_v49, %v1059_v2 }
 0x282   : > { %v1113_v51 = vrot.slane %v1106_v50, %v1059_v2 }
 0x284   : > { %1121 = vst.msk [vmem:[%s290_s17 + $0x8] sm:$0x3] %vm1119_vm3, %v1113_v51 }
 0x285 PF: > { %s17_s20 = sadd.s32 1, %s1607_s20   ;;  %s2315_s18 = smov %s1603_s19 }
 0x286   : > { %p14_p5 = scmp.ge.s32.totalorder %s17_s20, 4   ;;  %s2316_s19 = smov %s2318_s26 }
 0x288   :  { %16 = sbr.rel (!%p14_p5) target bundleno = 3 (0x3), region = 91 }
 0x28f   :  { %1141 = vsyncpa [#allocation4], 1 }
 0x290   :  { %1143 = vsyncpa [#allocation4 + $0x1], 1 }
 0x291   :  { %1144 = vsyncpa [#allocation6], 1 }

// kernel: rgbdmh_forward.5
= control target key start
LH: loop header
LB: loop body
LE: loop exit
PB: predicated region body
PF: predicated region fallthrough
CT: control target
= control target key end

     0   :  { %v3660_v47 = vmov 1983009808   ;;  %v685_v49 = vlaneseq  ;;  %vm2297_vm0 = vcmask 58368   ;;  %s5755_s1 = inlined_call_operand.vmem [shape: f32[5120,8], index: 1, kind: input, shape index: {}]   ;;  %s5756_s0 = inlined_call_operand.vmem [shape: f32[2,5120], index: 0, kind: input, shape index: {}]   ;;  %s5757_s2 = inlined_call_operand.vmem [shape: f32[1,8], index: 2, kind: input, shape index: {}]   ;;  %s5758_s3 = inlined_call_operand.vmem [shape: f32[2,8], index: 3, kind: output, shape index: {}]  }
   0x1   :  { %v40_v0 = vld [vmem:[%s5755_s1 + $0x80] sm:$0xff]  ;;  %v41_v1 = vld [vmem:[%s5755_s1 + $0x88] sm:$0xff]  ;;  %v42_v11 = vld [vmem:[%s5755_s1 + $0x90] sm:$0xff]  ;;  %v683_v48 = vunpack.c.l.s4 %v3660_v47 }
   0x2   :  { %v24_v2 = vld [vmem:[%s5755_s1] sm:$0xff]  ;;  %v3005_v3 = vpack.c.bf16 %v41_v1, %v40_v0  ;;  %v25_v4 = vld [vmem:[%s5755_s1 + $0x8] sm:$0xff]  ;;  %v43_v13 = vld [vmem:[%s5755_s1 + $0x98] sm:$0xff]  ;;  %v686_v0 = vshrl.u32 %v685_v49, 7 }
   0x3   :  { %v72_v5 = vld [vmem:[%s5755_s1 + $0x180] sm:$0xff]  ;;  %v73_v6 = vld [vmem:[%s5755_s1 + $0x188] sm:$0xff]  ;;  %v3007_v7 = vpack.c.bf16 %v25_v4, %v24_v2  ;;  %v26_v14 = vld [vmem:[%s5755_s1 + $0x10] sm:$0xff]  ;;  %v3009_v16 = vpack.c.bf16 %v43_v13, %v42_v11  ;;  %v684_v63 = vunpack.c.0.s8 %v683_v48 }
   0x4   :  { %v3037_v8 = vpack.c.bf16 %v73_v6, %v72_v5  ;;  %v56_v9 = vld [vmem:[%s5755_s1 + $0x100] sm:$0xff]  ;;  %v57_v10 = vld [vmem:[%s5755_s1 + $0x108] sm:$0xff]  ;;  %3006 = vmatprep.subr.bf16.mxu0 %v3005_v3  ;;  %v27_v15 = vld [vmem:[%s5755_s1 + $0x18] sm:$0xff] }
   0x5   :  { %v3039_v12 = vpack.c.bf16 %v57_v10, %v56_v9  ;;  %3008 = vmatpush3.bf16.msra.mxu0 %v3007_v7  ;;  %v3011_v17 = vpack.c.bf16 %v27_v15, %v26_v14  ;;  %v74_v18 = vld [vmem:[%s5755_s1 + $0x190] sm:$0xff]  ;;  %v75_v19 = vld [vmem:[%s5755_s1 + $0x198] sm:$0xff]  ;;  %v44_v23 = vld [vmem:[%s5755_s1 + $0xa0] sm:$0xff]  ;;  %v3831_v13 = vsub.s32 %v684_v63, %v686_v0 }
   0x6   :  { %3038 = vmatprep.subr.bf16.mxu1 %v3037_v8  ;;  %v58_v20 = vld [vmem:[%s5755_s1 + $0x110] sm:$0xff]  ;;  %v3041_v21 = vpack.c.bf16 %v75_v19, %v74_v18  ;;  %v59_v22 = vld [vmem:[%s5755_s1 + $0x118] sm:$0xff]  ;;  %v45_v24 = vld [vmem:[%s5755_s1 + $0xa8] sm:$0xff]  ;;  %3010 = vmatprep.subr.bf16.mxu0 %v3009_v16 }
   0x7   :  { %3040 = vmatpush3.bf16.msra.mxu1 %v3039_v12  ;;  %v3043_v25 = vpack.c.bf16 %v59_v22, %v58_v20  ;;  %v3013_v26 = vpack.c.bf16 %v45_v24, %v44_v23  ;;  %v28_v27 = vld [vmem:[%s5755_s1 + $0x20] sm:$0xff]  ;;  %v29_v28 = vld [vmem:[%s5755_s1 + $0x28] sm:$0xff]  ;;  %v46_v35 = vld [vmem:[%s5755_s1 + $0xb0] sm:$0xff] }
   0x8   :  { %v76_v29 = vld [vmem:[%s5755_s1 + $0x1a0] sm:$0xff]  ;;  %3042 = vmatprep.subr.bf16.mxu1 %v3041_v21  ;;  %v77_v30 = vld [vmem:[%s5755_s1 + $0x1a8] sm:$0xff]  ;;  %v3015_v33 = vpack.c.bf16 %v29_v28, %v28_v27  ;;  %v47_v36 = vld [vmem:[%s5755_s1 + $0xb8] sm:$0xff] }
   0x9   :  { %v60_v31 = vld [vmem:[%s5755_s1 + $0x120] sm:$0xff]  ;;  %v61_v32 = vld [vmem:[%s5755_s1 + $0x128] sm:$0xff]  ;;  %3012 = vmatpush3.bf16.msra.mxu0 %v3011_v17  ;;  %v3045_v34 = vpack.c.bf16 %v77_v30, %v76_v29  ;;  %v30_v37 = vld [vmem:[%s5755_s1 + $0x30] sm:$0xff]  ;;  %v3017_v39 = vpack.c.bf16 %v47_v36, %v46_v35 }
   0xa   :  { %3014 = vmatprep.subr.bf16.mxu0 %v3013_v26  ;;  %v3047_v38 = vpack.c.bf16 %v61_v32, %v60_v31  ;;  %v31_v40 = vld [vmem:[%s5755_s1 + $0x38] sm:$0xff]  ;;  %v78_v41 = vld [vmem:[%s5755_s1 + $0x1b0] sm:$0xff]  ;;  %v48_v46 = vld [vmem:[%s5755_s1 + $0xc0] sm:$0xff] }
   0xb   :  { %3044 = vmatpush3.bf16.msra.mxu1 %v3043_v25  ;;  %v79_v42 = vld [vmem:[%s5755_s1 + $0x1b8] sm:$0xff]  ;;  %v62_v44 = vld [vmem:[%s5755_s1 + $0x130] sm:$0xff]  ;;  %v49_v50 = vld [vmem:[%s5755_s1 + $0xc8] sm:$0xff]  ;;  %v3019_v51 = vpack.c.bf16 %v31_v40, %v30_v37 }
   0xc   :  { %3046 = vmatprep.subr.bf16.mxu1 %v3045_v34  ;;  %v3049_v43 = vpack.c.bf16 %v79_v42, %v78_v41  ;;  %v63_v45 = vld [vmem:[%s5755_s1 + $0x138] sm:$0xff]  ;;  %v80_v52 = vld [vmem:[%s5755_s1 + $0x1c0] sm:$0xff]  ;;  %v81_v53 = vld [vmem:[%s5755_s1 + $0x1c8] sm:$0xff]  ;;  %v3021_v55 = vpack.c.bf16 %v49_v50, %v48_v46 }
   0xd   :  { %3016 = vmatpush3.bf16.msra.mxu0 %v3015_v33  ;;  %v3051_v54 = vpack.c.bf16 %v63_v45, %v62_v44  ;;  %v32_v56 = vld [vmem:[%s5755_s1 + $0x40] sm:$0xff]  ;;  %v33_v57 = vld [vmem:[%s5755_s1 + $0x48] sm:$0xff]  ;;  %v3053_v59 = vpack.c.bf16 %v81_v53, %v80_v52  ;;  %v50_v61 = vld [vmem:[%s5755_s1 + $0xd0] sm:$0xff] }
   0xe   :  { %3018 = vmatprep.subr.bf16.mxu0 %v3017_v39  ;;  %v64_v58 = vld [vmem:[%s5755_s1 + $0x140] sm:$0xff]  ;;  %v65_v60 = vld [vmem:[%s5755_s1 + $0x148] sm:$0xff]  ;;  %v51_v62 = vld [vmem:[%s5755_s1 + $0xd8] sm:$0xff]  ;;  %v3023_v3 = vpack.c.bf16 %v33_v57, %v32_v56 }
   0xf   :  { %3048 = vmatpush3.bf16.msra.mxu1 %v3047_v38  ;;  %v82_v1 = vld [vmem:[%s5755_s1 + $0x1d0] sm:$0xff]  ;;  %v83_v2 = vld [vmem:[%s5755_s1 + $0x1d8] sm:$0xff]  ;;  %v3055_v4 = vpack.c.bf16 %v65_v60, %v64_v58  ;;  %v3025_v5 = vpack.c.bf16 %v51_v62, %v50_v61  ;;  %v52_v11 = vld [vmem:[%s5755_s1 + $0xe0] sm:$0xff] }
  0x10   :  { %3050 = vmatprep.subr.bf16.mxu1 %v3049_v43  ;;  %v34_v6 = vld [vmem:[%s5755_s1 + $0x50] sm:$0xff]  ;;  %v35_v7 = vld [vmem:[%s5755_s1 + $0x58] sm:$0xff]  ;;  %v3057_v9 = vpack.c.bf16 %v83_v2, %v82_v1  ;;  %v53_v12 = vld [vmem:[%s5755_s1 + $0xe8] sm:$0xff] }
  0x11   :  { %3020 = vmatpush3.bf16.msra.mxu0 %v3019_v51  ;;  %v66_v8 = vld [vmem:[%s5755_s1 + $0x150] sm:$0xff]  ;;  %v67_v10 = vld [vmem:[%s5755_s1 + $0x158] sm:$0xff]  ;;  %v84_v14 = vld [vmem:[%s5755_s1 + $0x1e0] sm:$0xff]  ;;  %v3027_v16 = vpack.c.bf16 %v35_v7, %v34_v6  ;;  %v3029_v19 = vpack.c.bf16 %v53_v12, %v52_v11 }
  0x12   :  { %3022 = vmatprep.subr.bf16.mxu0 %v3021_v55  ;;  %v85_v15 = vld [vmem:[%s5755_s1 + $0x1e8] sm:$0xff]  ;;  %v36_v17 = vld [vmem:[%s5755_s1 + $0x60] sm:$0xff]  ;;  %v3059_v18 = vpack.c.bf16 %v67_v10, %v66_v8  ;;  %v54_v25 = vld [vmem:[%s5755_s1 + $0xf0] sm:$0xff] }
  0x13   :  { %3052 = vmatpush3.bf16.msra.mxu1 %v3051_v54  ;;  %v37_v20 = vld [vmem:[%s5755_s1 + $0x68] sm:$0xff]  ;;  %v68_v21 = vld [vmem:[%s5755_s1 + $0x160] sm:$0xff]  ;;  %v3061_v23 = vpack.c.bf16 %v85_v15, %v84_v14  ;;  %v55_v26 = vld [vmem:[%s5755_s1 + $0xf8] sm:$0xff] }
  0x14   :  { %3054 = vmatprep.subr.bf16.mxu1 %v3053_v59  ;;  %v14_v22 = vld [vmem:[%s5756_s0] sm:$0xff]  ;;  %v69_v24 = vld [vmem:[%s5755_s1 + $0x168] sm:$0xff]  ;;  %v86_v29 = vld [vmem:[%s5755_s1 + $0x1f0] sm:$0xff]  ;;  %v3031_v31 = vpack.c.bf16 %v37_v20, %v36_v17  ;;  %v3033_v35 = vpack.c.bf16 %v55_v26, %v54_v25 }
  0x15   :  { %3024 = vmatpush3.bf16.msra.mxu0 %v3023_v3  ;;  %v688_v27 = vrot.slane %v14_v22, %v3831_v13  ;;  %v681_v28 = vcombine.high %v14_v22, %v14_v22  ;;  %v87_v30 = vld [vmem:[%s5755_s1 + $0x1f8] sm:$0xff]  ;;  %v3063_v34 = vpack.c.bf16 %v69_v24, %v68_v21  ;;  %v38_v36 = vld [vmem:[%s5755_s1 + $0x70] sm:$0xff]  ;;  %v104_v41 = vld [vmem:[%s5755_s1 + $0x280] sm:$0xff] }
  0x16   :  { %3026 = vmatprep.subr.bf16.mxu0 %v3025_v5  ;;  %v39_v37 = vld [vmem:[%s5755_s1 + $0x78] sm:$0xff]  ;;  %v70_v38 = vld [vmem:[%s5755_s1 + $0x170] sm:$0xff]  ;;  %v3065_v39 = vpack.c.bf16 %v87_v30, %v86_v29  ;;  %v105_v42 = vld [vmem:[%s5755_s1 + $0x288] sm:$0xff] }
  0x17   :  { %3056 = vmatpush3.bf16.msra.mxu1 %v3055_v4  ;;  %v696_v32 = vcombine.high %v688_v27, %v688_v27  ;;  %v695_v33 = vrot.slane %v681_v28, %v3831_v13  ;;  %v71_v40 = vld [vmem:[%s5755_s1 + $0x178] sm:$0xff]  ;;  %v136_v44 = vld [vmem:[%s5755_s1 + $0x380] sm:$0xff]  ;;  %v137_v45 = vld [vmem:[%s5755_s1 + $0x388] sm:$0xff]  ;;  %v3035_v46 = vpack.c.bf16 %v39_v37, %v38_v36  ;;  %v3069_v48 = vpack.c.bf16 %v105_v42, %v104_v41 }
  0x18   :  { %3058 = vmatprep.subr.bf16.mxu1 %v3057_v9  ;;  %v3067_v47 = vpack.c.bf16 %v71_v40, %v70_v38  ;;  %v88_v49 = vld [vmem:[%s5755_s1 + $0x200] sm:$0xff]  ;;  %v89_v50 = vld [vmem:[%s5755_s1 + $0x208] sm:$0xff]  ;;  %v3101_v52 = vpack.c.bf16 %v137_v45, %v136_v44  ;;  %v106_v54 = vld [vmem:[%s5755_s1 + $0x290] sm:$0xff] }
  0x19   :  { %3028 = vmatpush3.bf16.msra.mxu0 %v3027_v16  ;;  %955 = vmatprep.mubr.f32.mxu0 %v696_v32  ;;  %v697_v43 = vcombine.high %v695_v33, %v695_v33  ;;  %v120_v51 = vld [vmem:[%s5755_s1 + $0x300] sm:$0xff]  ;;  %v121_v53 = vld [vmem:[%s5755_s1 + $0x308] sm:$0xff]  ;;  %v107_v55 = vld [vmem:[%s5755_s1 + $0x298] sm:$0xff]  ;;  %v3071_v58 = vpack.c.bf16 %v89_v50, %v88_v49 }
  0x1a   :  { %3030 = vmatprep.subr.bf16.mxu0 %v3029_v19  ;;  %v138_v56 = vld [vmem:[%s5755_s1 + $0x390] sm:$0xff]  ;;  %v139_v57 = vld [vmem:[%s5755_s1 + $0x398] sm:$0xff]  ;;  %v3103_v59 = vpack.c.bf16 %v121_v53, %v120_v51  ;;  %v3073_v60 = vpack.c.bf16 %v107_v55, %v106_v54  ;;  %v108_v2 = vld [vmem:[%s5755_s1 + $0x2a0] sm:$0xff] }
  0x1b   :  { %3060 = vmatpush3.bf16.msra.mxu1 %v3059_v18  ;;  %1025 = vmatprep.mubr.f32.mxu1 %v697_v43  ;;  %v90_v61 = vld [vmem:[%s5755_s1 + $0x210] sm:$0xff]  ;;  %v91_v62 = vld [vmem:[%s5755_s1 + $0x218] sm:$0xff]  ;;  %v3105_v0 = vpack.c.bf16 %v139_v57, %v138_v56  ;;  %v109_v3 = vld [vmem:[%s5755_s1 + $0x2a8] sm:$0xff] }
  0x1c   :  { %3062 = vmatprep.subr.bf16.mxu1 %v3061_v23  ;;  %v122_v63 = vld [vmem:[%s5755_s1 + $0x310] sm:$0xff]  ;;  %v123_v1 = vld [vmem:[%s5755_s1 + $0x318] sm:$0xff]  ;;  %v140_v4 = vld [vmem:[%s5755_s1 + $0x3a0] sm:$0xff]  ;;  %v3075_v6 = vpack.c.bf16 %v91_v62, %v90_v61  ;;  %v3077_v8 = vpack.c.bf16 %v109_v3, %v108_v2 }
  0x1d   :  { %3032 = vmatpush3.bf16.msra.mxu0 %v3031_v31  ;;  %v141_v5 = vld [vmem:[%s5755_s1 + $0x3a8] sm:$0xff]  ;;  %v3107_v7 = vpack.c.bf16 %v123_v1, %v122_v63  ;;  %v92_v9 = vld [vmem:[%s5755_s1 + $0x220] sm:$0xff]  ;;  %v110_v15 = vld [vmem:[%s5755_s1 + $0x2b0] sm:$0xff] }
  0x1e   :  { %3034 = vmatprep.subr.bf16.mxu0 %v3033_v35  ;;  %v93_v10 = vld [vmem:[%s5755_s1 + $0x228] sm:$0xff]  ;;  %v124_v11 = vld [vmem:[%s5755_s1 + $0x320] sm:$0xff]  ;;  %v3109_v12 = vpack.c.bf16 %v141_v5, %v140_v4  ;;  %v111_v16 = vld [vmem:[%s5755_s1 + $0x2b8] sm:$0xff] }
  0x1f   :  { %3064 = vmatpush3.bf16.msra.mxu1 %v3063_v34  ;;  %v125_v14 = vld [vmem:[%s5755_s1 + $0x328] sm:$0xff]  ;;  %v142_v17 = vld [vmem:[%s5755_s1 + $0x3b0] sm:$0xff]  ;;  %v143_v18 = vld [vmem:[%s5755_s1 + $0x3b8] sm:$0xff]  ;;  %v3079_v19 = vpack.c.bf16 %v93_v10, %v92_v9  ;;  %v3081_v21 = vpack.c.bf16 %v111_v16, %v110_v15 }
  0x20   :  { %3066 = vmatprep.subr.bf16.mxu1 %v3065_v39  ;;  %v3111_v20 = vpack.c.bf16 %v125_v14, %v124_v11  ;;  %v94_v22 = vld [vmem:[%s5755_s1 + $0x230] sm:$0xff]  ;;  %v95_v23 = vld [vmem:[%s5755_s1 + $0x238] sm:$0xff]  ;;  %v3113_v25 = vpack.c.bf16 %v143_v18, %v142_v17  ;;  %v113_v28 = vld [vmem:[%s5755_s1 + $0x2c8] sm:$0xff] }
  0x21   :  { %3036 = vmatpush3.bf16.msra.mxu0 %v3035_v46  ;;  %v126_v24 = vld [vmem:[%s5755_s1 + $0x330] sm:$0xff]  ;;  %v127_v26 = vld [vmem:[%s5755_s1 + $0x338] sm:$0xff]  ;;  %v144_v29 = vld [vmem:[%s5755_s1 + $0x3c0] sm:$0xff]  ;;  %v3083_v32 = vpack.c.bf16 %v95_v23, %v94_v22 }
  0x22   :  { %3070 = vmatprep.subr.bf16.mxu0 %v3069_v48  ;;  %v145_v30 = vld [vmem:[%s5755_s1 + $0x3c8] sm:$0xff]  ;;  %v3115_v35 = vpack.c.bf16 %v127_v26, %v126_v24  ;;  %v96_v37 = vld [vmem:[%s5755_s1 + $0x240] sm:$0xff]  ;;  %v114_v42 = vld [vmem:[%s5755_s1 + $0x2d0] sm:$0xff] }
  0x23   :  { %3068 = vmatpush3.bf16.msra.mxu1 %v3067_v47  ;;  %v15_v31 = vld [vmem:[%s5756_s0 + $0x8] sm:$0xff]  ;;  %v128_v39 = vld [vmem:[%s5755_s1 + $0x340] sm:$0xff]  ;;  %v3117_v40 = vpack.c.bf16 %v145_v30, %v144_v29  ;;  %v115_v43 = vld [vmem:[%s5755_s1 + $0x2d8] sm:$0xff] }
  0x24   :  { %3102 = vmatprep.subr.bf16.mxu1 %v3101_v52  ;;  %956 = vmatmul.mubr.f32.vlgmr.msra.gmra.mrb[0].mxu0 %v688_v27  ;;  %v112_v27 = vld [vmem:[%s5755_s1 + $0x2c0] sm:$0xff]  ;;  %v698_v34 = vcombine.high %v15_v31, %v15_v31  ;;  %v97_v38 = vld [vmem:[%s5755_s1 + $0x248] sm:$0xff]  ;;  %v146_v46 = vld [vmem:[%s5755_s1 + $0x3d0] sm:$0xff]  ;;  %v3089_v51 = vpack.c.bf16 %v115_v43, %v114_v42 }
  0x25   :  { %3072 = vmatpush3.bf16.msra.mxu0 %v3071_v58  ;;  %v3085_v36 = vpack.c.bf16 %v113_v28, %v112_v27  ;;  %v129_v41 = vld [vmem:[%s5755_s1 + $0x348] sm:$0xff]  ;;  %v147_v47 = vld [vmem:[%s5755_s1 + $0x3d8] sm:$0xff]  ;;  %v3087_v48 = vpack.c.bf16 %v97_v38, %v96_v37  ;;  %v98_v52 = vld [vmem:[%s5755_s1 + $0x250] sm:$0xff] }
  0x26   :  { %1026 = vmatmul.mubr.f32.vlgmr.msra.gmra.mrb[0].mxu1 %v695_v33  ;;  %3074 = vmatprep.subr.bf16.mxu0 %v3073_v60  ;;  %v3992_v33 = vrot.slane %v15_v31, %v3831_v13  ;;  %v4015_v45 = vrot.slane %v698_v34, %v3831_v13  ;;  %v3119_v50 = vpack.c.bf16 %v129_v41, %v128_v39  ;;  %v99_v53 = vld [vmem:[%s5755_s1 + $0x258] sm:$0xff]  ;;  %v130_v54 = vld [vmem:[%s5755_s1 + $0x350] sm:$0xff]  ;;  %v116_v57 = vld [vmem:[%s5755_s1 + $0x2e0] sm:$0xff] }
  0x27   :  { %3104 = vmatpush3.bf16.msra.mxu1 %v3103_v59  ;;  %v3121_v55 = vpack.c.bf16 %v147_v47, %v146_v46  ;;  %v131_v56 = vld [vmem:[%s5755_s1 + $0x358] sm:$0xff]  ;;  %v117_v58 = vld [vmem:[%s5755_s1 + $0x2e8] sm:$0xff]  ;;  %v148_v59 = vld [vmem:[%s5755_s1 + $0x3e0] sm:$0xff]  ;;  %v3091_v61 = vpack.c.bf16 %v99_v53, %v98_v52 }
  0x28   :  { %3106 = vmatprep.subr.bf16.mxu1 %v3105_v0  ;;  %v713_v44 = vcombine.high %v3992_v33, %v3992_v33  ;;  %v714_v49 = vcombine.high %v4015_v45, %v4015_v45  ;;  %v149_v60 = vld [vmem:[%s5755_s1 + $0x3e8] sm:$0xff]  ;;  %v3123_v62 = vpack.c.bf16 %v131_v56, %v130_v54  ;;  %v3093_v63 = vpack.c.bf16 %v117_v58, %v116_v57  ;;  %v100_v0 = vld [vmem:[%s5755_s1 + $0x260] sm:$0xff]  ;;  %v118_v5 = vld [vmem:[%s5755_s1 + $0x2f0] sm:$0xff] }
  0x29   :  { %3076 = vmatpush3.bf16.msra.mxu0 %v3075_v6  ;;  %v101_v1 = vld [vmem:[%s5755_s1 + $0x268] sm:$0xff]  ;;  %v132_v2 = vld [vmem:[%s5755_s1 + $0x360] sm:$0xff]  ;;  %v3125_v3 = vpack.c.bf16 %v149_v60, %v148_v59  ;;  %v119_v6 = vld [vmem:[%s5755_s1 + $0x2f8] sm:$0xff] }
  0x2a   :  { %3078 = vmatprep.subr.bf16.mxu0 %v3077_v8  ;;  %1095 = vmatprep.mubr.f32.mxu0 %v713_v44  ;;  %v133_v4 = vld [vmem:[%s5755_s1 + $0x368] sm:$0xff]  ;;  %v151_v8 = vld [vmem:[%s5755_s1 + $0x3f8] sm:$0xff]  ;;  %v3095_v9 = vpack.c.bf16 %v101_v1, %v100_v0  ;;  %v3097_v11 = vpack.c.bf16 %v119_v6, %v118_v5  ;;  %v134_v15 = vld [vmem:[%s5755_s1 + $0x370] sm:$0xff] }
  0x2b   :  { %3108 = vmatpush3.bf16.msra.mxu1 %v3107_v7  ;;  %1165 = vmatprep.mubr.f32.mxu1 %v714_v49  ;;  %v150_v7 = vld [vmem:[%s5755_s1 + $0x3f0] sm:$0xff]  ;;  %v3127_v10 = vpack.c.bf16 %v133_v4, %v132_v2  ;;  %v103_v14 = vld [vmem:[%s5755_s1 + $0x278] sm:$0xff]  ;;  %v168_v18 = vld [vmem:[%s5755_s1 + $0x480] sm:$0xff] }
  0x2c   :  { %3110 = vmatprep.subr.bf16.mxu1 %v3109_v12  ;;  %v102_v12 = vld [vmem:[%s5755_s1 + $0x270] sm:$0xff]  ;;  %v3129_v16 = vpack.c.bf16 %v151_v8, %v150_v7  ;;  %v135_v17 = vld [vmem:[%s5755_s1 + $0x378] sm:$0xff]  ;;  %v152_v23 = vld [vmem:[%s5755_s1 + $0x400] sm:$0xff] }
  0x2d   :  { %3080 = vmatpush3.bf16.msra.mxu0 %v3079_v19  ;;  %v169_v19 = vld [vmem:[%s5755_s1 + $0x488] sm:$0xff]  ;;  %v3099_v22 = vpack.c.bf16 %v103_v14, %v102_v12  ;;  %v3131_v24 = vpack.c.bf16 %v135_v17, %v134_v15  ;;  %v184_v27 = vld [vmem:[%s5755_s1 + $0x500] sm:$0xff]  ;;  %v170_v30 = vld [vmem:[%s5755_s1 + $0x490] sm:$0xff] }
  0x2e   :  { %3082 = vmatprep.subr.bf16.mxu0 %v3081_v21  ;;  %v201_v21 = vld [vmem:[%s5755_s1 + $0x588] sm:$0xff]  ;;  %v171_v31 = vld [vmem:[%s5755_s1 + $0x498] sm:$0xff]  ;;  %v16_v37 = vld [vmem:[%s5756_s0 + $0x10] sm:$0xff] }
  0x2f   :  { %3112 = vmatpush3.bf16.msra.mxu1 %v3111_v20  ;;  %v200_v20 = vld [vmem:[%s5755_s1 + $0x580] sm:$0xff]  ;;  %v153_v26 = vld [vmem:[%s5755_s1 + $0x408] sm:$0xff]  ;;  %v203_v34 = vld [vmem:[%s5755_s1 + $0x598] sm:$0xff]  ;;  %v3137_v38 = vpack.c.bf16 %v171_v31, %v170_v30  ;;  %v4134_v42 = vrot.slane %v16_v37, %v3831_v13  ;;  %v715_v43 = vcombine.high %v16_v37, %v16_v37 }
  0x30   :  { %3114 = vmatprep.subr.bf16.mxu1 %v3113_v25  ;;  %v3133_v25 = vpack.c.bf16 %v169_v19, %v168_v18  ;;  %v185_v28 = vld [vmem:[%s5755_s1 + $0x508] sm:$0xff]  ;;  %v3165_v29 = vpack.c.bf16 %v201_v21, %v200_v20  ;;  %v154_v39 = vld [vmem:[%s5755_s1 + $0x410] sm:$0xff]  ;;  %v187_v46 = vld [vmem:[%s5755_s1 + $0x518] sm:$0xff] }
  0x31   :  { %3084 = vmatpush3.bf16.msra.mxu0 %v3083_v32  ;;  %v202_v32 = vld [vmem:[%s5755_s1 + $0x590] sm:$0xff]  ;;  %v172_v47 = vld [vmem:[%s5755_s1 + $0x4a0] sm:$0xff]  ;;  %v4155_v52 = vrot.slane %v715_v43, %v3831_v13  ;;  %v157_v56 = vld [vmem:[%s5755_s1 + $0x428] sm:$0xff] }
  0x32   :  { %3086 = vmatprep.subr.bf16.mxu0 %v3085_v36  ;;  %v3167_v36 = vpack.c.bf16 %v185_v28, %v184_v27  ;;  %v186_v41 = vld [vmem:[%s5755_s1 + $0x510] sm:$0xff]  ;;  %v3169_v44 = vpack.c.bf16 %v203_v34, %v202_v32  ;;  %v204_v49 = vld [vmem:[%s5755_s1 + $0x5a0] sm:$0xff]  ;;  %v189_v59 = vld [vmem:[%s5755_s1 + $0x528] sm:$0xff] }
  0x33   :  { %3116 = vmatpush3.bf16.msra.mxu1 %v3115_v35  ;;  %v3135_v35 = vpack.c.bf16 %v153_v26, %v152_v23  ;;  %v188_v57 = vld [vmem:[%s5755_s1 + $0x520] sm:$0xff]  ;;  %v174_v60 = vld [vmem:[%s5755_s1 + $0x4b0] sm:$0xff]  ;;  %v159_v4 = vld [vmem:[%s5755_s1 + $0x438] sm:$0xff] }
  0x34   :  { %3118 = vmatprep.subr.bf16.mxu1 %v3117_v40  ;;  %v155_v40 = vld [vmem:[%s5755_s1 + $0x418] sm:$0xff]  ;;  %v3175_v1 = vpack.c.bf16 %v189_v59, %v188_v57  ;;  %v190_v5 = vld [vmem:[%s5755_s1 + $0x530] sm:$0xff]  ;;  %v176_v8 = vld [vmem:[%s5755_s1 + $0x4c0] sm:$0xff] }
  0x35   :  { %3088 = vmatpush3.bf16.msra.mxu0 %v3087_v48  ;;  %v173_v48 = vld [vmem:[%s5755_s1 + $0x4a8] sm:$0xff]  ;;  %v3139_v53 = vpack.c.bf16 %v155_v40, %v154_v39  ;;  %v191_v7 = vld [vmem:[%s5755_s1 + $0x538] sm:$0xff]  ;;  %v192_v18 = vld [vmem:[%s5755_s1 + $0x540] sm:$0xff] }
  0x36   :  { %3090 = vmatprep.subr.bf16.mxu0 %v3089_v51  ;;  %v730_v51 = vcombine.high %v4134_v42, %v4134_v42  ;;  %v3141_v54 = vpack.c.bf16 %v173_v48, %v172_v47  ;;  %v3179_v14 = vpack.c.bf16 %v191_v7, %v190_v5  ;;  %v161_v17 = vld [vmem:[%s5755_s1 + $0x448] sm:$0xff]  ;;  %v178_v21 = vld [vmem:[%s5755_s1 + $0x4d0] sm:$0xff]  ;;  %v195_v32 = vld [vmem:[%s5755_s1 + $0x558] sm:$0xff] }
  0x37   :  { %3120 = vmatpush3.bf16.msra.mxu1 %v3119_v50  ;;  %v205_v50 = vld [vmem:[%s5755_s1 + $0x5a8] sm:$0xff]  ;;  %v210_v23 = vld [vmem:[%s5755_s1 + $0x5d0] sm:$0xff]  ;;  %v180_v34 = vld [vmem:[%s5755_s1 + $0x4e0] sm:$0xff] }
  0x38   :  { %3122 = vmatprep.subr.bf16.mxu1 %v3121_v55  ;;  %v156_v55 = vld [vmem:[%s5755_s1 + $0x420] sm:$0xff]  ;;  %v3173_v58 = vpack.c.bf16 %v205_v50, %v204_v49  ;;  %v193_v20 = vld [vmem:[%s5755_s1 + $0x548] sm:$0xff]  ;;  %v162_v28 = vld [vmem:[%s5755_s1 + $0x450] sm:$0xff] }
  0x39   :  { %3092 = vmatpush3.bf16.msra.mxu0 %v3091_v61  ;;  %v175_v61 = vld [vmem:[%s5755_s1 + $0x4b8] sm:$0xff]  ;;  %v3143_v0 = vpack.c.bf16 %v157_v56, %v156_v55  ;;  %v3183_v26 = vpack.c.bf16 %v193_v20, %v192_v18  ;;  %v194_v30 = vld [vmem:[%s5755_s1 + $0x550] sm:$0xff]  ;;  %v213_v37 = vld [vmem:[%s5755_s1 + $0x5e8] sm:$0xff] }
  0x3a   :  { %3094 = vmatprep.subr.bf16.mxu0 %v3093_v63  ;;  %v207_v63 = vld [vmem:[%s5755_s1 + $0x5b8] sm:$0xff]  ;;  %v3145_v2 = vpack.c.bf16 %v175_v61, %v174_v60  ;;  %v3187_v39 = vpack.c.bf16 %v195_v32, %v194_v30  ;;  %v165_v43 = vld [vmem:[%s5755_s1 + $0x468] sm:$0xff]  ;;  %v182_v48 = vld [vmem:[%s5755_s1 + $0x4f0] sm:$0xff] }
  0x3b   :  { %3124 = vmatpush3.bf16.msra.mxu1 %v3123_v62  ;;  %v206_v62 = vld [vmem:[%s5755_s1 + $0x5b0] sm:$0xff]  ;;  %v197_v47 = vld [vmem:[%s5755_s1 + $0x568] sm:$0xff]  ;;  %v183_v49 = vld [vmem:[%s5755_s1 + $0x4f8] sm:$0xff] }
  0x3c   :  { %3126 = vmatprep.subr.bf16.mxu1 %v3125_v3  ;;  %v158_v3 = vld [vmem:[%s5755_s1 + $0x430] sm:$0xff]  ;;  %v3177_v6 = vpack.c.bf16 %v207_v63, %v206_v62  ;;  %v3161_v55 = vpack.c.bf16 %v183_v49, %v182_v48  ;;  %v167_v57 = vld [vmem:[%s5755_s1 + $0x478] sm:$0xff]  ;;  %v232_v60 = vld [vmem:[%s5755_s1 + $0x680] sm:$0xff] }
  0x3d   :  { %3096 = vmatpush3.bf16.msra.mxu0 %v3095_v9  ;;  %v177_v9 = vld [vmem:[%s5755_s1 + $0x4c8] sm:$0xff]  ;;  %v3147_v12 = vpack.c.bf16 %v159_v4, %v158_v3  ;;  %v214_v50 = vld [vmem:[%s5755_s1 + $0x5f0] sm:$0xff]  ;;  %v199_v59 = vld [vmem:[%s5755_s1 + $0x578] sm:$0xff] }
  0x3e   :  { %3098 = vmatprep.subr.bf16.mxu0 %v3097_v11  ;;  %v209_v11 = vld [vmem:[%s5755_s1 + $0x5c8] sm:$0xff]  ;;  %v3149_v15 = vpack.c.bf16 %v177_v9, %v176_v8  ;;  %v166_v56 = vld [vmem:[%s5755_s1 + $0x470] sm:$0xff]  ;;  %v264_v62 = vld [vmem:[%s5755_s1 + $0x780] sm:$0xff] }
  0x3f   :  { %3128 = vmatpush3.bf16.msra.mxu1 %v3127_v10  ;;  %v208_v10 = vld [vmem:[%s5755_s1 + $0x5c0] sm:$0xff]  ;;  %v233_v61 = vld [vmem:[%s5755_s1 + $0x688] sm:$0xff]  ;;  %v234_v9 = vld [vmem:[%s5755_s1 + $0x690] sm:$0xff] }
  0x40   :  { %3130 = vmatprep.subr.bf16.mxu1 %v3129_v16  ;;  %v160_v16 = vld [vmem:[%s5755_s1 + $0x440] sm:$0xff]  ;;  %v3181_v19 = vpack.c.bf16 %v209_v11, %v208_v10  ;;  %v265_v63 = vld [vmem:[%s5755_s1 + $0x788] sm:$0xff]  ;;  %v3197_v3 = vpack.c.bf16 %v233_v61, %v232_v60  ;;  %v235_v10 = vld [vmem:[%s5755_s1 + $0x698] sm:$0xff] }
  0x41   :  { %3100 = vmatpush3.bf16.msra.mxu0 %v3099_v22  ;;  %v179_v22 = vld [vmem:[%s5755_s1 + $0x4d8] sm:$0xff]  ;;  %v216_v4 = vld [vmem:[%s5755_s1 + $0x600] sm:$0xff]  ;;  %v217_v5 = vld [vmem:[%s5755_s1 + $0x608] sm:$0xff]  ;;  %v3229_v7 = vpack.c.bf16 %v265_v63, %v264_v62  ;;  %v3201_v18 = vpack.c.bf16 %v235_v10, %v234_v9 }
  0x42   :  { %3134 = vmatprep.subr.bf16.mxu0 %v3133_v25  ;;  %v3151_v25 = vpack.c.bf16 %v161_v17, %v160_v16  ;;  %v3153_v27 = vpack.c.bf16 %v179_v22, %v178_v21  ;;  %v249_v8 = vld [vmem:[%s5755_s1 + $0x708] sm:$0xff]  ;;  %v3199_v16 = vpack.c.bf16 %v217_v5, %v216_v4  ;;  %v219_v20 = vld [vmem:[%s5755_s1 + $0x618] sm:$0xff]  ;;  %v250_v21 = vld [vmem:[%s5755_s1 + $0x710] sm:$0xff] }
  0x43   :  { %3132 = vmatpush3.bf16.msra.mxu1 %v3131_v24  ;;  %v211_v24 = vld [vmem:[%s5755_s1 + $0x5d8] sm:$0xff]  ;;  %v254_v48 = vld [vmem:[%s5755_s1 + $0x730] sm:$0xff]  ;;  %v257_v61 = vld [vmem:[%s5755_s1 + $0x748] sm:$0xff] }
  0x44   :  { %3166 = vmatprep.subr.bf16.mxu1 %v3165_v29  ;;  %1096 = vmatmul.mubr.f32.vlgmr.msra.gmra.mrb[2].mxu0 %v3992_v33  ;;  %v3171_v33 = vpack.c.bf16 %v187_v46, %v186_v41  ;;  %v163_v29 = vld [vmem:[%s5755_s1 + $0x458] sm:$0xff]  ;;  %v3185_v31 = vpack.c.bf16 %v211_v24, %v210_v23  ;;  %v164_v41 = vld [vmem:[%s5755_s1 + $0x460] sm:$0xff]  ;;  %v242_v62 = vld [vmem:[%s5755_s1 + $0x6d0] sm:$0xff] }
  0x45   :  { %3136 = vmatpush3.bf16.msra.mxu0 %v3135_v35  ;;  %1235 = vmatprep.mubr.f32.mxu0 %v730_v51  ;;  %v181_v35 = vld [vmem:[%s5755_s1 + $0x4e8] sm:$0xff]  ;;  %v215_v51 = vld [vmem:[%s5755_s1 + $0x5f8] sm:$0xff]  ;;  %v236_v24 = vld [vmem:[%s5755_s1 + $0x6a0] sm:$0xff] }
  0x46   :  { %1166 = vmatmul.mubr.f32.vlgmr.msra.gmra.mrb[2].mxu1 %v4015_v45  ;;  %3138 = vmatprep.subr.bf16.mxu0 %v3137_v38  ;;  %v731_v45 = vcombine.high %v4155_v52, %v4155_v52  ;;  %v3155_v38 = vpack.c.bf16 %v163_v29, %v162_v28  ;;  %v3157_v40 = vpack.c.bf16 %v181_v35, %v180_v34  ;;  %v251_v23 = vld [vmem:[%s5755_s1 + $0x718] sm:$0xff]  ;;  %v269_v28 = vld [vmem:[%s5755_s1 + $0x7a8] sm:$0xff]  ;;  %v252_v35 = vld [vmem:[%s5755_s1 + $0x720] sm:$0xff] }
  0x47   :  { %3168 = vmatpush3.bf16.msra.mxu1 %v3167_v36  ;;  %v212_v36 = vld [vmem:[%s5755_s1 + $0x5e0] sm:$0xff]  ;;  %v221_v34 = vld [vmem:[%s5755_s1 + $0x628] sm:$0xff]  ;;  %v243_v63 = vld [vmem:[%s5755_s1 + $0x6d8] sm:$0xff] }
  0x48   :  { %3170 = vmatprep.subr.bf16.mxu1 %v3169_v44  ;;  %1305 = vmatprep.mubr.f32.mxu1 %v731_v45  ;;  %v196_v44 = vld [vmem:[%s5755_s1 + $0x560] sm:$0xff]  ;;  %v3189_v46 = vpack.c.bf16 %v213_v37, %v212_v36  ;;  %v198_v45 = vld [vmem:[%s5755_s1 + $0x570] sm:$0xff]  ;;  %v3217_v4 = vpack.c.bf16 %v243_v63, %v242_v62  ;;  %v259_v9 = vld [vmem:[%s5755_s1 + $0x758] sm:$0xff] }
  0x49   :  { %3140 = vmatpush3.bf16.msra.mxu0 %v3139_v53  ;;  %v3159_v53 = vpack.c.bf16 %v165_v43, %v164_v41  ;;  %v238_v37 = vld [vmem:[%s5755_s1 + $0x6b0] sm:$0xff]  ;;  %v244_v10 = vld [vmem:[%s5755_s1 + $0x6e0] sm:$0xff] }
  0x4a   :  { %3142 = vmatprep.subr.bf16.mxu0 %v3141_v54  ;;  %v3191_v54 = vpack.c.bf16 %v197_v47, %v196_v44  ;;  %v223_v47 = vld [vmem:[%s5755_s1 + $0x638] sm:$0xff]  ;;  %v226_v5 = vld [vmem:[%s5755_s1 + $0x650] sm:$0xff] }
  0x4b   :  { %3172 = vmatpush3.bf16.msra.mxu1 %v3171_v33  ;;  %v17_v33 = vld [vmem:[%s5756_s0 + $0x18] sm:$0xff]  ;;  %v314_v62 = vld [vmem:[%s5755_s1 + $0x910] sm:$0xff] }
  0x4c   :  { %3174 = vmatprep.subr.bf16.mxu1 %v3173_v58  ;;  %v3193_v58 = vpack.c.bf16 %v215_v51, %v214_v50  ;;  %v4326_v11 = vrot.slane %v17_v33, %v3831_v13  ;;  %v255_v50 = vld [vmem:[%s5755_s1 + $0x738] sm:$0xff]  ;;  %v240_v51 = vld [vmem:[%s5755_s1 + $0x6c0] sm:$0xff] }
  0x4d   :  { %3144 = vmatpush3.bf16.msra.mxu0 %v3143_v0  ;;  %v732_v0 = vcombine.high %v17_v33, %v17_v33  ;;  %v272_v33 = vld [vmem:[%s5755_s1 + $0x7c0] sm:$0xff] }
  0x4e   :  { %3146 = vmatprep.subr.bf16.mxu0 %v3145_v2  ;;  %v3195_v2 = vpack.c.bf16 %v199_v59, %v198_v45  ;;  %v224_v45 = vld [vmem:[%s5755_s1 + $0x640] sm:$0xff] }
  0x4f   :  { %3176 = vmatpush3.bf16.msra.mxu1 %v3175_v1  ;;  %v3163_v1 = vpack.c.bf16 %v167_v57, %v166_v56  ;;  %v3243_v56 = vpack.c.bf16 %v255_v50, %v254_v48  ;;  %v256_v59 = vld [vmem:[%s5755_s1 + $0x740] sm:$0xff]  ;;  %v281_v48 = vld [vmem:[%s5755_s1 + $0x808] sm:$0xff] }
  0x50   :  { %3178 = vmatprep.subr.bf16.mxu1 %v3177_v6  ;;  %v248_v6 = vld [vmem:[%s5755_s1 + $0x700] sm:$0xff] }
  0x51   :  { %3148 = vmatpush3.bf16.msra.mxu0 %v3147_v12  ;;  %v266_v12 = vld [vmem:[%s5755_s1 + $0x790] sm:$0xff]  ;;  %v3231_v17 = vpack.c.bf16 %v249_v8, %v248_v6  ;;  %v227_v6 = vld [vmem:[%s5755_s1 + $0x658] sm:$0xff] }
  0x52   :  { %3150 = vmatprep.subr.bf16.mxu0 %v3149_v15  ;;  %v4335_v15 = vrot.slane %v732_v0, %v3831_v13  ;;  %v274_v0 = vld [vmem:[%s5755_s1 + $0x7d0] sm:$0xff] }
  0x53   :  { %3180 = vmatpush3.bf16.msra.mxu1 %v3179_v14  ;;  %v267_v14 = vld [vmem:[%s5755_s1 + $0x798] sm:$0xff] }
  0x54   :  { %3182 = vmatprep.subr.bf16.mxu1 %v3181_v19  ;;  %v218_v19 = vld [vmem:[%s5755_s1 + $0x610] sm:$0xff]  ;;  %v3233_v22 = vpack.c.bf16 %v267_v14, %v266_v12  ;;  %v748_v29 = vcombine.high %v4335_v15, %v4335_v15  ;;  %v245_v12 = vld [vmem:[%s5755_s1 + $0x6e8] sm:$0xff]  ;;  %v276_v14 = vld [vmem:[%s5755_s1 + $0x7e0] sm:$0xff] }
  0x55   :  { %3152 = vmatpush3.bf16.msra.mxu0 %v3151_v25  ;;  %v237_v25 = vld [vmem:[%s5755_s1 + $0x6a8] sm:$0xff]  ;;  %v3203_v30 = vpack.c.bf16 %v219_v20, %v218_v19  ;;  %v3221_v19 = vpack.c.bf16 %v245_v12, %v244_v10  ;;  %v228_v20 = vld [vmem:[%s5755_s1 + $0x660] sm:$0xff] }
  0x56   :  { %3154 = vmatprep.subr.bf16.mxu0 %v3153_v27  ;;  %v268_v27 = vld [vmem:[%s5755_s1 + $0x7a0] sm:$0xff]  ;;  %v3205_v32 = vpack.c.bf16 %v237_v25, %v236_v24  ;;  %v261_v24 = vld [vmem:[%s5755_s1 + $0x768] sm:$0xff]  ;;  %v246_v25 = vld [vmem:[%s5755_s1 + $0x6f0] sm:$0xff] }
  0x57   :  { %3184 = vmatpush3.bf16.msra.mxu1 %v3183_v26  ;;  %v747_v26 = vcombine.high %v4326_v11, %v4326_v11  ;;  %v3237_v36 = vpack.c.bf16 %v269_v28, %v268_v27  ;;  %v278_v27 = vld [vmem:[%s5755_s1 + $0x7f0] sm:$0xff]  ;;  %v279_v28 = vld [vmem:[%s5755_s1 + $0x7f8] sm:$0xff]  ;;  %v285_v10 = vld [vmem:[%s5755_s1 + $0x828] sm:$0xff] }
  0x58   :  { %3186 = vmatprep.subr.bf16.mxu1 %v3185_v31  ;;  %v3235_v31 = vpack.c.bf16 %v251_v23, %v250_v21  ;;  %v229_v21 = vld [vmem:[%s5755_s1 + $0x668] sm:$0xff]  ;;  %v316_v12 = vld [vmem:[%s5755_s1 + $0x920] sm:$0xff] }
  0x59   :  { %3156 = vmatpush3.bf16.msra.mxu0 %v3155_v38  ;;  %v239_v38 = vld [vmem:[%s5755_s1 + $0x6b8] sm:$0xff] }
  0x5a   :  { %3158 = vmatprep.subr.bf16.mxu0 %v3157_v40  ;;  %v271_v40 = vld [vmem:[%s5755_s1 + $0x7b8] sm:$0xff]  ;;  %v3209_v44 = vpack.c.bf16 %v239_v38, %v238_v37  ;;  %v296_v37 = vld [vmem:[%s5755_s1 + $0x880] sm:$0xff]  ;;  %v297_v38 = vld [vmem:[%s5755_s1 + $0x888] sm:$0xff] }
  0x5b   :  { %3188 = vmatpush3.bf16.msra.mxu1 %v3187_v39  ;;  %v270_v39 = vld [vmem:[%s5755_s1 + $0x7b0] sm:$0xff] }
  0x5c   :  { %3190 = vmatprep.subr.bf16.mxu1 %v3189_v46  ;;  %v222_v46 = vld [vmem:[%s5755_s1 + $0x630] sm:$0xff]  ;;  %v3241_v49 = vpack.c.bf16 %v271_v40, %v270_v39  ;;  %v328_v39 = vld [vmem:[%s5755_s1 + $0x980] sm:$0xff]  ;;  %v329_v40 = vld [vmem:[%s5755_s1 + $0x988] sm:$0xff] }
  0x5d   :  { %3160 = vmatpush3.bf16.msra.mxu0 %v3159_v53  ;;  %v241_v53 = vld [vmem:[%s5755_s1 + $0x6c8] sm:$0xff]  ;;  %v3293_v50 = vpack.c.bf16 %v329_v40, %v328_v39  ;;  %v306_v39 = vld [vmem:[%s5755_s1 + $0x8d0] sm:$0xff]  ;;  %v307_v40 = vld [vmem:[%s5755_s1 + $0x8d8] sm:$0xff] }
  0x5e   :  { %3162 = vmatprep.subr.bf16.mxu0 %v3161_v55  ;;  %v3211_v55 = vpack.c.bf16 %v223_v47, %v222_v46  ;;  %v3213_v57 = vpack.c.bf16 %v241_v53, %v240_v51  ;;  %v3261_v46 = vpack.c.bf16 %v297_v38, %v296_v37  ;;  %v280_v47 = vld [vmem:[%s5755_s1 + $0x800] sm:$0xff]  ;;  %v313_v51 = vld [vmem:[%s5755_s1 + $0x908] sm:$0xff]  ;;  %v298_v53 = vld [vmem:[%s5755_s1 + $0x890] sm:$0xff] }
  0x5f   :  { %3192 = vmatpush3.bf16.msra.mxu1 %v3191_v54  ;;  %v273_v54 = vld [vmem:[%s5755_s1 + $0x7c8] sm:$0xff] }
  0x60   :  { %3194 = vmatprep.subr.bf16.mxu1 %v3193_v58  ;;  %v225_v58 = vld [vmem:[%s5755_s1 + $0x648] sm:$0xff]  ;;  %v3245_v60 = vpack.c.bf16 %v273_v54, %v272_v33  ;;  %v299_v33 = vld [vmem:[%s5755_s1 + $0x898] sm:$0xff] }
  0x61   :  { %3164 = vmatpush3.bf16.msra.mxu0 %v3163_v1  ;;  %v275_v1 = vld [vmem:[%s5755_s1 + $0x7d8] sm:$0xff]  ;;  %v321_v38 = vld [vmem:[%s5755_s1 + $0x948] sm:$0xff] }
  0x62   :  { %3198 = vmatprep.subr.bf16.mxu0 %v3197_v3  ;;  %v3247_v3 = vpack.c.bf16 %v257_v61, %v256_v59  ;;  %v3249_v8 = vpack.c.bf16 %v275_v1, %v274_v0  ;;  %v3265_v59 = vpack.c.bf16 %v299_v33, %v298_v53  ;;  %v283_v61 = vld [vmem:[%s5755_s1 + $0x818] sm:$0xff]  ;;  %v300_v1 = vld [vmem:[%s5755_s1 + $0x8a0] sm:$0xff] }
  0x63   :  { %3196 = vmatpush3.bf16.msra.mxu1 %v3195_v2  ;;  %v3215_v2 = vpack.c.bf16 %v225_v58, %v224_v45  ;;  %v3263_v45 = vpack.c.bf16 %v281_v48, %v280_v47  ;;  %v315_v0 = vld [vmem:[%s5755_s1 + $0x918] sm:$0xff]  ;;  %v3281_v47 = vpack.c.bf16 %v307_v40, %v306_v39  ;;  %v290_v48 = vld [vmem:[%s5755_s1 + $0x850] sm:$0xff]  ;;  %v308_v33 = vld [vmem:[%s5755_s1 + $0x8e0] sm:$0xff] }
  0x64   :  { %3230 = vmatprep.subr.bf16.mxu1 %v3229_v7  ;;  %1236 = vmatmul.mubr.f32.vlgmr.msra.gmra.mrb[4].mxu0 %v4134_v42  ;;  %v220_v42 = vld [vmem:[%s5755_s1 + $0x620] sm:$0xff]  ;;  %v258_v7 = vld [vmem:[%s5755_s1 + $0x750] sm:$0xff]  ;;  %v323_v53 = vld [vmem:[%s5755_s1 + $0x958] sm:$0xff] }
  0x65   :  { %3200 = vmatpush3.bf16.msra.mxu0 %v3199_v16  ;;  %1375 = vmatprep.mubr.f32.mxu0 %v747_v26  ;;  %v3207_v41 = vpack.c.bf16 %v221_v34, %v220_v42  ;;  %v277_v16 = vld [vmem:[%s5755_s1 + $0x7e8] sm:$0xff]  ;;  %v247_v26 = vld [vmem:[%s5755_s1 + $0x6f8] sm:$0xff]  ;;  %v230_v42 = vld [vmem:[%s5755_s1 + $0x670] sm:$0xff] }
  0x66   :  { %1306 = vmatmul.mubr.f32.vlgmr.msra.gmra.mrb[4].mxu1 %v4155_v52  ;;  %3202 = vmatprep.subr.bf16.mxu0 %v3201_v18  ;;  %v253_v52 = vld [vmem:[%s5755_s1 + $0x728] sm:$0xff]  ;;  %v3251_v18 = vpack.c.bf16 %v259_v9, %v258_v7  ;;  %v3253_v23 = vpack.c.bf16 %v277_v16, %v276_v14  ;;  %v231_v34 = vld [vmem:[%s5755_s1 + $0x678] sm:$0xff]  ;;  %v302_v16 = vld [vmem:[%s5755_s1 + $0x8b0] sm:$0xff] }
  0x67   :  { %3232 = vmatpush3.bf16.msra.mxu1 %v3231_v17  ;;  %1445 = vmatprep.mubr.f32.mxu1 %v748_v29  ;;  %v3239_v43 = vpack.c.bf16 %v253_v52, %v252_v35  ;;  %v3219_v17 = vpack.c.bf16 %v227_v6, %v226_v5  ;;  %v3223_v29 = vpack.c.bf16 %v229_v21, %v228_v20  ;;  %v262_v35 = vld [vmem:[%s5755_s1 + $0x770] sm:$0xff]  ;;  %v263_v52 = vld [vmem:[%s5755_s1 + $0x778] sm:$0xff]  ;;  %v333_v5 = vld [vmem:[%s5755_s1 + $0x9a8] sm:$0xff] }
  0x68   :  { %3234 = vmatprep.subr.bf16.mxu1 %v3233_v22  ;;  %v260_v22 = vld [vmem:[%s5755_s1 + $0x760] sm:$0xff]  ;;  %v378_v39 = vld [vmem:[%s5755_s1 + $0xb10] sm:$0xff] }
  0x69   :  { %3204 = vmatpush3.bf16.msra.mxu0 %v3203_v30  ;;  %v18_v30 = vld [vmem:[%s5756_s0 + $0x20] sm:$0xff] }
  0x6a   :  { %3206 = vmatprep.subr.bf16.mxu0 %v3205_v32  ;;  %v3225_v32 = vpack.c.bf16 %v247_v26, %v246_v25  ;;  %v4533_v54 = vrot.slane %v18_v30, %v3831_v13  ;;  %v318_v25 = vld [vmem:[%s5755_s1 + $0x930] sm:$0xff] }
  0x6b   :  { %3236 = vmatpush3.bf16.msra.mxu1 %v3235_v31  ;;  %v3255_v31 = vpack.c.bf16 %v261_v24, %v260_v22  ;;  %v287_v24 = vld [vmem:[%s5755_s1 + $0x838] sm:$0xff] }
  0x6c   :  { %3238 = vmatprep.subr.bf16.mxu1 %v3237_v36  ;;  %v3257_v36 = vpack.c.bf16 %v279_v28, %v278_v27  ;;  %v319_v27 = vld [vmem:[%s5755_s1 + $0x938] sm:$0xff]  ;;  %v304_v28 = vld [vmem:[%s5755_s1 + $0x8c0] sm:$0xff] }
  0x6d   :  { %3208 = vmatpush3.bf16.msra.mxu0 %v3207_v41  ;;  %v749_v41 = vcombine.high %v18_v30, %v18_v30  ;;  %v336_v30 = vld [vmem:[%s5755_s1 + $0x9c0] sm:$0xff] }
  0x6e   :  { %3210 = vmatprep.subr.bf16.mxu0 %v3209_v44  ;;  %v3259_v44 = vpack.c.bf16 %v263_v52, %v262_v35  ;;  %v288_v35 = vld [vmem:[%s5755_s1 + $0x840] sm:$0xff] }
  0x6f   :  { %3240 = vmatpush3.bf16.msra.mxu1 %v3239_v43  ;;  %v3227_v43 = vpack.c.bf16 %v231_v34, %v230_v42  ;;  %v3307_v42 = vpack.c.bf16 %v319_v27, %v318_v25  ;;  %v320_v52 = vld [vmem:[%s5755_s1 + $0x940] sm:$0xff]  ;;  %v345_v25 = vld [vmem:[%s5755_s1 + $0xa08] sm:$0xff] }
  0x70   :  { %3242 = vmatprep.subr.bf16.mxu1 %v3241_v49  ;;  %v312_v49 = vld [vmem:[%s5755_s1 + $0x900] sm:$0xff] }
  0x71   :  { %3212 = vmatpush3.bf16.msra.mxu0 %v3211_v55  ;;  %v330_v55 = vld [vmem:[%s5755_s1 + $0x990] sm:$0xff]  ;;  %v3295_v58 = vpack.c.bf16 %v313_v51, %v312_v49  ;;  %v291_v49 = vld [vmem:[%s5755_s1 + $0x858] sm:$0xff] }
  0x72   :  { %3214 = vmatprep.subr.bf16.mxu0 %v3213_v57  ;;  %v4542_v57 = vrot.slane %v749_v41, %v3831_v13  ;;  %v338_v41 = vld [vmem:[%s5755_s1 + $0x9d0] sm:$0xff] }
  0x73   :  { %3244 = vmatpush3.bf16.msra.mxu1 %v3243_v56  ;;  %v331_v56 = vld [vmem:[%s5755_s1 + $0x998] sm:$0xff] }
  0x74   :  { %3246 = vmatprep.subr.bf16.mxu1 %v3245_v60  ;;  %v282_v60 = vld [vmem:[%s5755_s1 + $0x810] sm:$0xff]  ;;  %v3297_v63 = vpack.c.bf16 %v331_v56, %v330_v55  ;;  %v765_v6 = vcombine.high %v4542_v57, %v4542_v57  ;;  %v309_v55 = vld [vmem:[%s5755_s1 + $0x8e8] sm:$0xff]  ;;  %v340_v56 = vld [vmem:[%s5755_s1 + $0x9e0] sm:$0xff] }
  0x75   :  { %3216 = vmatpush3.bf16.msra.mxu0 %v3215_v2  ;;  %v301_v2 = vld [vmem:[%s5755_s1 + $0x8a8] sm:$0xff]  ;;  %v3267_v7 = vpack.c.bf16 %v283_v61, %v282_v60  ;;  %v3285_v60 = vpack.c.bf16 %v309_v55, %v308_v33  ;;  %v292_v61 = vld [vmem:[%s5755_s1 + $0x860] sm:$0xff] }
  0x76   :  { %3218 = vmatprep.subr.bf16.mxu0 %v3217_v4  ;;  %v332_v4 = vld [vmem:[%s5755_s1 + $0x9a0] sm:$0xff]  ;;  %v3269_v9 = vpack.c.bf16 %v301_v2, %v300_v1  ;;  %v325_v1 = vld [vmem:[%s5755_s1 + $0x968] sm:$0xff]  ;;  %v310_v2 = vld [vmem:[%s5755_s1 + $0x8f0] sm:$0xff] }
  0x77   :  { %3248 = vmatpush3.bf16.msra.mxu1 %v3247_v3  ;;  %v764_v3 = vcombine.high %v4533_v54, %v4533_v54  ;;  %v3301_v14 = vpack.c.bf16 %v333_v5, %v332_v4  ;;  %v342_v4 = vld [vmem:[%s5755_s1 + $0x9f0] sm:$0xff]  ;;  %v343_v5 = vld [vmem:[%s5755_s1 + $0x9f8] sm:$0xff]  ;;  %v349_v33 = vld [vmem:[%s5755_s1 + $0xa28] sm:$0xff] }
  0x78   :  { %3250 = vmatprep.subr.bf16.mxu1 %v3249_v8  ;;  %v3299_v8 = vpack.c.bf16 %v315_v0, %v314_v62  ;;  %v293_v62 = vld [vmem:[%s5755_s1 + $0x868] sm:$0xff]  ;;  %v380_v55 = vld [vmem:[%s5755_s1 + $0xb20] sm:$0xff] }
  0x79   :  { %3220 = vmatpush3.bf16.msra.mxu0 %v3219_v17  ;;  %v303_v17 = vld [vmem:[%s5755_s1 + $0x8b8] sm:$0xff] }
  0x7a   :  { %3222 = vmatprep.subr.bf16.mxu0 %v3221_v19  ;;  %v335_v19 = vld [vmem:[%s5755_s1 + $0x9b8] sm:$0xff]  ;;  %v3273_v22 = vpack.c.bf16 %v303_v17, %v302_v16  ;;  %v360_v16 = vld [vmem:[%s5755_s1 + $0xa80] sm:$0xff]  ;;  %v361_v17 = vld [vmem:[%s5755_s1 + $0xa88] sm:$0xff] }
  0x7b   :  { %3252 = vmatpush3.bf16.msra.mxu1 %v3251_v18  ;;  %v334_v18 = vld [vmem:[%s5755_s1 + $0x9b0] sm:$0xff] }
  0x7c   :  { %3254 = vmatprep.subr.bf16.mxu1 %v3253_v23  ;;  %v286_v23 = vld [vmem:[%s5755_s1 + $0x830] sm:$0xff]  ;;  %v3305_v26 = vpack.c.bf16 %v335_v19, %v334_v18  ;;  %v392_v18 = vld [vmem:[%s5755_s1 + $0xb80] sm:$0xff]  ;;  %v393_v19 = vld [vmem:[%s5755_s1 + $0xb88] sm:$0xff] }
  0x7d   :  { %3224 = vmatpush3.bf16.msra.mxu0 %v3223_v29  ;;  %v305_v29 = vld [vmem:[%s5755_s1 + $0x8c8] sm:$0xff]  ;;  %v3357_v27 = vpack.c.bf16 %v393_v19, %v392_v18  ;;  %v370_v18 = vld [vmem:[%s5755_s1 + $0xad0] sm:$0xff]  ;;  %v371_v19 = vld [vmem:[%s5755_s1 + $0xad8] sm:$0xff] }
  0x7e   :  { %3226 = vmatprep.subr.bf16.mxu0 %v3225_v32  ;;  %v3275_v32 = vpack.c.bf16 %v287_v24, %v286_v23  ;;  %v3277_v34 = vpack.c.bf16 %v305_v29, %v304_v28  ;;  %v3325_v23 = vpack.c.bf16 %v361_v17, %v360_v16  ;;  %v344_v24 = vld [vmem:[%s5755_s1 + $0xa00] sm:$0xff]  ;;  %v377_v28 = vld [vmem:[%s5755_s1 + $0xb08] sm:$0xff]  ;;  %v362_v29 = vld [vmem:[%s5755_s1 + $0xa90] sm:$0xff] }
  0x7f   :  { %3256 = vmatpush3.bf16.msra.mxu1 %v3255_v31  ;;  %v337_v31 = vld [vmem:[%s5755_s1 + $0x9c8] sm:$0xff] }
  0x80   :  { %3258 = vmatprep.subr.bf16.mxu1 %v3257_v36  ;;  %v289_v36 = vld [vmem:[%s5755_s1 + $0x848] sm:$0xff]  ;;  %v3309_v37 = vpack.c.bf16 %v337_v31, %v336_v30  ;;  %v363_v30 = vld [vmem:[%s5755_s1 + $0xa98] sm:$0xff] }
  0x81   :  { %3228 = vmatpush3.bf16.msra.mxu0 %v3227_v43  ;;  %v339_v43 = vld [vmem:[%s5755_s1 + $0x9d8] sm:$0xff]  ;;  %v385_v17 = vld [vmem:[%s5755_s1 + $0xb48] sm:$0xff] }
  0x82   :  { %3262 = vmatprep.subr.bf16.mxu0 %v3261_v46  ;;  %v3311_v46 = vpack.c.bf16 %v321_v38, %v320_v52  ;;  %v3313_v51 = vpack.c.bf16 %v339_v43, %v338_v41  ;;  %v3329_v52 = vpack.c.bf16 %v363_v30, %v362_v29  ;;  %v347_v38 = vld [vmem:[%s5755_s1 + $0xa18] sm:$0xff]  ;;  %v364_v43 = vld [vmem:[%s5755_s1 + $0xaa0] sm:$0xff] }
  0x83   :  { %3260 = vmatpush3.bf16.msra.mxu1 %v3259_v44  ;;  %v3279_v44 = vpack.c.bf16 %v289_v36, %v288_v35  ;;  %v3327_v35 = vpack.c.bf16 %v345_v25, %v344_v24  ;;  %v379_v41 = vld [vmem:[%s5755_s1 + $0xb18] sm:$0xff]  ;;  %v3345_v24 = vpack.c.bf16 %v371_v19, %v370_v18  ;;  %v354_v25 = vld [vmem:[%s5755_s1 + $0xa50] sm:$0xff]  ;;  %v372_v30 = vld [vmem:[%s5755_s1 + $0xae0] sm:$0xff] }
  0x84   :  { %3294 = vmatprep.subr.bf16.mxu1 %v3293_v50  ;;  %1376 = vmatmul.mubr.f32.vlgmr.msra.gmra.mrb[6].mxu0 %v4326_v11  ;;  %v284_v11 = vld [vmem:[%s5755_s1 + $0x820] sm:$0xff]  ;;  %v322_v50 = vld [vmem:[%s5755_s1 + $0x950] sm:$0xff]  ;;  %v387_v29 = vld [vmem:[%s5755_s1 + $0xb58] sm:$0xff] }
  0x85   :  { %3264 = vmatpush3.bf16.msra.mxu0 %v3263_v45  ;;  %1515 = vmatprep.mubr.f32.mxu0 %v764_v3  ;;  %v3271_v20 = vpack.c.bf16 %v285_v10, %v284_v11  ;;  %v341_v45 = vld [vmem:[%s5755_s1 + $0x9e8] sm:$0xff]  ;;  %v311_v3 = vld [vmem:[%s5755_s1 + $0x8f8] sm:$0xff]  ;;  %v294_v11 = vld [vmem:[%s5755_s1 + $0x870] sm:$0xff] }
  0x86   :  { %1446 = vmatmul.mubr.f32.vlgmr.msra.gmra.mrb[6].mxu1 %v4335_v15  ;;  %3266 = vmatprep.subr.bf16.mxu0 %v3265_v59  ;;  %v317_v15 = vld [vmem:[%s5755_s1 + $0x928] sm:$0xff]  ;;  %v3315_v59 = vpack.c.bf16 %v323_v53, %v322_v50  ;;  %v3317_v0 = vpack.c.bf16 %v341_v45, %v340_v56  ;;  %v295_v10 = vld [vmem:[%s5755_s1 + $0x878] sm:$0xff]  ;;  %v366_v45 = vld [vmem:[%s5755_s1 + $0xab0] sm:$0xff] }
  0x87   :  { %3296 = vmatpush3.bf16.msra.mxu1 %v3295_v58  ;;  %1585 = vmatprep.mubr.f32.mxu1 %v765_v6  ;;  %v3303_v21 = vpack.c.bf16 %v317_v15, %v316_v12  ;;  %v3283_v58 = vpack.c.bf16 %v291_v49, %v290_v48  ;;  %v3287_v6 = vpack.c.bf16 %v293_v62, %v292_v61  ;;  %v326_v12 = vld [vmem:[%s5755_s1 + $0x970] sm:$0xff]  ;;  %v327_v15 = vld [vmem:[%s5755_s1 + $0x978] sm:$0xff]  ;;  %v397_v48 = vld [vmem:[%s5755_s1 + $0xba8] sm:$0xff] }
  0x88   :  { %3298 = vmatprep.subr.bf16.mxu1 %v3297_v63  ;;  %v324_v63 = vld [vmem:[%s5755_s1 + $0x960] sm:$0xff]  ;;  %v442_v18 = vld [vmem:[%s5755_s1 + $0xd10] sm:$0xff] }
  0x89   :  { %3268 = vmatpush3.bf16.msra.mxu0 %v3267_v7  ;;  %v19_v7 = vld [vmem:[%s5756_s0 + $0x28] sm:$0xff] }
  0x8a   :  { %3270 = vmatprep.subr.bf16.mxu0 %v3269_v9  ;;  %v3289_v9 = vpack.c.bf16 %v311_v3, %v310_v2  ;;  %v4740_v31 = vrot.slane %v19_v7, %v3831_v13  ;;  %v382_v2 = vld [vmem:[%s5755_s1 + $0xb30] sm:$0xff] }
  0x8b   :  { %3300 = vmatpush3.bf16.msra.mxu1 %v3299_v8  ;;  %v3319_v8 = vpack.c.bf16 %v325_v1, %v324_v63  ;;  %v351_v1 = vld [vmem:[%s5755_s1 + $0xa38] sm:$0xff] }
  0x8c   :  { %3302 = vmatprep.subr.bf16.mxu1 %v3301_v14  ;;  %v3321_v14 = vpack.c.bf16 %v343_v5, %v342_v4  ;;  %v383_v4 = vld [vmem:[%s5755_s1 + $0xb38] sm:$0xff]  ;;  %v368_v5 = vld [vmem:[%s5755_s1 + $0xac0] sm:$0xff] }
  0x8d   :  { %3272 = vmatpush3.bf16.msra.mxu0 %v3271_v20  ;;  %v766_v20 = vcombine.high %v19_v7, %v19_v7  ;;  %v400_v7 = vld [vmem:[%s5755_s1 + $0xbc0] sm:$0xff] }
  0x8e   :  { %3274 = vmatprep.subr.bf16.mxu0 %v3273_v22  ;;  %v3323_v22 = vpack.c.bf16 %v327_v15, %v326_v12  ;;  %v352_v12 = vld [vmem:[%s5755_s1 + $0xa40] sm:$0xff] }
  0x8f   :  { %3304 = vmatpush3.bf16.msra.mxu1 %v3303_v21  ;;  %v3291_v21 = vpack.c.bf16 %v295_v10, %v294_v11  ;;  %v3371_v11 = vpack.c.bf16 %v383_v4, %v382_v2  ;;  %v384_v15 = vld [vmem:[%s5755_s1 + $0xb40] sm:$0xff]  ;;  %v409_v2 = vld [vmem:[%s5755_s1 + $0xc08] sm:$0xff] }
  0x90   :  { %3306 = vmatprep.subr.bf16.mxu1 %v3305_v26  ;;  %v376_v26 = vld [vmem:[%s5755_s1 + $0xb00] sm:$0xff] }
  0x91   :  { %3276 = vmatpush3.bf16.msra.mxu0 %v3275_v32  ;;  %v394_v32 = vld [vmem:[%s5755_s1 + $0xb90] sm:$0xff]  ;;  %v3359_v36 = vpack.c.bf16 %v377_v28, %v376_v26  ;;  %v355_v26 = vld [vmem:[%s5755_s1 + $0xa58] sm:$0xff] }
  0x92   :  { %3278 = vmatprep.subr.bf16.mxu0 %v3277_v34  ;;  %v4749_v34 = vrot.slane %v766_v20, %v3831_v13  ;;  %v402_v20 = vld [vmem:[%s5755_s1 + $0xbd0] sm:$0xff] }
  0x93   :  { %3308 = vmatpush3.bf16.msra.mxu1 %v3307_v42  ;;  %v395_v42 = vld [vmem:[%s5755_s1 + $0xb98] sm:$0xff] }
  0x94   :  { %3310 = vmatprep.subr.bf16.mxu1 %v3309_v37  ;;  %v346_v37 = vld [vmem:[%s5755_s1 + $0xa10] sm:$0xff]  ;;  %v3361_v40 = vpack.c.bf16 %v395_v42, %v394_v32  ;;  %v782_v49 = vcombine.high %v4749_v34, %v4749_v34  ;;  %v373_v32 = vld [vmem:[%s5755_s1 + $0xae8] sm:$0xff]  ;;  %v404_v42 = vld [vmem:[%s5755_s1 + $0xbe0] sm:$0xff] }
  0x95   :  { %3280 = vmatpush3.bf16.msra.mxu0 %v3279_v44  ;;  %v365_v44 = vld [vmem:[%s5755_s1 + $0xaa8] sm:$0xff]  ;;  %v3331_v50 = vpack.c.bf16 %v347_v38, %v346_v37  ;;  %v3349_v37 = vpack.c.bf16 %v373_v32, %v372_v30  ;;  %v356_v38 = vld [vmem:[%s5755_s1 + $0xa60] sm:$0xff] }
  0x96   :  { %3282 = vmatprep.subr.bf16.mxu0 %v3281_v47  ;;  %v396_v47 = vld [vmem:[%s5755_s1 + $0xba0] sm:$0xff]  ;;  %v3333_v53 = vpack.c.bf16 %v365_v44, %v364_v43  ;;  %v389_v43 = vld [vmem:[%s5755_s1 + $0xb68] sm:$0xff]  ;;  %v374_v44 = vld [vmem:[%s5755_s1 + $0xaf0] sm:$0xff] }
  0x97   :  { %3312 = vmatpush3.bf16.msra.mxu1 %v3311_v46  ;;  %v781_v46 = vcombine.high %v4740_v31, %v4740_v31  ;;  %v3365_v56 = vpack.c.bf16 %v397_v48, %v396_v47  ;;  %v406_v47 = vld [vmem:[%s5755_s1 + $0xbf0] sm:$0xff]  ;;  %v407_v48 = vld [vmem:[%s5755_s1 + $0xbf8] sm:$0xff]  ;;  %v413_v30 = vld [vmem:[%s5755_s1 + $0xc28] sm:$0xff] }
  0x98   :  { %3314 = vmatprep.subr.bf16.mxu1 %v3313_v51  ;;  %v3363_v51 = vpack.c.bf16 %v379_v41, %v378_v39  ;;  %v357_v39 = vld [vmem:[%s5755_s1 + $0xa68] sm:$0xff]  ;;  %v444_v32 = vld [vmem:[%s5755_s1 + $0xd20] sm:$0xff] }
  0x99   :  { %3284 = vmatpush3.bf16.msra.mxu0 %v3283_v58  ;;  %v367_v58 = vld [vmem:[%s5755_s1 + $0xab8] sm:$0xff] }
  0x9a   :  { %3286 = vmatprep.subr.bf16.mxu0 %v3285_v60  ;;  %v399_v60 = vld [vmem:[%s5755_s1 + $0xbb8] sm:$0xff]  ;;  %v3337_v63 = vpack.c.bf16 %v367_v58, %v366_v45  ;;  %v424_v45 = vld [vmem:[%s5755_s1 + $0xc80] sm:$0xff]  ;;  %v425_v58 = vld [vmem:[%s5755_s1 + $0xc88] sm:$0xff] }
  0x9b   :  { %3316 = vmatpush3.bf16.msra.mxu1 %v3315_v59  ;;  %v398_v59 = vld [vmem:[%s5755_s1 + $0xbb0] sm:$0xff] }
  0x9c   :  { %3318 = vmatprep.subr.bf16.mxu1 %v3317_v0  ;;  %v350_v0 = vld [vmem:[%s5755_s1 + $0xa30] sm:$0xff]  ;;  %v3369_v3 = vpack.c.bf16 %v399_v60, %v398_v59  ;;  %v456_v59 = vld [vmem:[%s5755_s1 + $0xd80] sm:$0xff]  ;;  %v457_v60 = vld [vmem:[%s5755_s1 + $0xd88] sm:$0xff] }
  0x9d   :  { %3288 = vmatpush3.bf16.msra.mxu0 %v3287_v6  ;;  %v369_v6 = vld [vmem:[%s5755_s1 + $0xac8] sm:$0xff]  ;;  %v3421_v4 = vpack.c.bf16 %v457_v60, %v456_v59  ;;  %v434_v59 = vld [vmem:[%s5755_s1 + $0xcd0] sm:$0xff]  ;;  %v435_v60 = vld [vmem:[%s5755_s1 + $0xcd8] sm:$0xff] }
  0x9e   :  { %3290 = vmatprep.subr.bf16.mxu0 %v3289_v9  ;;  %v3339_v9 = vpack.c.bf16 %v351_v1, %v350_v0  ;;  %v3341_v10 = vpack.c.bf16 %v369_v6, %v368_v5  ;;  %v3389_v0 = vpack.c.bf16 %v425_v58, %v424_v45  ;;  %v408_v1 = vld [vmem:[%s5755_s1 + $0xc00] sm:$0xff]  ;;  %v441_v5 = vld [vmem:[%s5755_s1 + $0xd08] sm:$0xff]  ;;  %v426_v6 = vld [vmem:[%s5755_s1 + $0xc90] sm:$0xff] }
  0x9f   :  { %3320 = vmatpush3.bf16.msra.mxu1 %v3319_v8  ;;  %v401_v8 = vld [vmem:[%s5755_s1 + $0xbc8] sm:$0xff] }
  0xa0   :  { %3322 = vmatprep.subr.bf16.mxu1 %v3321_v14  ;;  %v353_v14 = vld [vmem:[%s5755_s1 + $0xa48] sm:$0xff]  ;;  %v3373_v16 = vpack.c.bf16 %v401_v8, %v400_v7  ;;  %v427_v7 = vld [vmem:[%s5755_s1 + $0xc98] sm:$0xff] }
  0xa1   :  { %3292 = vmatpush3.bf16.msra.mxu0 %v3291_v21  ;;  %v403_v21 = vld [vmem:[%s5755_s1 + $0xbd8] sm:$0xff]  ;;  %v449_v58 = vld [vmem:[%s5755_s1 + $0xd48] sm:$0xff] }
  0xa2   :  { %3326 = vmatprep.subr.bf16.mxu0 %v3325_v23  ;;  %v3375_v23 = vpack.c.bf16 %v385_v17, %v384_v15  ;;  %v3377_v28 = vpack.c.bf16 %v403_v21, %v402_v20  ;;  %v3393_v15 = vpack.c.bf16 %v427_v7, %v426_v6  ;;  %v411_v17 = vld [vmem:[%s5755_s1 + $0xc18] sm:$0xff]  ;;  %v428_v21 = vld [vmem:[%s5755_s1 + $0xca0] sm:$0xff] }
  0xa3   :  { %3324 = vmatpush3.bf16.msra.mxu1 %v3323_v22  ;;  %v3343_v22 = vpack.c.bf16 %v353_v14, %v352_v12  ;;  %v3391_v12 = vpack.c.bf16 %v409_v2, %v408_v1  ;;  %v443_v20 = vld [vmem:[%s5755_s1 + $0xd18] sm:$0xff]  ;;  %v3409_v1 = vpack.c.bf16 %v435_v60, %v434_v59  ;;  %v418_v2 = vld [vmem:[%s5755_s1 + $0xc50] sm:$0xff]  ;;  %v436_v7 = vld [vmem:[%s5755_s1 + $0xce0] sm:$0xff] }
  0xa4   :  { %3358 = vmatprep.subr.bf16.mxu1 %v3357_v27  ;;  %1516 = vmatmul.mubr.f32.vlgmr.msra.gmra.mrb[8].mxu0 %v4533_v54  ;;  %v348_v54 = vld [vmem:[%s5755_s1 + $0xa20] sm:$0xff]  ;;  %v386_v27 = vld [vmem:[%s5755_s1 + $0xb50] sm:$0xff]  ;;  %v451_v6 = vld [vmem:[%s5755_s1 + $0xd58] sm:$0xff] }
  0xa5   :  { %3328 = vmatpush3.bf16.msra.mxu0 %v3327_v35  ;;  %1655 = vmatprep.mubr.f32.mxu0 %v781_v46  ;;  %v3335_v61 = vpack.c.bf16 %v349_v33, %v348_v54  ;;  %v405_v35 = vld [vmem:[%s5755_s1 + $0xbe8] sm:$0xff]  ;;  %v375_v46 = vld [vmem:[%s5755_s1 + $0xaf8] sm:$0xff]  ;;  %v358_v54 = vld [vmem:[%s5755_s1 + $0xa70] sm:$0xff] }
  0xa6   :  { %1586 = vmatmul.mubr.f32.vlgmr.msra.gmra.mrb[8].mxu1 %v4542_v57  ;;  %3330 = vmatprep.subr.bf16.mxu0 %v3329_v52  ;;  %v381_v57 = vld [vmem:[%s5755_s1 + $0xb28] sm:$0xff]  ;;  %v3379_v52 = vpack.c.bf16 %v387_v29, %v386_v27  ;;  %v3381_v41 = vpack.c.bf16 %v405_v35, %v404_v42  ;;  %v359_v33 = vld [vmem:[%s5755_s1 + $0xa78] sm:$0xff]  ;;  %v430_v35 = vld [vmem:[%s5755_s1 + $0xcb0] sm:$0xff] }
  0xa7   :  { %3360 = vmatpush3.bf16.msra.mxu1 %v3359_v36  ;;  %1725 = vmatprep.mubr.f32.mxu1 %v782_v49  ;;  %v3367_v62 = vpack.c.bf16 %v381_v57, %v380_v55  ;;  %v3347_v36 = vpack.c.bf16 %v355_v26, %v354_v25  ;;  %v3351_v49 = vpack.c.bf16 %v357_v39, %v356_v38  ;;  %v390_v55 = vld [vmem:[%s5755_s1 + $0xb70] sm:$0xff]  ;;  %v391_v57 = vld [vmem:[%s5755_s1 + $0xb78] sm:$0xff]  ;;  %v461_v25 = vld [vmem:[%s5755_s1 + $0xda8] sm:$0xff] }
  0xa8   :  { %3362 = vmatprep.subr.bf16.mxu1 %v3361_v40  ;;  %v388_v40 = vld [vmem:[%s5755_s1 + $0xb60] sm:$0xff]  ;;  %v506_v59 = vld [vmem:[%s5755_s1 + $0xf10] sm:$0xff] }
  0xa9   :  { %3332 = vmatpush3.bf16.msra.mxu0 %v3331_v50  ;;  %v20_v50 = vld [vmem:[%s5756_s0 + $0x30] sm:$0xff] }
  0xaa   :  { %3334 = vmatprep.subr.bf16.mxu0 %v3333_v53  ;;  %v3353_v53 = vpack.c.bf16 %v375_v46, %v374_v44  ;;  %v4947_v8 = vrot.slane %v20_v50, %v3831_v13  ;;  %v446_v44 = vld [vmem:[%s5755_s1 + $0xd30] sm:$0xff] }
  0xab   :  { %3364 = vmatpush3.bf16.msra.mxu1 %v3363_v51  ;;  %v3383_v51 = vpack.c.bf16 %v389_v43, %v388_v40  ;;  %v415_v43 = vld [vmem:[%s5755_s1 + $0xc38] sm:$0xff] }
  0xac   :  { %3366 = vmatprep.subr.bf16.mxu1 %v3365_v56  ;;  %v3385_v56 = vpack.c.bf16 %v407_v48, %v406_v47  ;;  %v447_v47 = vld [vmem:[%s5755_s1 + $0xd38] sm:$0xff]  ;;  %v432_v48 = vld [vmem:[%s5755_s1 + $0xcc0] sm:$0xff] }
  0xad   :  { %3336 = vmatpush3.bf16.msra.mxu0 %v3335_v61  ;;  %v783_v61 = vcombine.high %v20_v50, %v20_v50  ;;  %v464_v50 = vld [vmem:[%s5755_s1 + $0xdc0] sm:$0xff] }
  0xae   :  { %3338 = vmatprep.subr.bf16.mxu0 %v3337_v63  ;;  %v3387_v63 = vpack.c.bf16 %v391_v57, %v390_v55  ;;  %v416_v55 = vld [vmem:[%s5755_s1 + $0xc40] sm:$0xff] }
  0xaf   :  { %3368 = vmatpush3.bf16.msra.mxu1 %v3367_v62  ;;  %v3355_v62 = vpack.c.bf16 %v359_v33, %v358_v54  ;;  %v3435_v54 = vpack.c.bf16 %v447_v47, %v446_v44  ;;  %v448_v57 = vld [vmem:[%s5755_s1 + $0xd40] sm:$0xff]  ;;  %v473_v44 = vld [vmem:[%s5755_s1 + $0xe08] sm:$0xff] }
  0xb0   :  { %3370 = vmatprep.subr.bf16.mxu1 %v3369_v3  ;;  %v440_v3 = vld [vmem:[%s5755_s1 + $0xd00] sm:$0xff] }
  0xb1   :  { %3340 = vmatpush3.bf16.msra.mxu0 %v3339_v9  ;;  %v458_v9 = vld [vmem:[%s5755_s1 + $0xd90] sm:$0xff]  ;;  %v3423_v14 = vpack.c.bf16 %v441_v5, %v440_v3  ;;  %v419_v3 = vld [vmem:[%s5755_s1 + $0xc58] sm:$0xff] }
  0xb2   :  { %3342 = vmatprep.subr.bf16.mxu0 %v3341_v10  ;;  %v4956_v10 = vrot.slane %v783_v61, %v3831_v13  ;;  %v466_v61 = vld [vmem:[%s5755_s1 + $0xdd0] sm:$0xff] }
  0xb3   :  { %3372 = vmatpush3.bf16.msra.mxu1 %v3371_v11  ;;  %v459_v11 = vld [vmem:[%s5755_s1 + $0xd98] sm:$0xff] }
  0xb4   :  { %3374 = vmatprep.subr.bf16.mxu1 %v3373_v16  ;;  %v410_v16 = vld [vmem:[%s5755_s1 + $0xc10] sm:$0xff]  ;;  %v3425_v19 = vpack.c.bf16 %v459_v11, %v458_v9  ;;  %v799_v26 = vcombine.high %v4956_v10, %v4956_v10  ;;  %v437_v9 = vld [vmem:[%s5755_s1 + $0xce8] sm:$0xff]  ;;  %v468_v11 = vld [vmem:[%s5755_s1 + $0xde0] sm:$0xff] }
  0xb5   :  { %3344 = vmatpush3.bf16.msra.mxu0 %v3343_v22  ;;  %v429_v22 = vld [vmem:[%s5755_s1 + $0xca8] sm:$0xff]  ;;  %v3395_v27 = vpack.c.bf16 %v411_v17, %v410_v16  ;;  %v3413_v16 = vpack.c.bf16 %v437_v9, %v436_v7  ;;  %v420_v17 = vld [vmem:[%s5755_s1 + $0xc60] sm:$0xff] }
  0xb6   :  { %3346 = vmatprep.subr.bf16.mxu0 %v3345_v24  ;;  %v460_v24 = vld [vmem:[%s5755_s1 + $0xda0] sm:$0xff]  ;;  %v3397_v29 = vpack.c.bf16 %v429_v22, %v428_v21  ;;  %v453_v21 = vld [vmem:[%s5755_s1 + $0xd68] sm:$0xff]  ;;  %v438_v22 = vld [vmem:[%s5755_s1 + $0xcf0] sm:$0xff] }
  0xb7   :  { %3376 = vmatpush3.bf16.msra.mxu1 %v3375_v23  ;;  %v798_v23 = vcombine.high %v4947_v8, %v4947_v8  ;;  %v3429_v42 = vpack.c.bf16 %v461_v25, %v460_v24  ;;  %v470_v24 = vld [vmem:[%s5755_s1 + $0xdf0] sm:$0xff]  ;;  %v471_v25 = vld [vmem:[%s5755_s1 + $0xdf8] sm:$0xff]  ;;  %v477_v7 = vld [vmem:[%s5755_s1 + $0xe28] sm:$0xff] }
  0xb8   :  { %3378 = vmatprep.subr.bf16.mxu1 %v3377_v28  ;;  %v3427_v28 = vpack.c.bf16 %v443_v20, %v442_v18  ;;  %v421_v18 = vld [vmem:[%s5755_s1 + $0xc68] sm:$0xff]  ;;  %v508_v9 = vld [vmem:[%s5755_s1 + $0xf20] sm:$0xff] }
  0xb9   :  { %3348 = vmatpush3.bf16.msra.mxu0 %v3347_v36  ;;  %v431_v36 = vld [vmem:[%s5755_s1 + $0xcb8] sm:$0xff] }
  0xba   :  { %3350 = vmatprep.subr.bf16.mxu0 %v3349_v37  ;;  %v463_v37 = vld [vmem:[%s5755_s1 + $0xdb8] sm:$0xff]  ;;  %v3401_v40 = vpack.c.bf16 %v431_v36, %v430_v35  ;;  %v488_v35 = vld [vmem:[%s5755_s1 + $0xe80] sm:$0xff]  ;;  %v489_v36 = vld [vmem:[%s5755_s1 + $0xe88] sm:$0xff] }
  0xbb   :  { %3380 = vmatpush3.bf16.msra.mxu1 %v3379_v52  ;;  %v462_v52 = vld [vmem:[%s5755_s1 + $0xdb0] sm:$0xff] }
  0xbc   :  { %3382 = vmatprep.subr.bf16.mxu1 %v3381_v41  ;;  %v414_v41 = vld [vmem:[%s5755_s1 + $0xc30] sm:$0xff]  ;;  %v3433_v46 = vpack.c.bf16 %v463_v37, %v462_v52  ;;  %v520_v52 = vld [vmem:[%s5755_s1 + $0xf80] sm:$0xff]  ;;  %v521_v37 = vld [vmem:[%s5755_s1 + $0xf88] sm:$0xff] }
  0xbd   :  { %3352 = vmatpush3.bf16.msra.mxu0 %v3351_v49  ;;  %v433_v49 = vld [vmem:[%s5755_s1 + $0xcc8] sm:$0xff]  ;;  %v3485_v47 = vpack.c.bf16 %v521_v37, %v520_v52  ;;  %v498_v52 = vld [vmem:[%s5755_s1 + $0xed0] sm:$0xff]  ;;  %v499_v37 = vld [vmem:[%s5755_s1 + $0xed8] sm:$0xff] }
  0xbe   :  { %3354 = vmatprep.subr.bf16.mxu0 %v3353_v53  ;;  %v3403_v53 = vpack.c.bf16 %v415_v43, %v414_v41  ;;  %v3405_v33 = vpack.c.bf16 %v433_v49, %v432_v48  ;;  %v3453_v41 = vpack.c.bf16 %v489_v36, %v488_v35  ;;  %v472_v43 = vld [vmem:[%s5755_s1 + $0xe00] sm:$0xff]  ;;  %v505_v48 = vld [vmem:[%s5755_s1 + $0xf08] sm:$0xff]  ;;  %v490_v49 = vld [vmem:[%s5755_s1 + $0xe90] sm:$0xff] }
  0xbf   :  { %3384 = vmatpush3.bf16.msra.mxu1 %v3383_v51  ;;  %v465_v51 = vld [vmem:[%s5755_s1 + $0xdc8] sm:$0xff] }
  0xc0   :  { %3386 = vmatprep.subr.bf16.mxu1 %v3385_v56  ;;  %v417_v56 = vld [vmem:[%s5755_s1 + $0xc48] sm:$0xff]  ;;  %v3437_v45 = vpack.c.bf16 %v465_v51, %v464_v50  ;;  %v491_v50 = vld [vmem:[%s5755_s1 + $0xe98] sm:$0xff] }
  0xc1   :  { %3356 = vmatpush3.bf16.msra.mxu0 %v3355_v62  ;;  %v467_v62 = vld [vmem:[%s5755_s1 + $0xdd8] sm:$0xff]  ;;  %v513_v36 = vld [vmem:[%s5755_s1 + $0xf48] sm:$0xff] }
  0xc2   :  { %3390 = vmatprep.subr.bf16.mxu0 %v3389_v0  ;;  %v3439_v0 = vpack.c.bf16 %v449_v58, %v448_v57  ;;  %v3441_v5 = vpack.c.bf16 %v467_v62, %v466_v61  ;;  %v3457_v57 = vpack.c.bf16 %v491_v50, %v490_v49  ;;  %v475_v58 = vld [vmem:[%s5755_s1 + $0xe18] sm:$0xff]  ;;  %v492_v62 = vld [vmem:[%s5755_s1 + $0xea0] sm:$0xff] }
  0xc3   :  { %3388 = vmatpush3.bf16.msra.mxu1 %v3387_v63  ;;  %v3407_v63 = vpack.c.bf16 %v417_v56, %v416_v55  ;;  %v3455_v55 = vpack.c.bf16 %v473_v44, %v472_v43  ;;  %v507_v61 = vld [vmem:[%s5755_s1 + $0xf18] sm:$0xff]  ;;  %v3473_v43 = vpack.c.bf16 %v499_v37, %v498_v52  ;;  %v482_v44 = vld [vmem:[%s5755_s1 + $0xe50] sm:$0xff]  ;;  %v500_v50 = vld [vmem:[%s5755_s1 + $0xee0] sm:$0xff] }
  0xc4   :  { %3422 = vmatprep.subr.bf16.mxu1 %v3421_v4  ;;  %1656 = vmatmul.mubr.f32.vlgmr.msra.gmra.mrb[10].mxu0 %v4740_v31  ;;  %v412_v31 = vld [vmem:[%s5755_s1 + $0xc20] sm:$0xff]  ;;  %v450_v4 = vld [vmem:[%s5755_s1 + $0xd50] sm:$0xff]  ;;  %v515_v49 = vld [vmem:[%s5755_s1 + $0xf58] sm:$0xff] }
  0xc5   :  { %3392 = vmatpush3.bf16.msra.mxu0 %v3391_v12  ;;  %1795 = vmatprep.mubr.f32.mxu0 %v798_v23  ;;  %v3399_v38 = vpack.c.bf16 %v413_v30, %v412_v31  ;;  %v469_v12 = vld [vmem:[%s5755_s1 + $0xde8] sm:$0xff]  ;;  %v439_v23 = vld [vmem:[%s5755_s1 + $0xcf8] sm:$0xff]  ;;  %v422_v31 = vld [vmem:[%s5755_s1 + $0xc70] sm:$0xff] }
  0xc6   :  { %1726 = vmatmul.mubr.f32.vlgmr.msra.gmra.mrb[10].mxu1 %v4749_v34  ;;  %3394 = vmatprep.subr.bf16.mxu0 %v3393_v15  ;;  %v445_v34 = vld [vmem:[%s5755_s1 + $0xd28] sm:$0xff]  ;;  %v3443_v15 = vpack.c.bf16 %v451_v6, %v450_v4  ;;  %v3445_v20 = vpack.c.bf16 %v469_v12, %v468_v11  ;;  %v423_v30 = vld [vmem:[%s5755_s1 + $0xc78] sm:$0xff]  ;;  %v494_v12 = vld [vmem:[%s5755_s1 + $0xeb0] sm:$0xff] }
  0xc7   :  { %3424 = vmatpush3.bf16.msra.mxu1 %v3423_v14  ;;  %1865 = vmatprep.mubr.f32.mxu1 %v799_v26  ;;  %v3431_v39 = vpack.c.bf16 %v445_v34, %v444_v32  ;;  %v3411_v14 = vpack.c.bf16 %v419_v3, %v418_v2  ;;  %v3415_v26 = vpack.c.bf16 %v421_v18, %v420_v17  ;;  %v454_v32 = vld [vmem:[%s5755_s1 + $0xd70] sm:$0xff]  ;;  %v455_v34 = vld [vmem:[%s5755_s1 + $0xd78] sm:$0xff]  ;;  %v525_v2 = vld [vmem:[%s5755_s1 + $0xfa8] sm:$0xff] }
  0xc8   :  { %3426 = vmatprep.subr.bf16.mxu1 %v3425_v19  ;;  %v452_v19 = vld [vmem:[%s5755_s1 + $0xd60] sm:$0xff]  ;;  %v586_v37 = vld [vmem:[%s5755_s1 + $0x1190] sm:$0xff] }
  0xc9   :  { %3396 = vmatpush3.bf16.msra.mxu0 %v3395_v27  ;;  %v21_v27 = vld [vmem:[%s5756_s0 + $0x38] sm:$0xff] }
  0xca   :  { %3398 = vmatprep.subr.bf16.mxu0 %v3397_v29  ;;  %v3417_v29 = vpack.c.bf16 %v439_v23, %v438_v22  ;;  %v5154_v51 = vrot.slane %v21_v27, %v3831_v13  ;;  %v510_v22 = vld [vmem:[%s5755_s1 + $0xf30] sm:$0xff] }
  0xcb   :  { %3428 = vmatpush3.bf16.msra.mxu1 %v3427_v28  ;;  %v3447_v28 = vpack.c.bf16 %v453_v21, %v452_v19  ;;  %v479_v21 = vld [vmem:[%s5755_s1 + $0xe38] sm:$0xff] }
  0xcc   :  { %3430 = vmatprep.subr.bf16.mxu1 %v3429_v42  ;;  %v3449_v42 = vpack.c.bf16 %v471_v25, %v470_v24  ;;  %v511_v24 = vld [vmem:[%s5755_s1 + $0xf38] sm:$0xff]  ;;  %v496_v25 = vld [vmem:[%s5755_s1 + $0xec0] sm:$0xff] }
  0xcd   :  { %3400 = vmatpush3.bf16.msra.mxu0 %v3399_v38  ;;  %v800_v38 = vcombine.high %v21_v27, %v21_v27  ;;  %v528_v27 = vld [vmem:[%s5755_s1 + $0xfc0] sm:$0xff] }
  0xce   :  { %3402 = vmatprep.subr.bf16.mxu0 %v3401_v40  ;;  %v3451_v40 = vpack.c.bf16 %v455_v34, %v454_v32  ;;  %v480_v32 = vld [vmem:[%s5755_s1 + $0xe40] sm:$0xff] }
  0xcf   :  { %3432 = vmatpush3.bf16.msra.mxu1 %v3431_v39  ;;  %v3419_v39 = vpack.c.bf16 %v423_v30, %v422_v31  ;;  %v3499_v31 = vpack.c.bf16 %v511_v24, %v510_v22  ;;  %v512_v34 = vld [vmem:[%s5755_s1 + $0xf40] sm:$0xff]  ;;  %v553_v22 = vld [vmem:[%s5755_s1 + $0x1088] sm:$0xff] }
  0xd0   :  { %3434 = vmatprep.subr.bf16.mxu1 %v3433_v46  ;;  %v504_v46 = vld [vmem:[%s5755_s1 + $0xf00] sm:$0xff]  ;;  %v585_v24 = vld [vmem:[%s5755_s1 + $0x1188] sm:$0xff] }
  0xd1   :  { %3404 = vmatpush3.bf16.msra.mxu0 %v3403_v53  ;;  %v522_v53 = vld [vmem:[%s5755_s1 + $0xf90] sm:$0xff]  ;;  %v3487_v56 = vpack.c.bf16 %v505_v48, %v504_v46  ;;  %v483_v46 = vld [vmem:[%s5755_s1 + $0xe58] sm:$0xff] }
  0xd2   :  { %3406 = vmatprep.subr.bf16.mxu0 %v3405_v33  ;;  %v5163_v33 = vrot.slane %v800_v38, %v3831_v13  ;;  %v530_v38 = vld [vmem:[%s5755_s1 + $0xfd0] sm:$0xff] }
  0xd3   :  { %3436 = vmatpush3.bf16.msra.mxu1 %v3435_v54  ;;  %v523_v54 = vld [vmem:[%s5755_s1 + $0xf98] sm:$0xff] }
  0xd4   :  { %3438 = vmatprep.subr.bf16.mxu1 %v3437_v45  ;;  %v474_v45 = vld [vmem:[%s5755_s1 + $0xe10] sm:$0xff]  ;;  %v3489_v60 = vpack.c.bf16 %v523_v54, %v522_v53  ;;  %v816_v3 = vcombine.high %v5163_v33, %v5163_v33  ;;  %v501_v53 = vld [vmem:[%s5755_s1 + $0xee8] sm:$0xff]  ;;  %v532_v54 = vld [vmem:[%s5755_s1 + $0xfe0] sm:$0xff] }
  0xd5   :  { %3408 = vmatpush3.bf16.msra.mxu0 %v3407_v63  ;;  %v493_v63 = vld [vmem:[%s5755_s1 + $0xea8] sm:$0xff]  ;;  %v3459_v4 = vpack.c.bf16 %v475_v58, %v474_v45  ;;  %v3477_v45 = vpack.c.bf16 %v501_v53, %v500_v50  ;;  %v484_v58 = vld [vmem:[%s5755_s1 + $0xe60] sm:$0xff] }
  0xd6   :  { %3410 = vmatprep.subr.bf16.mxu0 %v3409_v1  ;;  %v524_v1 = vld [vmem:[%s5755_s1 + $0xfa0] sm:$0xff]  ;;  %v3461_v6 = vpack.c.bf16 %v493_v63, %v492_v62  ;;  %v517_v63 = vld [vmem:[%s5755_s1 + $0xf68] sm:$0xff] }
  0xd7   :  { %3440 = vmatpush3.bf16.msra.mxu1 %v3439_v0  ;;  %v815_v0 = vcombine.high %v5154_v51, %v5154_v51  ;;  %v3493_v11 = vpack.c.bf16 %v525_v2, %v524_v1  ;;  %v503_v1 = vld [vmem:[%s5755_s1 + $0xef8] sm:$0xff]  ;;  %v2303_v2 = vld [vmem:[%s5757_s2] ss:$0 sm:$0xff]  ;;  %v557_v53 = vld [vmem:[%s5755_s1 + $0x10a8] sm:$0xff] }
  0xd8   :  { %3442 = vmatprep.subr.bf16.mxu1 %v3441_v5  ;;  %v3491_v5 = vpack.c.bf16 %v507_v61, %v506_v59  ;;  %v485_v59 = vld [vmem:[%s5755_s1 + $0xe68] sm:$0xff]  ;;  %v556_v50 = vld [vmem:[%s5755_s1 + $0x10a0] sm:$0xff] }
  0xd9   :  { %3412 = vmatpush3.bf16.msra.mxu0 %v3411_v14  ;;  %v495_v14 = vld [vmem:[%s5755_s1 + $0xeb8] sm:$0xff] }
  0xda   :  { %3414 = vmatprep.subr.bf16.mxu0 %v3413_v16  ;;  %v527_v16 = vld [vmem:[%s5755_s1 + $0xfb8] sm:$0xff]  ;;  %v3465_v19 = vpack.c.bf16 %v495_v14, %v494_v12 }
  0xdb   :  { %3444 = vmatpush3.bf16.msra.mxu1 %v3443_v15  ;;  %v526_v15 = vld [vmem:[%s5755_s1 + $0xfb0] sm:$0xff] }
  0xdc   :  { %3446 = vmatprep.subr.bf16.mxu1 %v3445_v20  ;;  %v478_v20 = vld [vmem:[%s5755_s1 + $0xe30] sm:$0xff]  ;;  %v3497_v23 = vpack.c.bf16 %v527_v16, %v526_v15  ;;  %v487_v16 = vld [vmem:[%s5755_s1 + $0xe78] sm:$0xff] }
  0xdd   :  { %3416 = vmatpush3.bf16.msra.mxu0 %v3415_v26  ;;  %v497_v26 = vld [vmem:[%s5755_s1 + $0xec8] sm:$0xff]  ;;  %v486_v15 = vld [vmem:[%s5755_s1 + $0xe70] sm:$0xff] }
  0xde   :  { %3418 = vmatprep.subr.bf16.mxu0 %v3417_v29  ;;  %v3467_v29 = vpack.c.bf16 %v479_v21, %v478_v20  ;;  %v3469_v30 = vpack.c.bf16 %v497_v26, %v496_v25  ;;  %v519_v20 = vld [vmem:[%s5755_s1 + $0xf78] sm:$0xff]  ;;  %v552_v21 = vld [vmem:[%s5755_s1 + $0x1080] sm:$0xff] }
  0xdf   :  { %3448 = vmatpush3.bf16.msra.mxu1 %v3447_v28  ;;  %v529_v28 = vld [vmem:[%s5755_s1 + $0xfc8] sm:$0xff] }
  0xe0   :  { %3450 = vmatprep.subr.bf16.mxu1 %v3449_v42  ;;  %v481_v42 = vld [vmem:[%s5755_s1 + $0xe48] sm:$0xff]  ;;  %v3501_v35 = vpack.c.bf16 %v529_v28, %v528_v27  ;;  %v3483_v27 = vpack.c.bf16 %v487_v16, %v486_v15 }
  0xe1   :  { %3420 = vmatpush3.bf16.msra.mxu0 %v3419_v39  ;;  %v531_v39 = vld [vmem:[%s5755_s1 + $0xfd8] sm:$0xff]  ;;  %v593_v15 = vld [vmem:[%s5755_s1 + $0x11c8] sm:$0xff] }
  0xe2   :  { %3454 = vmatprep.subr.bf16.mxu0 %v3453_v41  ;;  %v3503_v41 = vpack.c.bf16 %v513_v36, %v512_v34  ;;  %v3505_v48 = vpack.c.bf16 %v531_v39, %v530_v38  ;;  %v569_v34 = vld [vmem:[%s5755_s1 + $0x1108] sm:$0xff]  ;;  %v555_v36 = vld [vmem:[%s5755_s1 + $0x1098] sm:$0xff] }
  0xe3   :  { %3452 = vmatpush3.bf16.msra.mxu1 %v3451_v40  ;;  %v3471_v40 = vpack.c.bf16 %v481_v42, %v480_v32  ;;  %v568_v32 = vld [vmem:[%s5755_s1 + $0x1100] sm:$0xff]  ;;  %v587_v38 = vld [vmem:[%s5755_s1 + $0x1198] sm:$0xff] }
  0xe4   :  { %3486 = vmatprep.subr.bf16.mxu1 %v3485_v47  ;;  %1796 = vmatmul.mubr.f32.vlgmr.msra.gmra.mrb[12].mxu0 %v4947_v8  ;;  %v476_v8 = vld [vmem:[%s5755_s1 + $0xe20] sm:$0xff]  ;;  %v514_v47 = vld [vmem:[%s5755_s1 + $0xf50] sm:$0xff] }
  0xe5   :  { %3456 = vmatpush3.bf16.msra.mxu0 %v3455_v55  ;;  %1935 = vmatprep.mubr.f32.mxu0 %v815_v0  ;;  %v3463_v17 = vpack.c.bf16 %v477_v7, %v476_v8  ;;  %v533_v55 = vld [vmem:[%s5755_s1 + $0xfe8] sm:$0xff]  ;;  %v502_v0 = vld [vmem:[%s5755_s1 + $0xef0] sm:$0xff] }
  0xe6   :  { %1866 = vmatmul.mubr.f32.vlgmr.msra.gmra.mrb[12].mxu1 %v4956_v10  ;;  %3458 = vmatprep.subr.bf16.mxu0 %v3457_v57  ;;  %v509_v10 = vld [vmem:[%s5755_s1 + $0xf28] sm:$0xff]  ;;  %v3507_v57 = vpack.c.bf16 %v515_v49, %v514_v47  ;;  %v3509_v62 = vpack.c.bf16 %v533_v55, %v532_v54  ;;  %v3481_v14 = vpack.c.bf16 %v503_v1, %v502_v0  ;;  %v570_v47 = vld [vmem:[%s5755_s1 + $0x1110] sm:$0xff]  ;;  %v571_v49 = vld [vmem:[%s5755_s1 + $0x1118] sm:$0xff] }
  0xe7   :  { %3488 = vmatpush3.bf16.msra.mxu1 %v3487_v56  ;;  %2005 = vmatprep.mubr.f32.mxu1 %v816_v3  ;;  %v3495_v18 = vpack.c.bf16 %v509_v10, %v508_v9  ;;  %v3475_v56 = vpack.c.bf16 %v483_v46, %v482_v44  ;;  %v3479_v9 = vpack.c.bf16 %v485_v59, %v484_v58  ;;  %v538_v44 = vld [vmem:[%s5755_s1 + $0x1010] sm:$0xff]  ;;  %v539_v46 = vld [vmem:[%s5755_s1 + $0x1018] sm:$0xff]  ;;  %v588_v55 = vld [vmem:[%s5755_s1 + $0x11a0] sm:$0xff] }
  0xe8   :  { %3490 = vmatprep.subr.bf16.mxu1 %v3489_v60  ;;  %v516_v60 = vld [vmem:[%s5755_s1 + $0xf60] sm:$0xff]  ;;  %v3555_v58 = vpack.c.bf16 %v571_v49, %v570_v47  ;;  %v3525_v59 = vpack.c.bf16 %v557_v53, %v556_v50  ;;  %v559_v0 = vld [vmem:[%s5755_s1 + $0x10b8] sm:$0xff]  ;;  %v590_v1 = vld [vmem:[%s5755_s1 + $0x11b0] sm:$0xff] }
  0xe9   :  { %3460 = vmatpush3.bf16.msra.mxu0 %v3459_v4  ;;  %v3511_v12 = vpack.c.bf16 %v517_v63, %v516_v60  ;;  %v541_v60 = vld [vmem:[%s5755_s1 + $0x1028] sm:$0xff]  ;;  %v558_v63 = vld [vmem:[%s5755_s1 + $0x10b0] sm:$0xff]  ;;  %v548_v47 = vld [vmem:[%s5755_s1 + $0x1060] sm:$0xff] }
  0xea   :  { %3462 = vmatprep.subr.bf16.mxu0 %v3461_v6  ;;  %v535_v6 = vld [vmem:[%s5755_s1 + $0xff8] sm:$0xff]  ;;  %v580_v49 = vld [vmem:[%s5755_s1 + $0x1160] sm:$0xff] }
  0xeb   :  { %3492 = vmatpush3.bf16.msra.mxu1 %v3491_v5  ;;  %v534_v5 = vld [vmem:[%s5755_s1 + $0xff0] sm:$0xff] }
  0xec   :  { %3494 = vmatprep.subr.bf16.mxu1 %v3493_v11  ;;  %v22_v11 = vld [vmem:[%s5756_s0 + $0x40] sm:$0xff] }
  0xed   :  { %3464 = vmatpush3.bf16.msra.mxu0 %v3463_v17  ;;  %v518_v17 = vld [vmem:[%s5755_s1 + $0xf70] sm:$0xff]  ;;  %v817_v25 = vcombine.high %v22_v11, %v22_v11  ;;  %v5366_v52 = vrot.slane %v22_v11, %v3831_v13  ;;  %v575_v11 = vld [vmem:[%s5755_s1 + $0x1138] sm:$0xff] }
  0xee   :  { %3466 = vmatprep.subr.bf16.mxu0 %v3465_v19  ;;  %v3513_v19 = vpack.c.bf16 %v535_v6, %v534_v5  ;;  %v3515_v28 = vpack.c.bf16 %v519_v20, %v518_v17  ;;  %v3529_v5 = vpack.c.bf16 %v559_v0, %v558_v63  ;;  %v542_v6 = vld [vmem:[%s5755_s1 + $0x1030] sm:$0xff]  ;;  %v545_v20 = vld [vmem:[%s5755_s1 + $0x1048] sm:$0xff] }
  0xef   :  { %3496 = vmatpush3.bf16.msra.mxu1 %v3495_v18  ;;  %v5375_v39 = vrot.slane %v817_v25, %v3831_v13  ;;  %v832_v54 = vcombine.high %v5366_v52, %v5366_v52  ;;  %v563_v25 = vld [vmem:[%s5755_s1 + $0x10d8] sm:$0xff] }
  0xf0   :  { %3498 = vmatprep.subr.bf16.mxu1 %v3497_v23  ;;  %v584_v23 = vld [vmem:[%s5755_s1 + $0x1180] sm:$0xff] }
  0xf1   :  { %3468 = vmatpush3.bf16.msra.mxu0 %v3467_v29  ;;  %v3517_v29 = vpack.c.bf16 %v553_v22, %v552_v21  ;;  %v3549_v42 = vpack.c.bf16 %v585_v24, %v584_v23  ;;  %v576_v21 = vld [vmem:[%s5755_s1 + $0x1140] sm:$0xff]  ;;  %v577_v23 = vld [vmem:[%s5755_s1 + $0x1148] sm:$0xff]  ;;  %v562_v24 = vld [vmem:[%s5755_s1 + $0x10d0] sm:$0xff] }
  0xf2   :  { %3470 = vmatprep.subr.bf16.mxu0 %v3469_v30  ;;  %v537_v30 = vld [vmem:[%s5755_s1 + $0x1008] sm:$0xff] }
  0xf3   :  { %3500 = vmatpush3.bf16.msra.mxu1 %v3499_v31  ;;  %v536_v31 = vld [vmem:[%s5755_s1 + $0x1000] sm:$0xff] }
  0xf4   :  { %3502 = vmatprep.subr.bf16.mxu1 %v3501_v35  ;;  %v554_v35 = vld [vmem:[%s5755_s1 + $0x1090] sm:$0xff] }
  0xf5   :  { %3472 = vmatpush3.bf16.msra.mxu0 %v3471_v40  ;;  %v3519_v40 = vpack.c.bf16 %v537_v30, %v536_v31  ;;  %v3567_v31 = vpack.c.bf16 %v577_v23, %v576_v21  ;;  %v3537_v30 = vpack.c.bf16 %v563_v25, %v562_v24  ;;  %v618_v21 = vld [vmem:[%s5755_s1 + $0x1290] sm:$0xff]  ;;  %v651_v25 = vld [vmem:[%s5755_s1 + $0x1398] sm:$0xff] }
  0xf6   :  { %3474 = vmatprep.subr.bf16.mxu0 %v3473_v43  ;;  %v3521_v43 = vpack.c.bf16 %v555_v36, %v554_v35  ;;  %v579_v36 = vld [vmem:[%s5755_s1 + $0x1158] sm:$0xff]  ;;  %v650_v24 = vld [vmem:[%s5755_s1 + $0x1390] sm:$0xff] }
  0xf7   :  { %3504 = vmatpush3.bf16.msra.mxu1 %v3503_v41  ;;  %v2337_v61 = vpop.f32.mrb[0].mxu0  ;;  %v3551_v41 = vpack.c.bf16 %v569_v34, %v568_v32  ;;  %v546_v32 = vld [vmem:[%s5755_s1 + $0x1050] sm:$0xff] }
  0xf8   :  { %3506 = vmatprep.subr.bf16.mxu1 %v3505_v48  ;;  %v2338_v3 = vpop.f32.mrb[1].mxu0  ;;  %v3553_v48 = vpack.c.bf16 %v587_v38, %v586_v37  ;;  %v578_v34 = vld [vmem:[%s5755_s1 + $0x1150] sm:$0xff]  ;;  %v564_v37 = vld [vmem:[%s5755_s1 + $0x10e0] sm:$0xff]  ;;  %v565_v38 = vld [vmem:[%s5755_s1 + $0x10e8] sm:$0xff] }
  0xf9   :  { %v2372_v4 = vpop.f32.mrb[0].mxu1  ;;  %v2339_v8 = vadd.f32 %v2338_v3, %v2337_v61  ;;  %3476 = vmatpush3.bf16.msra.mxu0 %v3475_v56  ;;  %v589_v56 = vld [vmem:[%s5755_s1 + $0x11a8] sm:$0xff]  ;;  %v572_v61 = vld [vmem:[%s5755_s1 + $0x1120] sm:$0xff] }
  0xfa   :  { %v2373_v7 = vpop.f32.mrb[1].mxu1  ;;  %3478 = vmatprep.subr.bf16.mxu0 %v3477_v45  ;;  %v3523_v45 = vpack.c.bf16 %v539_v46, %v538_v44  ;;  %v3571_v44 = vpack.c.bf16 %v579_v36, %v578_v34  ;;  %v3541_v46 = vpack.c.bf16 %v565_v38, %v564_v37  ;;  %v635_v34 = vld [vmem:[%s5755_s1 + $0x1318] sm:$0xff]  ;;  %v621_v36 = vld [vmem:[%s5755_s1 + $0x12a8] sm:$0xff]  ;;  %v652_v38 = vld [vmem:[%s5755_s1 + $0x13a0] sm:$0xff] }
  0xfb   :  { %v2374_v10 = vadd.f32 %v2373_v7, %v2372_v4  ;;  %3508 = vmatpush3.bf16.msra.mxu1 %v3507_v57  ;;  %v958_v18 = vadd.f32 %v2339_v8, %v2303_v2  ;;  %v833_v57 = vcombine.high %v5375_v39, %v5375_v39  ;;  %v591_v2 = vld [vmem:[%s5755_s1 + $0x11b8] sm:$0xff]  ;;  %v574_v7 = vld [vmem:[%s5755_s1 + $0x1130] sm:$0xff] }
  0xfc   :  { %3510 = vmatprep.subr.bf16.mxu1 %v3509_v62  ;;  %v3557_v62 = vpack.c.bf16 %v589_v56, %v588_v55  ;;  %v543_v8 = vld [vmem:[%s5755_s1 + $0x1038] sm:$0xff]  ;;  %v3563_v17 = vpack.c.bf16 %v575_v11, %v574_v7  ;;  %v566_v55 = vld [vmem:[%s5755_s1 + $0x10f0] sm:$0xff]  ;;  %v617_v7 = vld [vmem:[%s5755_s1 + $0x1288] sm:$0xff] }
  0xfd   :  { %v5345_v26 = vadd.f32 %v2374_v10, %v958_v18  ;;  %3480 = vmatpush3.bf16.msra.mxu0 %v3479_v9  ;;  %v3561_v9 = vpack.c.bf16 %v591_v2, %v590_v1  ;;  %v560_v10 = vld [vmem:[%s5755_s1 + $0x10c0] sm:$0xff]  ;;  %v3531_v16 = vpack.c.bf16 %v543_v8, %v542_v6  ;;  %v567_v56 = vld [vmem:[%s5755_s1 + $0x10f8] sm:$0xff]  ;;  %v550_v1 = vld [vmem:[%s5755_s1 + $0x1070] sm:$0xff] }
  0xfe   :  { %3482 = vmatprep.subr.bf16.mxu0 %v3481_v14  ;;  %v592_v14 = vld [vmem:[%s5755_s1 + $0x11c0] sm:$0xff]  ;;  %v3545_v0 = vpack.c.bf16 %v567_v56, %v566_v55  ;;  %v551_v2 = vld [vmem:[%s5755_s1 + $0x1078] sm:$0xff] }
  0xff   :  { %3512 = vmatpush3.bf16.msra.mxu1 %v3511_v12  ;;  %v561_v12 = vld [vmem:[%s5755_s1 + $0x10c8] sm:$0xff]  ;;  %v3565_v22 = vpack.c.bf16 %v593_v15, %v592_v14  ;;  %v583_v6 = vld [vmem:[%s5755_s1 + $0x1178] sm:$0xff]  ;;  %v616_v8 = vld [vmem:[%s5755_s1 + $0x1280] sm:$0xff] }
 0x100   :  { %3514 = vmatprep.subr.bf16.mxu1 %v3513_v19  ;;  %v3533_v18 = vpack.c.bf16 %v561_v12, %v560_v10  ;;  %v544_v19 = vld [vmem:[%s5755_s1 + $0x1040] sm:$0xff]  ;;  %v3547_v12 = vpack.c.bf16 %v551_v2, %v550_v1  ;;  %v3581_v15 = vpack.c.bf16 %v617_v7, %v616_v8  ;;  %v655_v55 = vld [vmem:[%s5755_s1 + $0x13b8] sm:$0xff]  ;;  %v641_v7 = vld [vmem:[%s5755_s1 + $0x1348] sm:$0xff] }
 0x101   :  { %3484 = vmatpush3.bf16.msra.mxu0 %v3483_v27  ;;  %v594_v27 = vld [vmem:[%s5755_s1 + $0x11d0] sm:$0xff] }
 0x102   :  { %3518 = vmatprep.subr.bf16.mxu0 %v3517_v29  ;;  %v3535_v29 = vpack.c.bf16 %v545_v20, %v544_v19  ;;  %v633_v20 = vld [vmem:[%s5755_s1 + $0x1308] sm:$0xff] }
 0x103   :  { %3516 = vmatpush3.bf16.msra.mxu1 %v3515_v28  ;;  %v595_v28 = vld [vmem:[%s5755_s1 + $0x11d8] sm:$0xff] }
 0x104   :  { %3550 = vmatprep.subr.bf16.mxu1 %v3549_v42  ;;  %1936 = vmatmul.mubr.f32.vlgmr.msra.gmra.mrb[14].mxu0 %v5154_v51  ;;  %v540_v51 = vld [vmem:[%s5755_s1 + $0x1020] sm:$0xff]  ;;  %v547_v42 = vld [vmem:[%s5755_s1 + $0x1058] sm:$0xff]  ;;  %v3569_v35 = vpack.c.bf16 %v595_v28, %v594_v27 }
 0x105   :  { %3520 = vmatpush3.bf16.msra.mxu0 %v3519_v40  ;;  %2075 = vmatprep.mubr.f32.mxu0 %v832_v54  ;;  %v3527_v3 = vpack.c.bf16 %v541_v60, %v540_v51  ;;  %v596_v40 = vld [vmem:[%s5755_s1 + $0x11e0] sm:$0xff]  ;;  %v581_v54 = vld [vmem:[%s5755_s1 + $0x1168] sm:$0xff] }
 0x106   :  { %2006 = vmatmul.mubr.f32.vlgmr.msra.gmra.mrb[14].mxu1 %v5163_v33  ;;  %3522 = vmatprep.subr.bf16.mxu0 %v3521_v43  ;;  %v573_v33 = vld [vmem:[%s5755_s1 + $0x1128] sm:$0xff]  ;;  %v3539_v43 = vpack.c.bf16 %v547_v42, %v546_v32  ;;  %v3575_v63 = vpack.c.bf16 %v581_v54, %v580_v49  ;;  %v603_v32 = vld [vmem:[%s5755_s1 + $0x1218] sm:$0xff]  ;;  %v634_v42 = vld [vmem:[%s5755_s1 + $0x1310] sm:$0xff] }
 0x107   :  { %3552 = vmatpush3.bf16.msra.mxu1 %v3551_v41  ;;  %2145 = vmatprep.mubr.f32.mxu1 %v833_v57  ;;  %v3559_v4 = vpack.c.bf16 %v573_v33, %v572_v61  ;;  %v597_v41 = vld [vmem:[%s5755_s1 + $0x11e8] sm:$0xff]  ;;  %v654_v54 = vld [vmem:[%s5755_s1 + $0x13b0] sm:$0xff] }
 0x108   :  { %3554 = vmatprep.subr.bf16.mxu1 %v3553_v48  ;;  %v549_v48 = vld [vmem:[%s5755_s1 + $0x1068] sm:$0xff]  ;;  %v3573_v53 = vpack.c.bf16 %v597_v41, %v596_v40 }
 0x109   :  { %3524 = vmatpush3.bf16.msra.mxu0 %v3523_v45  ;;  %v3543_v61 = vpack.c.bf16 %v549_v48, %v548_v47  ;;  %v653_v40 = vld [vmem:[%s5755_s1 + $0x13a8] sm:$0xff]  ;;  %v636_v48 = vld [vmem:[%s5755_s1 + $0x1320] sm:$0xff] }
 0x10a   :  { %3526 = vmatprep.subr.bf16.mxu0 %v3525_v59  ;;  %v599_v59 = vld [vmem:[%s5755_s1 + $0x11f8] sm:$0xff]  ;;  %v605_v47 = vld [vmem:[%s5755_s1 + $0x1228] sm:$0xff]  ;;  %v3621_v49 = vpack.c.bf16 %v653_v40, %v652_v38 }
 0x10b   :  { %3556 = vmatpush3.bf16.msra.mxu1 %v3555_v58  ;;  %v598_v58 = vld [vmem:[%s5755_s1 + $0x11f0] sm:$0xff]  ;;  %v631_v38 = vld [vmem:[%s5755_s1 + $0x12f8] sm:$0xff] }
 0x10c   :  { %3558 = vmatprep.subr.bf16.mxu1 %v3557_v62  ;;  %v23_v62 = vld [vmem:[%s5756_s0 + $0x48] sm:$0xff] }
 0x10d   :  { %3528 = vmatpush3.bf16.msra.mxu0 %v3527_v3  ;;  %v582_v3 = vld [vmem:[%s5755_s1 + $0x1170] sm:$0xff]  ;;  %v834_v11 = vcombine.high %v23_v62, %v23_v62  ;;  %v5576_v23 = vrot.slane %v23_v62, %v3831_v13  ;;  %v624_v62 = vld [vmem:[%s5755_s1 + $0x12c0] sm:$0xff] }
 0x10e   :  { %3530 = vmatprep.subr.bf16.mxu0 %v3529_v5  ;;  %v3577_v5 = vpack.c.bf16 %v599_v59, %v598_v58  ;;  %v3579_v14 = vpack.c.bf16 %v583_v6, %v582_v3  ;;  %v606_v58 = vld [vmem:[%s5755_s1 + $0x1230] sm:$0xff]  ;;  %v607_v59 = vld [vmem:[%s5755_s1 + $0x1238] sm:$0xff]  ;;  %v640_v6 = vld [vmem:[%s5755_s1 + $0x1340] sm:$0xff] }
 0x10f   :  { %3560 = vmatpush3.bf16.msra.mxu1 %v3559_v4  ;;  %v5585_v27 = vrot.slane %v834_v11, %v3831_v13  ;;  %v3617_v13 = vpack.c.bf16 %v651_v25, %v650_v24  ;;  %v849_v37 = vcombine.high %v5576_v23, %v5576_v23  ;;  %v3595_v1 = vpack.c.bf16 %v607_v59, %v606_v58  ;;  %v658_v11 = vld [vmem:[%s5755_s1 + $0x13d0] sm:$0xff]  ;;  %v629_v24 = vld [vmem:[%s5755_s1 + $0x12e8] sm:$0xff]  ;;  %v660_v25 = vld [vmem:[%s5755_s1 + $0x13e0] sm:$0xff] }
 0x110   :  { %3562 = vmatprep.subr.bf16.mxu1 %v3561_v9  ;;  %v648_v9 = vld [vmem:[%s5755_s1 + $0x1380] sm:$0xff] }
 0x111   :  { %3532 = vmatpush3.bf16.msra.mxu0 %v3531_v16  ;;  %v600_v16 = vld [vmem:[%s5755_s1 + $0x1200] sm:$0xff]  ;;  %v850_v41 = vcombine.high %v5585_v27, %v5585_v27 }
 0x112   :  { %3534 = vmatprep.subr.bf16.mxu0 %v3533_v18  ;;  %v632_v18 = vld [vmem:[%s5755_s1 + $0x1300] sm:$0xff] }
 0x113   :  { %3564 = vmatpush3.bf16.msra.mxu1 %v3563_v17  ;;  %v601_v17 = vld [vmem:[%s5755_s1 + $0x1208] sm:$0xff] }
 0x114   :  { %3566 = vmatprep.subr.bf16.mxu1 %v3565_v22  ;;  %v619_v22 = vld [vmem:[%s5755_s1 + $0x1298] sm:$0xff]  ;;  %v3583_v28 = vpack.c.bf16 %v601_v17, %v600_v16  ;;  %v610_v17 = vld [vmem:[%s5755_s1 + $0x1250] sm:$0xff] }
 0x115   :  { %3536 = vmatpush3.bf16.msra.mxu0 %v3535_v29  ;;  %v3615_v29 = vpack.c.bf16 %v633_v20, %v632_v18  ;;  %v611_v18 = vld [vmem:[%s5755_s1 + $0x1258] sm:$0xff] }
 0x116   :  { %3538 = vmatprep.subr.bf16.mxu0 %v3537_v30  ;;  %v602_v30 = vld [vmem:[%s5755_s1 + $0x1210] sm:$0xff] }
 0x117   :  { %3568 = vmatpush3.bf16.msra.mxu1 %v3567_v31  ;;  %v2407_v50 = vpop.f32.mrb[2].mxu0  ;;  %v3585_v31 = vpack.c.bf16 %v619_v22, %v618_v21  ;;  %v643_v21 = vld [vmem:[%s5755_s1 + $0x1358] sm:$0xff]  ;;  %v628_v22 = vld [vmem:[%s5755_s1 + $0x12e0] sm:$0xff] }
 0x118   :  { %3570 = vmatprep.subr.bf16.mxu1 %v3569_v35  ;;  %v2408_v57 = vpop.f32.mrb[3].mxu0  ;;  %v620_v35 = vld [vmem:[%s5755_s1 + $0x12a0] sm:$0xff] }
 0x119   :  { %v2442_v45 = vpop.f32.mrb[2].mxu1  ;;  %v2409_v51 = vadd.f32 %v2408_v57, %v2407_v50  ;;  %3540 = vmatpush3.bf16.msra.mxu0 %v3539_v43  ;;  %v3587_v43 = vpack.c.bf16 %v603_v32, %v602_v30  ;;  %v622_v50 = vld [vmem:[%s5755_s1 + $0x12b0] sm:$0xff]  ;;  %v3605_v30 = vpack.c.bf16 %v629_v24, %v628_v22  ;;  %v612_v32 = vld [vmem:[%s5755_s1 + $0x1260] sm:$0xff] }
 0x11a   :  { %v2443_v60 = vpop.f32.mrb[3].mxu1  ;;  %3542 = vmatprep.subr.bf16.mxu0 %v3541_v46  ;;  %v3589_v46 = vpack.c.bf16 %v621_v36, %v620_v35  ;;  %v645_v36 = vld [vmem:[%s5755_s1 + $0x1368] sm:$0xff] }
 0x11b   :  { %v2444_v33 = vadd.f32 %v2443_v60, %v2442_v45  ;;  %3572 = vmatpush3.bf16.msra.mxu1 %v3571_v44  ;;  %v1098_v4 = vadd.f32 %v2409_v51, %v5345_v26  ;;  %v649_v26 = vld [vmem:[%s5755_s1 + $0x1388] sm:$0xff]  ;;  %v3619_v44 = vpack.c.bf16 %v635_v34, %v634_v42  ;;  %v638_v51 = vld [vmem:[%s5755_s1 + $0x1330] sm:$0xff]  ;;  %v3625_v60 = vpack.c.bf16 %v655_v55, %v654_v54 }
 0x11c   :  { %3574 = vmatprep.subr.bf16.mxu1 %v3573_v53  ;;  %v3613_v19 = vpack.c.bf16 %v649_v26, %v648_v9  ;;  %v623_v53 = vld [vmem:[%s5755_s1 + $0x12b8] sm:$0xff]  ;;  %v626_v9 = vld [vmem:[%s5755_s1 + $0x12d0] sm:$0xff]  ;;  %v613_v42 = vld [vmem:[%s5755_s1 + $0x1268] sm:$0xff] }
 0x11d   :  { %v5555_v10 = vadd.f32 %v2444_v33, %v1098_v4  ;;  %3544 = vmatpush3.bf16.msra.mxu0 %v3543_v61  ;;  %v3593_v45 = vpack.c.bf16 %v623_v53, %v622_v50  ;;  %v639_v61 = vld [vmem:[%s5755_s1 + $0x1338] sm:$0xff]  ;;  %v625_v33 = vld [vmem:[%s5755_s1 + $0x12c8] sm:$0xff]  ;;  %v608_v4 = vld [vmem:[%s5755_s1 + $0x1240] sm:$0xff] }
 0x11e   :  { %3546 = vmatprep.subr.bf16.mxu0 %v3545_v0  ;;  %v657_v0 = vld [vmem:[%s5755_s1 + $0x13c8] sm:$0xff]  ;;  %v3627_v2 = vpack.c.bf16 %v639_v61, %v638_v51  ;;  %v3597_v3 = vpack.c.bf16 %v625_v33, %v624_v62  ;;  %v627_v26 = vld [vmem:[%s5755_s1 + $0x12d8] sm:$0xff]  ;;  %v614_v50 = vld [vmem:[%s5755_s1 + $0x1270] sm:$0xff] }
 0x11f   :  { %3576 = vmatpush3.bf16.msra.mxu1 %v3575_v63  ;;  %v656_v63 = vld [vmem:[%s5755_s1 + $0x13c0] sm:$0xff]  ;;  %v3601_v16 = vpack.c.bf16 %v627_v26, %v626_v9  ;;  %v615_v53 = vld [vmem:[%s5755_s1 + $0x1278] sm:$0xff] }
 0x120   :  { %3578 = vmatprep.subr.bf16.mxu1 %v3577_v5  ;;  %v609_v5 = vld [vmem:[%s5755_s1 + $0x1248] sm:$0xff]  ;;  %v3629_v8 = vpack.c.bf16 %v657_v0, %v656_v63  ;;  %v3611_v58 = vpack.c.bf16 %v615_v53, %v614_v50 }
 0x121   :  { %3548 = vmatpush3.bf16.msra.mxu0 %v3547_v12  ;;  %v659_v12 = vld [vmem:[%s5755_s1 + $0x13d8] sm:$0xff] }
 0x122   :  { %3582 = vmatprep.subr.bf16.mxu0 %v3581_v15  ;;  %v3631_v15 = vpack.c.bf16 %v641_v7, %v640_v6  ;;  %v3633_v20 = vpack.c.bf16 %v659_v12, %v658_v11 }
 0x123   :  { %3580 = vmatpush3.bf16.msra.mxu1 %v3579_v14  ;;  %v3599_v14 = vpack.c.bf16 %v609_v5, %v608_v4 }
 0x124   :  { %3614 = vmatprep.subr.bf16.mxu1 %v3613_v19  ;;  %2076 = vmatmul.mubr.f32.vlgmr.msra.gmra.mrb[16].mxu0 %v5366_v52  ;;  %v604_v52 = vld [vmem:[%s5755_s1 + $0x1220] sm:$0xff]  ;;  %v642_v19 = vld [vmem:[%s5755_s1 + $0x1350] sm:$0xff] }
 0x125   :  { %3584 = vmatpush3.bf16.msra.mxu0 %v3583_v28  ;;  %2215 = vmatprep.mubr.f32.mxu0 %v849_v37  ;;  %v3591_v56 = vpack.c.bf16 %v605_v47, %v604_v52  ;;  %v661_v28 = vld [vmem:[%s5755_s1 + $0x13e8] sm:$0xff]  ;;  %v630_v37 = vld [vmem:[%s5755_s1 + $0x12f0] sm:$0xff]  ;;  %v3607_v47 = vpack.c.bf16 %v613_v42, %v612_v32 }
 0x126   :  { %2146 = vmatmul.mubr.f32.vlgmr.msra.gmra.mrb[16].mxu1 %v5375_v39  ;;  %3586 = vmatprep.subr.bf16.mxu0 %v3585_v31  ;;  %v637_v39 = vld [vmem:[%s5755_s1 + $0x1328] sm:$0xff]  ;;  %v3635_v31 = vpack.c.bf16 %v643_v21, %v642_v19  ;;  %v3637_v35 = vpack.c.bf16 %v661_v28, %v660_v25 }
 0x127   :  { %3616 = vmatpush3.bf16.msra.mxu1 %v3615_v29  ;;  %2285 = vmatprep.mubr.f32.mxu1 %v850_v41  ;;  %v3623_v57 = vpack.c.bf16 %v637_v39, %v636_v48  ;;  %v3603_v29 = vpack.c.bf16 %v611_v18, %v610_v17  ;;  %v3609_v39 = vpack.c.bf16 %v631_v38, %v630_v37 }
 0x128   :  { %3618 = vmatprep.subr.bf16.mxu1 %v3617_v13  ;;  %v644_v13 = vld [vmem:[%s5755_s1 + $0x1360] sm:$0xff] }
 0x129   :  { %3588 = vmatpush3.bf16.msra.mxu0 %v3587_v43  ;;  %v662_v43 = vld [vmem:[%s5755_s1 + $0x13f0] sm:$0xff] }
 0x12a   :  { %3590 = vmatprep.subr.bf16.mxu0 %v3589_v46 }
 0x12b   :  { %3620 = vmatpush3.bf16.msra.mxu1 %v3619_v44  ;;  %v663_v44 = vld [vmem:[%s5755_s1 + $0x13f8] sm:$0xff] }
 0x12c   :  { %3622 = vmatprep.subr.bf16.mxu1 %v3621_v49  ;;  %v3639_v49 = vpack.c.bf16 %v645_v36, %v644_v13  ;;  %v3641_v55 = vpack.c.bf16 %v663_v44, %v662_v43 }
 0x12d   :  { %3592 = vmatpush3.bf16.msra.mxu0 %v3591_v56  ;;  %v646_v56 = vld [vmem:[%s5755_s1 + $0x1370] sm:$0xff] }
 0x12e   :  { %3594 = vmatprep.subr.bf16.mxu0 %v3593_v45 }
 0x12f   :  { %3624 = vmatpush3.bf16.msra.mxu1 %v3623_v57  ;;  %v647_v57 = vld [vmem:[%s5755_s1 + $0x1378] sm:$0xff] }
 0x130   :  { %3626 = vmatprep.subr.bf16.mxu1 %v3625_v60  ;;  %v3643_v59 = vpack.c.bf16 %v647_v57, %v646_v56 }
 0x131   :  { %3596 = vmatpush3.bf16.msra.mxu0 %v3595_v1 }
 0x132   :  { %3598 = vmatprep.subr.bf16.mxu0 %v3597_v3 }
 0x133   :  { %3628 = vmatpush3.bf16.msra.mxu1 %v3627_v2 }
 0x134   :  { %3630 = vmatprep.subr.bf16.mxu1 %v3629_v8 }
 0x135   :  { %3600 = vmatpush3.bf16.msra.mxu0 %v3599_v14 }
 0x136   :  { %3602 = vmatprep.subr.bf16.mxu0 %v3601_v16 }
 0x137   :  { %3632 = vmatpush3.bf16.msra.mxu1 %v3631_v15  ;;  %v2477_v34 = vpop.f32.mrb[4].mxu0 }
 0x138   :  { %3634 = vmatprep.subr.bf16.mxu1 %v3633_v20  ;;  %v2478_v40 = vpop.f32.mrb[5].mxu0 }
 0x139   :  { %v2512_v41 = vpop.f32.mrb[4].mxu1  ;;  %v2479_v46 = vadd.f32 %v2478_v40, %v2477_v34  ;;  %3604 = vmatpush3.bf16.msra.mxu0 %v3603_v29 }
 0x13a   :  { %v2513_v52 = vpop.f32.mrb[5].mxu1  ;;  %3606 = vmatprep.subr.bf16.mxu0 %v3605_v30 }
 0x13b   :  { %v2514_v48 = vadd.f32 %v2513_v52, %v2512_v41  ;;  %3636 = vmatpush3.bf16.msra.mxu1 %v3635_v31  ;;  %v1238_v54 = vadd.f32 %v2479_v46, %v5555_v10 }
 0x13c   :  { %3638 = vmatprep.subr.bf16.mxu1 %v3637_v35 }
 0x13d   :  { %v1308_v45 = vadd.f32 %v2514_v48, %v1238_v54  ;;  %3608 = vmatpush3.bf16.msra.mxu0 %v3607_v47 }
 0x13e   :  { %3610 = vmatprep.subr.bf16.mxu0 %v3609_v39 }
 0x13f   :  { %3640 = vmatpush3.bf16.msra.mxu1 %v3639_v49 }
 0x140   :  { %3642 = vmatprep.subr.bf16.mxu1 %v3641_v55 }
 0x141   :  { %3612 = vmatpush3.bf16.msra.mxu0 %v3611_v58 }
 0x143   :  { %3644 = vmatpush3.bf16.msra.mxu1 %v3643_v59 }
 0x144   :  { %2216 = vmatmul.mubr.f32.vlgmr.msra.gmra.mrb[18].mxu0 %v5576_v23 }
 0x146   :  { %2286 = vmatmul.mubr.f32.vlgmr.msra.gmra.mrb[18].mxu1 %v5585_v27 }
 0x157   :  { %v2547_v10 = vpop.f32.mrb[6].mxu0 }
 0x158   :  { %v2548_v51 = vpop.f32.mrb[7].mxu0 }
 0x159   :  { %v2582_v60 = vpop.f32.mrb[6].mxu1  ;;  %v2549_v61 = vadd.f32 %v2548_v51, %v2547_v10 }
 0x15a   :  { %v2583_v62 = vpop.f32.mrb[7].mxu1 }
 0x15b   :  { %v2584_v33 = vadd.f32 %v2583_v62, %v2582_v60  ;;  %v1378_v63 = vadd.f32 %v2549_v61, %v1308_v45 }
 0x15d   :  { %v1448_v0 = vadd.f32 %v2584_v33, %v1378_v63 }
 0x177   :  { %v2617_v1 = vpop.f32.mrb[8].mxu0 }
 0x178   :  { %v2618_v2 = vpop.f32.mrb[9].mxu0 }
 0x179   :  { %v2652_v3 = vpop.f32.mrb[8].mxu1  ;;  %v2619_v4 = vadd.f32 %v2618_v2, %v2617_v1 }
 0x17a   :  { %v2653_v5 = vpop.f32.mrb[9].mxu1 }
 0x17b   :  { %v2654_v6 = vadd.f32 %v2653_v5, %v2652_v3  ;;  %v1518_v8 = vadd.f32 %v2619_v4, %v1448_v0 }
 0x17d   :  { %v1588_v7 = vadd.f32 %v2654_v6, %v1518_v8 }
 0x197   :  { %v2687_v9 = vpop.f32.mrb[10].mxu0 }
 0x198   :  { %v2688_v23 = vpop.f32.mrb[11].mxu0 }
 0x199   :  { %v2722_v26 = vpop.f32.mrb[10].mxu1  ;;  %v2689_v27 = vadd.f32 %v2688_v23, %v2687_v9 }
 0x19a   :  { %v2723_v11 = vpop.f32.mrb[11].mxu1 }
 0x19b   :  { %v2724_v12 = vadd.f32 %v2723_v11, %v2722_v26  ;;  %v1658_v14 = vadd.f32 %v2689_v27, %v1588_v7 }
 0x19d   :  { %v1728_v15 = vadd.f32 %v2724_v12, %v1658_v14 }
 0x1b7   :  { %v2757_v16 = vpop.f32.mrb[12].mxu0 }
 0x1b8   :  { %v2758_v17 = vpop.f32.mrb[13].mxu0 }
 0x1b9   :  { %v2792_v18 = vpop.f32.mrb[12].mxu1  ;;  %v2759_v19 = vadd.f32 %v2758_v17, %v2757_v16 }
 0x1ba   :  { %v2793_v20 = vpop.f32.mrb[13].mxu1 }
 0x1bb   :  { %v2794_v21 = vadd.f32 %v2793_v20, %v2792_v18  ;;  %v1798_v22 = vadd.f32 %v2759_v19, %v1728_v15 }
 0x1bd   :  { %v1868_v24 = vadd.f32 %v2794_v21, %v1798_v22 }
 0x1d7   :  { %v2827_v25 = vpop.f32.mrb[14].mxu0 }
 0x1d8   :  { %v2828_v28 = vpop.f32.mrb[15].mxu0 }
 0x1d9   :  { %v2862_v29 = vpop.f32.mrb[14].mxu1  ;;  %v2829_v31 = vadd.f32 %v2828_v28, %v2827_v25 }
 0x1da   :  { %v2863_v30 = vpop.f32.mrb[15].mxu1 }
 0x1db   :  { %v2864_v32 = vadd.f32 %v2863_v30, %v2862_v29  ;;  %v1938_v42 = vadd.f32 %v2829_v31, %v1868_v24 }
 0x1dd   :  { %v2008_v13 = vadd.f32 %v2864_v32, %v1938_v42 }
 0x1f7   :  { %v2897_v34 = vpop.f32.mrb[16].mxu0 }
 0x1f8   :  { %v2898_v35 = vpop.f32.mrb[17].mxu0 }
 0x1f9   :  { %v2932_v36 = vpop.f32.mrb[16].mxu1  ;;  %v2899_v37 = vadd.f32 %v2898_v35, %v2897_v34 }
 0x1fa   :  { %v2933_v38 = vpop.f32.mrb[17].mxu1 }
 0x1fb   :  { %v2934_v40 = vadd.f32 %v2933_v38, %v2932_v36  ;;  %v2078_v41 = vadd.f32 %v2899_v37, %v2008_v13 }
 0x1fd   :  { %v2148_v43 = vadd.f32 %v2934_v40, %v2078_v41 }
 0x217   :  { %v2967_v44 = vpop.f32.mrb[18].mxu0 }
 0x218   :  { %v2968_v46 = vpop.f32.mrb[19].mxu0 }
 0x219   :  { %v3002_v52 = vpop.f32.mrb[18].mxu1  ;;  %v2969_v47 = vadd.f32 %v2968_v46, %v2967_v44 }
 0x21a   :  { %v3003_v48 = vpop.f32.mrb[19].mxu1 }
 0x21b   :  { %v3004_v49 = vadd.f32 %v3003_v48, %v3002_v52  ;;  %v2218_v39 = vadd.f32 %v2969_v47, %v2148_v43 }
 0x21d   :  { %v2288_v50 = vadd.f32 %v3004_v49, %v2218_v39 }
 0x21f   :  { %v2304_v53 = vmul.f32 -1.442695, %v2288_v50 }
 0x221   :  { %3656 = vpow2.f32 %v2304_v53 }
 0x22b   :  { %v3657_v54 = vpop.eup %3656 }
 0x22c   :  { %v2294_v55 = vadd.f32 1.0, %v3657_v54 }
 0x22e   :  { %3658 = vrcp.f32 %v2294_v55 }
 0x238   :  { %v3659_v56 = vpop.eup %3658 }
 0x239   :  { %2298 = vst.msk [vmem:[%s5758_s3] sm:$0x3] %vm2297_vm0, %v3659_v56 }

</bundles_post_ra>
